<compile_context>
chip_gen: v5e
topology: v5e:2x2
jax: 0.10.0
libtpu: 0.0.40
codegen_flags: <defaults>
</compile_context>

<pallas_src>
import jax
import jax.numpy as jnp
import numpy as np
from jax.experimental import pallas as pl
from jax.experimental.pallas import tpu as pltpu

KSIZE = 5
PAD = 4          # left causal pad (padding=4 then [:, :, :-4])
N_CONVS = 5      # conv1 + 3 middle convs + conv2
HALO = 24        # >= N_CONVS * PAD = 20, rounded up to a multiple of 8 sublanes


def _round_up(v, m):
    return (v + m - 1) // m * m


def _causal_conv(pad_ref, taps_ref, w, layer=None):
    """pad_ref: (w+PAD, Cin) bf16 scratch; rows 0..PAD-1 hold the causal zero
    pad, rows PAD..PAD+w-1 the layer input.  taps_ref: bf16 weight Ref of shape
    (5, Cin, Cout) (or (3, 5, Cin, Cout) indexed by `layer`).  Each tap slice is
    streamed from VMEM straight into the MXU; accumulation is f32."""
    acc = None
    for k in range(KSIZE):                      # static unroll over the 5 taps
        lhs = pad_ref[pl.ds(k, w), :]           # bf16 shifted window, no cast
        tap = taps_ref[k] if layer is None else taps_ref[layer, k]
        d = jnp.dot(lhs, tap, preferred_element_type=jnp.float32)
        acc = d if acc is None else acc + d
    return acc


def postconvnet_kernel(xb_ref, xh_ref, wout_ref, bout_ref,
                       c1w_ref, pre_s_ref, pre_b_ref,
                       cw_ref, bns_ref, bnb_ref,
                       c2w_ref, c2b_ref,
                       mel_ref, out_ref,
                       pad_m, pad_h):
    t_tile = out_ref.shape[0]
    w = t_tile + HALO
    first_tile = pl.program_id(1) == 0

    # Zero the causal-pad rows once per grid step (shared by all 5 convs).
    pad_m[pl.ds(0, PAD), :] = jnp.zeros((PAD, pad_m.shape[1]), pad_m.dtype)
    pad_h[pl.ds(0, PAD), :] = jnp.zeros((PAD, pad_h.shape[1]), pad_h.dtype)

    # mel_pred = Linear(num_hidden -> mel_dim*reduction): bf16 MXU, f32 acc.
    # Body (this tile's frames) and halo (previous HALO frames, recomputed so
    # tiles stay independent) are handled separately.
    mel_body = jnp.dot(xb_ref[...], wout_ref[...],
                       preferred_element_type=jnp.float32) + bout_ref[...]
    mel_halo = jnp.dot(xh_ref[...], wout_ref[...],
                       preferred_element_type=jnp.float32) + bout_ref[...]
    mel_ref[...] = mel_body.astype(mel_ref.dtype)
    out_ref[...] = mel_body.astype(out_ref.dtype)   # residual base, re-read at end

    pad_m[pl.ds(PAD, HALO), :] = mel_halo.astype(pad_m.dtype)
    pad_m[pl.ds(PAD + HALO, t_tile), :] = mel_body.astype(pad_m.dtype)

    @pl.when(first_tile)
    def _():   # frames left of the sequence start are zero at every conv input
        pad_m[pl.ds(PAD, HALO), :] = jnp.zeros((HALO, pad_m.shape[1]), pad_m.dtype)

    # conv1 -> folded (BN + conv bias) -> tanh  (dropout == identity, eval mode)
    h = _causal_conv(pad_m, c1w_ref, w)
    h = jnp.tanh(h * pre_s_ref[...] + pre_b_ref[...])

    # 3 x (conv -> folded (BN + conv bias) -> tanh)
    for i in range(3):
        pad_h[pl.ds(PAD, w), :] = h.astype(pad_h.dtype)

        @pl.when(first_tile)
        def _():
            pad_h[pl.ds(PAD, HALO), :] = jnp.zeros((HALO, pad_h.shape[1]),
                                                   pad_h.dtype)

        h = _causal_conv(pad_h, cw_ref, w, layer=i)
        h = jnp.tanh(h * bns_ref[i] + bnb_ref[i])

    # conv2 -> residual add with mel_pred (already stored in out_ref)
    pad_h[pl.ds(PAD, w), :] = h.astype(pad_h.dtype)

    @pl.when(first_tile)
    def _():
        pad_h[pl.ds(PAD, HALO), :] = jnp.zeros((HALO, pad_h.shape[1]), pad_h.dtype)

    res = _causal_conv(pad_h, c2w_ref, w) + c2b_ref[...]
    out_ref[...] = out_ref[...] + res[HALO:, :].astype(out_ref.dtype)


def _bn_fold(gamma, beta, mean, var, eps=1e-5):
    scale = gamma / jnp.sqrt(var + eps)
    shift = beta - mean * scale
    return scale, shift


def _vmem_capacity_bytes():
    try:
        return int(getattr(pltpu.get_tpu_info(), "vmem_capacity_bytes", 64 << 20))
    except Exception:
        return 64 << 20


def postconvnet_forward(x, p, *, max_t_tile=None):
    """x: (B, T, num_hidden) -> (mel_pred (B,T,M), out (B,T,M))."""
    B, T, H = x.shape
    M = p["w_out"].shape[0]
    HP = _round_up(H, 128)        # lane-dense hidden width
    MP = _round_up(M, 128)        # lane-dense mel width (dense output stores)
    bf16, f32 = jnp.bfloat16, jnp.float32

    # Generation-aware time tiling: larger tiles where VMEM allows (amortizes
    # the HALO recompute and per-grid-step fixed overhead).
    vmem_cap = _vmem_capacity_bytes()
    if max_t_tile is None:
        max_t_tile = 512 if vmem_cap >= (96 << 20) else 384
    t_tile = min(_round_up(T, 8), max_t_tile)
    if B == 1:                    # v7x: keep both TensorCores busy when B == 1
        half = _round_up(-(-T // 2), 8)
        if half >= 4 * HALO:
            t_tile = min(t_tile, half)
    t_pad = _round_up(T, t_tile)
    nt = t_pad // t_tile
    w = t_tile + HALO

    # Input body: single lane-dense bf16 copy (channel pad + dtype cast); read
    # by the kernel with a plain blocked BlockSpec (no windowed duplication).
    x_body = jnp.zeros((B, t_pad, HP), bf16)
    x_body = x_body.at[:, :T, :H].set(x.astype(bf16))
    # Halo: only HALO frames per tile (tile 0's halo rows are zeroed in-kernel).
    halo_idx = np.arange(nt)[:, None] * t_tile - HALO + np.arange(HALO)[None, :]
    halo_idx = np.maximum(halo_idx, 0)
    x_halo = x_body[:, halo_idx, :]                       # (B, nt, HALO, HP)

    # Parameters: channels-last taps, zero-padded to lane-dense widths, bf16
    # matmul operands, f32 folded-BN / bias vectors.  Conv biases of conv1 and
    # the middle convs are folded into the following BN shift.
    def padc(a, rows, cols):
        return jnp.pad(a, ((0, 0),) * (a.ndim - 2) +
                          ((0, rows - a.shape[-2]), (0, cols - a.shape[-1])))

    def padv(v, cols):
        return jnp.pad(v, (0, cols - v.shape[0])).reshape(1, cols).astype(f32)

    wout_t = padc(p["w_out"].T, HP, MP).astype(bf16)                         # (HP, MP)
    bout = padv(p["b_out"], MP)
    c1w = padc(jnp.transpose(p["conv1_w"], (2, 1, 0)), MP, HP).astype(bf16)  # (5,MP,HP)
    cw = jnp.stack([padc(jnp.transpose(wi, (2, 1, 0)), HP, HP)
                    for wi in p["convs_w"]]).astype(bf16)                    # (3,5,HP,HP)
    c2w = padc(jnp.transpose(p["conv2_w"], (2, 1, 0)), HP, MP).astype(bf16)  # (5,HP,MP)
    c2b = padv(p["conv2_b"], MP)

    pre_s, pre_b = _bn_fold(*p["bn_pre"])
    pre_b = pre_b + pre_s * p["conv1_b"]          # fold conv1 bias into BN shift
    pre_s_p, pre_b_p = padv(pre_s, HP), padv(pre_b, HP)
    bn_sb = [_bn_fold(*bn) for bn in p["bn_list"]]
    bns = jnp.stack([padv(s, HP) for s, _ in bn_sb])                         # (3,1,HP)
    bnb = jnp.stack([padv(b + s * bi, HP)
                     for (s, b), bi in zip(bn_sb, p["convs_b"])])            # (3,1,HP)

    weights = (wout_t, bout, c1w, pre_s_p, pre_b_p, cw, bns, bnb, c2w, c2b)
    weight_bytes = sum(int(a.size) * a.dtype.itemsize for a in weights)
    io_bytes = 2 * ((t_tile + HALO) * HP * 2                 # bf16 input tiles
                    + 2 * t_tile * MP * x.dtype.itemsize)    # 2 output tiles
    scratch_bytes = (w + PAD) * (MP + HP) * 2                # bf16 pads

    def build_and_run(single_buffer_weights):
        def const_spec(shape):
            n = len(shape)
            idx = lambda *_, n=n: (0,) * n     # grid-invariant: no re-DMA
            if single_buffer_weights:
                return pl.BlockSpec(shape, idx, pipeline_mode=pl.Buffered(1))
            return pl.BlockSpec(shape, idx)

        wbuf = 1 if single_buffer_weights else 2
        need = wbuf * weight_bytes + io_bytes + scratch_bytes
        vmem_limit = int(min(max(need + (8 << 20), 16 << 20), (vmem_cap * 4) // 5))

        in_specs = [
            pl.BlockSpec((None, t_tile, HP), lambda b, t: (b, t, 0)),         # body
            pl.BlockSpec((None, None, HALO, HP), lambda b, t: (b, t, 0, 0)),  # halo
            const_spec((HP, MP)), const_spec((1, MP)),
            const_spec((KSIZE, MP, HP)), const_spec((1, HP)), const_spec((1, HP)),
            const_spec((3, KSIZE, HP, HP)), const_spec((3, 1, HP)),
            const_spec((3, 1, HP)),
            const_spec((KSIZE, HP, MP)), const_spec((1, MP)),
        ]
        out_specs = [pl.BlockSpec((None, t_tile, MP), lambda b, t: (b, t, 0)),
                     pl.BlockSpec((None, t_tile, MP), lambda b, t: (b, t, 0))]

        return pl.pallas_call(
            postconvnet_kernel,
            out_shape=(jax.ShapeDtypeStruct((B, t_pad, MP), x.dtype),
                       jax.ShapeDtypeStruct((B, t_pad, MP), x.dtype)),
            grid_spec=pltpu.PrefetchScalarGridSpec(
                num_scalar_prefetch=0,
                grid=(B, nt),
                in_specs=in_specs,
                out_specs=out_specs,
                scratch_shapes=[pltpu.VMEM((w + PAD, MP), jnp.bfloat16),
                                pltpu.VMEM((w + PAD, HP), jnp.bfloat16)]),
            compiler_params=pltpu.CompilerParams(
                dimension_semantics=("parallel", "parallel"),
                vmem_limit_bytes=vmem_limit),
        )(x_body, x_halo, wout_t, bout, c1w, pre_s_p, pre_b_p,
          cw, bns, bnb, c2w, c2b)

    try:
        mel_full, out_full = build_and_run(True)
    except Exception:
        # pl.Buffered(1) on the grid-invariant weights not supported by this
        # JAX/Mosaic build -> fall back to default (double-buffered) weights.
        mel_full, out_full = build_and_run(False)

    return mel_full[:, :T, :M], out_full[:, :T, :M]


# ---------------- pure-JAX reference (mirrors the PyTorch NCL forward) --------
def _conv1d_ncw(x, w_, b):
    y = jax.lax.conv_general_dilated(
        x, w_, window_strides=(1,), padding=[(PAD, PAD)],
        dimension_numbers=("NCH", "OIH", "NCH"))
    return y + b[None, :, None]


def ref_forward(x, p):
    mel_pred = jnp.einsum("bth,mh->btm", x, p["w_out"]) + p["b_out"]
    mp = jnp.transpose(mel_pred, (0, 2, 1))                   # (B, M, T)
    s, sh = _bn_fold(*p["bn_pre"])
    h = _conv1d_ncw(mp, p["conv1_w"], p["conv1_b"])[:, :, :-PAD]
    h = jnp.tanh(h * s[None, :, None] + sh[None, :, None])
    for i in range(3):
        s, sh = _bn_fold(*p["bn_list"][i])
        h = _conv1d_ncw(h, p["convs_w"][i], p["convs_b"][i])[:, :, :-PAD]
        h = jnp.tanh(h * s[None, :, None] + sh[None, :, None])
    res = _conv1d_ncw(h, p["conv2_w"], p["conv2_b"])[:, :, :-PAD]
    out = mp + res
    return mel_pred, jnp.transpose(out, (0, 2, 1))


# ---------------- deterministic parameter construction ------------------------
def make_params(key, num_hidden, mel_dim, reduction_rate):
    H, M = num_hidden, mel_dim * reduction_rate
    ks = jax.random.split(key, 32)

    def w(k, shape, scale=0.1):
        return scale * jax.random.normal(k, shape, jnp.float32)

    def bn(k):
        k1, k2, k3, k4 = jax.random.split(k, 4)
        gamma = 1.0 + 0.1 * jax.random.normal(k1, (H,), jnp.float32)
        beta = 0.1 * jax.random.normal(k2, (H,), jnp.float32)
        mean = 0.1 * jax.random.normal(k3, (H,), jnp.float32)
        var = 1.0 + 0.5 * jax.random.uniform(k4, (H,), jnp.float32)
        return (gamma, beta, mean, var)

    return {
        "w_out": w(ks[0], (M, H)), "b_out": w(ks[1], (M,)),
        "conv1_w": w(ks[2], (H, M, KSIZE)), "conv1_b": w(ks[3], (H,)),
        "convs_w": [w(ks[4 + i], (H, H, KSIZE)) for i in range(3)],
        "convs_b": [w(ks[8 + i], (H,)) for i in range(3)],
        "conv2_w": w(ks[12], (M, H, KSIZE)), "conv2_b": w(ks[13], (M,)),
        "bn_pre": bn(ks[14]),
        "bn_list": [bn(ks[15 + i]) for i in range(3)],
    }


if __name__ == "__main__":
    B, T = 2, 8
    num_hidden = 32
    mel_dim, reduction_rate = 4, 2

    key = jax.random.PRNGKey(0)
    kx, kp = jax.random.split(key)
    params = make_params(kp, num_hidden, mel_dim, reduction_rate)
    x = jax.random.normal(kx, (B, T, num_hidden), jnp.float32)

    mel_pred, out = postconvnet_forward(x, params)
    jax.block_until_ready((mel_pred, out))

    ref_mel, ref_out = ref_forward(x, params)
    # bf16 MXU operands (f32 accumulation) -> compare against the f32 reference
    # with a bf16-rounding tolerance (one matmul for mel, six for the output).
    assert jnp.allclose(mel_pred, ref_mel, atol=3e-2, rtol=3e-2), "mel_pred mismatch"
    assert jnp.allclose(out, ref_out, atol=1e-1, rtol=1e-1), "output mismatch"

    print("KERNEL_OK")
</pallas_src>

<mosaic_0001>
module attributes {stable_mosaic.version = 11 : i64} {
  func.func @postconvnet_kernel(%arg0: i32, %arg1: i32, %arg2: memref<1x8x128xbf16, #tpu.memory_space<vmem>>, %arg3: memref<1x1x24x128xbf16, #tpu.memory_space<vmem>>, %arg4: memref<128x128xbf16, #tpu.memory_space<vmem>>, %arg5: memref<1x128xf32, #tpu.memory_space<vmem>>, %arg6: memref<5x128x128xbf16, #tpu.memory_space<vmem>>, %arg7: memref<1x128xf32, #tpu.memory_space<vmem>>, %arg8: memref<1x128xf32, #tpu.memory_space<vmem>>, %arg9: memref<3x5x128x128xbf16, #tpu.memory_space<vmem>>, %arg10: memref<3x1x128xf32, #tpu.memory_space<vmem>>, %arg11: memref<3x1x128xf32, #tpu.memory_space<vmem>>, %arg12: memref<5x128x128xbf16, #tpu.memory_space<vmem>>, %arg13: memref<1x128xf32, #tpu.memory_space<vmem>>, %arg14: memref<1x8x128xf32, #tpu.memory_space<vmem>>, %arg15: memref<1x8x128xf32, #tpu.memory_space<vmem>>, %arg16: memref<36x128xbf16, #tpu.memory_space<vmem>>, %arg17: memref<36x128xbf16, #tpu.memory_space<vmem>>) attributes {dimension_semantics = [#tpu.dimension_semantics<parallel>, #tpu.dimension_semantics<parallel>], iteration_bounds = array<i64: 2, 1>, scalar_prefetch = 0 : i64, scratch_operands = 2 : i64, tpu.core_type = #tpu.core_type<tc>, window_params = [{transform_indices = @transform_0, window_bounds = array<i64: 1, 8, 128>}, {transform_indices = @transform_1, window_bounds = array<i64: 1, 1, 24, 128>}, {pipeline_mode = #tpu.pipeline_mode<synchronous>, transform_indices = @transform_2, window_bounds = array<i64: 128, 128>}, {pipeline_mode = #tpu.pipeline_mode<synchronous>, transform_indices = @transform_3, window_bounds = array<i64: 1, 128>}, {pipeline_mode = #tpu.pipeline_mode<synchronous>, transform_indices = @transform_4, window_bounds = array<i64: 5, 128, 128>}, {pipeline_mode = #tpu.pipeline_mode<synchronous>, transform_indices = @transform_5, window_bounds = array<i64: 1, 128>}, {pipeline_mode = #tpu.pipeline_mode<synchronous>, transform_indices = @transform_6, window_bounds = array<i64: 1, 128>}, {pipeline_mode = #tpu.pipeline_mode<synchronous>, transform_indices = @transform_7, window_bounds = array<i64: 3, 5, 128, 128>}, {pipeline_mode = #tpu.pipeline_mode<synchronous>, transform_indices = @transform_8, window_bounds = array<i64: 3, 1, 128>}, {pipeline_mode = #tpu.pipeline_mode<synchronous>, transform_indices = @transform_9, window_bounds = array<i64: 3, 1, 128>}, {pipeline_mode = #tpu.pipeline_mode<synchronous>, transform_indices = @transform_10, window_bounds = array<i64: 5, 128, 128>}, {pipeline_mode = #tpu.pipeline_mode<synchronous>, transform_indices = @transform_11, window_bounds = array<i64: 1, 128>}, {transform_indices = @transform_12, window_bounds = array<i64: 1, 8, 128>}, {transform_indices = @transform_13, window_bounds = array<i64: 1, 8, 128>}]} {
    %c0_i32 = arith.constant 0 : i32
    %0 = arith.cmpi eq, %arg1, %c0_i32 : i32
    %cst = arith.constant 0.000000e+00 : bf16
    %1 = vector.broadcast %cst : bf16 to vector<4x128xbf16>
    %c0 = arith.constant 0 : index
    %c0_0 = arith.constant 0 : index
    %2 = vector.load %arg16[%c0, %c0_0] : memref<36x128xbf16, #tpu.memory_space<vmem>>, vector<4x128xbf16>
    tpu.vector_store %arg16[%c0, %c0_0], %1 {strides = array<i32>} : memref<36x128xbf16, #tpu.memory_space<vmem>>, vector<4x128xbf16>,
    %cst_1 = arith.constant 0.000000e+00 : bf16
    %3 = vector.broadcast %cst_1 : bf16 to vector<4x128xbf16>
    %c0_2 = arith.constant 0 : index
    %c0_3 = arith.constant 0 : index
    %4 = vector.load %arg17[%c0_2, %c0_3] : memref<36x128xbf16, #tpu.memory_space<vmem>>, vector<4x128xbf16>
    tpu.vector_store %arg17[%c0_2, %c0_3], %3 {strides = array<i32>} : memref<36x128xbf16, #tpu.memory_space<vmem>>, vector<4x128xbf16>,
    %c0_4 = arith.constant 0 : index
    %c0_5 = arith.constant 0 : index
    %c0_6 = arith.constant 0 : index
    %5 = vector.load %arg2[%c0_4, %c0_5, %c0_6] : memref<1x8x128xbf16, #tpu.memory_space<vmem>>, vector<1x8x128xbf16>
    %6 = vector.shape_cast %5 : vector<1x8x128xbf16> to vector<8x128xbf16>
    %c0_7 = arith.constant 0 : index
    %c0_8 = arith.constant 0 : index
    %7 = vector.load %arg4[%c0_7, %c0_8] : memref<128x128xbf16, #tpu.memory_space<vmem>>, vector<128x128xbf16>
    %cst_9 = arith.constant dense<0.000000e+00> : vector<8x128xf32>
    %8 = tpu.matmul %6, %7, %cst_9 {dimension_numbers = #tpu.dot_dimension_numbers<[1], [0], [0], [1], [0, 0, 1, 1], [], []>} : vector<8x128xbf16>, vector<128x128xbf16>, vector<8x128xf32> -> vector<8x128xf32>
    %c0_10 = arith.constant 0 : index
    %c0_11 = arith.constant 0 : index
    %9 = vector.load %arg5[%c0_10, %c0_11] : memref<1x128xf32, #tpu.memory_space<vmem>>, vector<1x128xf32>
    %10 = vector.broadcast %9 : vector<1x128xf32> to vector<8x128xf32>
    %11 = arith.addf %8, %10 : vector<8x128xf32>
    %c0_12 = arith.constant 0 : index
    %c0_13 = arith.constant 0 : index
    %c0_14 = arith.constant 0 : index
    %c0_15 = arith.constant 0 : index
    %12 = vector.load %arg3[%c0_12, %c0_13, %c0_14, %c0_15] : memref<1x1x24x128xbf16, #tpu.memory_space<vmem>>, vector<1x1x24x128xbf16>
    %13 = vector.shape_cast %12 : vector<1x1x24x128xbf16> to vector<24x128xbf16>
    %c0_16 = arith.constant 0 : index
    %c0_17 = arith.constant 0 : index
    %14 = vector.load %arg4[%c0_16, %c0_17] : memref<128x128xbf16, #tpu.memory_space<vmem>>, vector<128x128xbf16>
    %cst_18 = arith.constant dense<0.000000e+00> : vector<24x128xf32>
    %15 = tpu.matmul %13, %14, %cst_18 {dimension_numbers = #tpu.dot_dimension_numbers<[1], [0], [0], [1], [0, 0, 1, 1], [], []>} : vector<24x128xbf16>, vector<128x128xbf16>, vector<24x128xf32> -> vector<24x128xf32>
    %c0_19 = arith.constant 0 : index
    %c0_20 = arith.constant 0 : index
    %16 = vector.load %arg5[%c0_19, %c0_20] : memref<1x128xf32, #tpu.memory_space<vmem>>, vector<1x128xf32>
    %17 = vector.broadcast %16 : vector<1x128xf32> to vector<24x128xf32>
    %18 = arith.addf %15, %17 : vector<24x128xf32>
    %c0_21 = arith.constant 0 : index
    %c0_22 = arith.constant 0 : index
    %c0_23 = arith.constant 0 : index
    %19 = vector.load %arg14[%c0_21, %c0_22, %c0_23] : memref<1x8x128xf32, #tpu.memory_space<vmem>>, vector<1x8x128xf32>
    %20 = vector.shape_cast %19 : vector<1x8x128xf32> to vector<8x128xf32>
    %21 = vector.shape_cast %11 : vector<8x128xf32> to vector<1x8x128xf32>
    tpu.vector_store %arg14[%c0_21, %c0_22, %c0_23], %21 {strides = array<i32>} : memref<1x8x128xf32, #tpu.memory_space<vmem>>, vector<1x8x128xf32>,
    %c0_24 = arith.constant 0 : index
    %c0_25 = arith.constant 0 : index
    %c0_26 = arith.constant 0 : index
    %22 = vector.load %arg15[%c0_24, %c0_25, %c0_26] : memref<1x8x128xf32, #tpu.memory_space<vmem>>, vector<1x8x128xf32>
    %23 = vector.shape_cast %22 : vector<1x8x128xf32> to vector<8x128xf32>
    %24 = vector.shape_cast %11 : vector<8x128xf32> to vector<1x8x128xf32>
    tpu.vector_store %arg15[%c0_24, %c0_25, %c0_26], %24 {strides = array<i32>} : memref<1x8x128xf32, #tpu.memory_space<vmem>>, vector<1x8x128xf32>,
    %25 = arith.truncf %18 : vector<24x128xf32> to vector<24x128xbf16>
    %c4 = arith.constant 4 : index
    %c0_27 = arith.constant 0 : index
    %26 = vector.load %arg16[%c4, %c0_27] : memref<36x128xbf16, #tpu.memory_space<vmem>>, vector<24x128xbf16>
    tpu.vector_store %arg16[%c4, %c0_27], %25 {strides = array<i32>} : memref<36x128xbf16, #tpu.memory_space<vmem>>, vector<24x128xbf16>,
    %27 = arith.truncf %11 : vector<8x128xf32> to vector<8x128xbf16>
    %c28 = arith.constant 28 : index
    %c0_28 = arith.constant 0 : index
    %28 = vector.load %arg16[%c28, %c0_28] : memref<36x128xbf16, #tpu.memory_space<vmem>>, vector<8x128xbf16>
    tpu.vector_store %arg16[%c28, %c0_28], %27 {strides = array<i32>} : memref<36x128xbf16, #tpu.memory_space<vmem>>, vector<8x128xbf16>,
    %29 = arith.extui %0 : i1 to i32
    %c0_i32_29 = arith.constant 0 : i32
    %30 = arith.cmpi ne, %29, %c0_i32_29 : i32
    scf.if %30 {
      %cst_234 = arith.constant 0.000000e+00 : bf16
      %211 = vector.broadcast %cst_234 : bf16 to vector<24x128xbf16>
      %c4_235 = arith.constant 4 : index
      %c0_236 = arith.constant 0 : index
      %212 = vector.load %arg16[%c4_235, %c0_236] : memref<36x128xbf16, #tpu.memory_space<vmem>>, vector<24x128xbf16>
      tpu.vector_store %arg16[%c4_235, %c0_236], %211 {strides = array<i32>} : memref<36x128xbf16, #tpu.memory_space<vmem>>, vector<24x128xbf16>,
    } else {
    }
    %c0_30 = arith.constant 0 : index
    %c0_31 = arith.constant 0 : index
    %31 = vector.load %arg16[%c0_30, %c0_31] : memref<36x128xbf16, #tpu.memory_space<vmem>>, vector<32x128xbf16>
    %c0_32 = arith.constant 0 : index
    %c0_33 = arith.constant 0 : index
    %c0_34 = arith.constant 0 : index
    %32 = vector.load %arg6[%c0_32, %c0_33, %c0_34] : memref<5x128x128xbf16, #tpu.memory_space<vmem>>, vector<1x128x128xbf16>
    %33 = vector.shape_cast %32 : vector<1x128x128xbf16> to vector<128x128xbf16>
    %cst_35 = arith.constant dense<0.000000e+00> : vector<32x128xf32>
    %34 = tpu.matmul %31, %33, %cst_35 {dimension_numbers = #tpu.dot_dimension_numbers<[1], [0], [0], [1], [0, 0, 1, 1], [], []>} : vector<32x128xbf16>, vector<128x128xbf16>, vector<32x128xf32> -> vector<32x128xf32>
    %c1 = arith.constant 1 : index
    %c0_36 = arith.constant 0 : index
    %35 = vector.load %arg16[%c1, %c0_36] : memref<36x128xbf16, #tpu.memory_space<vmem>>, vector<32x128xbf16>
    %c1_37 = arith.constant 1 : index
    %c0_38 = arith.constant 0 : index
    %c0_39 = arith.constant 0 : index
    %36 = vector.load %arg6[%c1_37, %c0_38, %c0_39] : memref<5x128x128xbf16, #tpu.memory_space<vmem>>, vector<1x128x128xbf16>
    %37 = vector.shape_cast %36 : vector<1x128x128xbf16> to vector<128x128xbf16>
    %cst_40 = arith.constant dense<0.000000e+00> : vector<32x128xf32>
    %38 = tpu.matmul %35, %37, %cst_40 {dimension_numbers = #tpu.dot_dimension_numbers<[1], [0], [0], [1], [0, 0, 1, 1], [], []>} : vector<32x128xbf16>, vector<128x128xbf16>, vector<32x128xf32> -> vector<32x128xf32>
    %39 = arith.addf %34, %38 : vector<32x128xf32>
    %c2 = arith.constant 2 : index
    %c0_41 = arith.constant 0 : index
    %40 = vector.load %arg16[%c2, %c0_41] : memref<36x128xbf16, #tpu.memory_space<vmem>>, vector<32x128xbf16>
    %c2_42 = arith.constant 2 : index
    %c0_43 = arith.constant 0 : index
    %c0_44 = arith.constant 0 : index
    %41 = vector.load %arg6[%c2_42, %c0_43, %c0_44] : memref<5x128x128xbf16, #tpu.memory_space<vmem>>, vector<1x128x128xbf16>
    %42 = vector.shape_cast %41 : vector<1x128x128xbf16> to vector<128x128xbf16>
    %cst_45 = arith.constant dense<0.000000e+00> : vector<32x128xf32>
    %43 = tpu.matmul %40, %42, %cst_45 {dimension_numbers = #tpu.dot_dimension_numbers<[1], [0], [0], [1], [0, 0, 1, 1], [], []>} : vector<32x128xbf16>, vector<128x128xbf16>, vector<32x128xf32> -> vector<32x128xf32>
    %44 = arith.addf %39, %43 : vector<32x128xf32>
    %c3 = arith.constant 3 : index
    %c0_46 = arith.constant 0 : index
    %45 = vector.load %arg16[%c3, %c0_46] : memref<36x128xbf16, #tpu.memory_space<vmem>>, vector<32x128xbf16>
    %c3_47 = arith.constant 3 : index
    %c0_48 = arith.constant 0 : index
    %c0_49 = arith.constant 0 : index
    %46 = vector.load %arg6[%c3_47, %c0_48, %c0_49] : memref<5x128x128xbf16, #tpu.memory_space<vmem>>, vector<1x128x128xbf16>
    %47 = vector.shape_cast %46 : vector<1x128x128xbf16> to vector<128x128xbf16>
    %cst_50 = arith.constant dense<0.000000e+00> : vector<32x128xf32>
    %48 = tpu.matmul %45, %47, %cst_50 {dimension_numbers = #tpu.dot_dimension_numbers<[1], [0], [0], [1], [0, 0, 1, 1], [], []>} : vector<32x128xbf16>, vector<128x128xbf16>, vector<32x128xf32> -> vector<32x128xf32>
    %49 = arith.addf %44, %48 : vector<32x128xf32>
    %c4_51 = arith.constant 4 : index
    %c0_52 = arith.constant 0 : index
    %50 = vector.load %arg16[%c4_51, %c0_52] : memref<36x128xbf16, #tpu.memory_space<vmem>>, vector<32x128xbf16>
    %c4_53 = arith.constant 4 : index
    %c0_54 = arith.constant 0 : index
    %c0_55 = arith.constant 0 : index
    %51 = vector.load %arg6[%c4_53, %c0_54, %c0_55] : memref<5x128x128xbf16, #tpu.memory_space<vmem>>, vector<1x128x128xbf16>
    %52 = vector.shape_cast %51 : vector<1x128x128xbf16> to vector<128x128xbf16>
    %cst_56 = arith.constant dense<0.000000e+00> : vector<32x128xf32>
    %53 = tpu.matmul %50, %52, %cst_56 {dimension_numbers = #tpu.dot_dimension_numbers<[1], [0], [0], [1], [0, 0, 1, 1], [], []>} : vector<32x128xbf16>, vector<128x128xbf16>, vector<32x128xf32> -> vector<32x128xf32>
    %54 = arith.addf %49, %53 : vector<32x128xf32>
    %c0_57 = arith.constant 0 : index
    %c0_58 = arith.constant 0 : index
    %55 = vector.load %arg7[%c0_57, %c0_58] : memref<1x128xf32, #tpu.memory_space<vmem>>, vector<1x128xf32>
    %56 = vector.broadcast %55 : vector<1x128xf32> to vector<32x128xf32>
    %57 = arith.mulf %54, %56 : vector<32x128xf32>
    %c0_59 = arith.constant 0 : index
    %c0_60 = arith.constant 0 : index
    %58 = vector.load %arg8[%c0_59, %c0_60] : memref<1x128xf32, #tpu.memory_space<vmem>>, vector<1x128xf32>
    %59 = vector.broadcast %58 : vector<1x128xf32> to vector<32x128xf32>
    %60 = arith.addf %57, %59 : vector<32x128xf32>
    %61 = math.tanh %60 : vector<32x128xf32>
    %62 = arith.truncf %61 : vector<32x128xf32> to vector<32x128xbf16>
    %c4_61 = arith.constant 4 : index
    %c0_62 = arith.constant 0 : index
    %63 = vector.load %arg17[%c4_61, %c0_62] : memref<36x128xbf16, #tpu.memory_space<vmem>>, vector<32x128xbf16>
    tpu.vector_store %arg17[%c4_61, %c0_62], %62 {strides = array<i32>} : memref<36x128xbf16, #tpu.memory_space<vmem>>, vector<32x128xbf16>,
    %64 = arith.extui %0 : i1 to i32
    %c0_i32_63 = arith.constant 0 : i32
    %65 = arith.cmpi ne, %64, %c0_i32_63 : i32
    scf.if %65 {
      %cst_234 = arith.constant 0.000000e+00 : bf16
      %211 = vector.broadcast %cst_234 : bf16 to vector<24x128xbf16>
      %c4_235 = arith.constant 4 : index
      %c0_236 = arith.constant 0 : index
      %212 = vector.load %arg17[%c4_235, %c0_236] : memref<36x128xbf16, #tpu.memory_space<vmem>>, vector<24x128xbf16>
      tpu.vector_store %arg17[%c4_235, %c0_236], %211 {strides = array<i32>} : memref<36x128xbf16, #tpu.memory_space<vmem>>, vector<24x128xbf16>,
    } else {
    }
    %c0_64 = arith.constant 0 : index
    %c0_65 = arith.constant 0 : index
    %66 = vector.load %arg17[%c0_64, %c0_65] : memref<36x128xbf16, #tpu.memory_space<vmem>>, vector<32x128xbf16>
    %c0_66 = arith.constant 0 : index
    %c0_67 = arith.constant 0 : index
    %c0_68 = arith.constant 0 : index
    %c0_69 = arith.constant 0 : index
    %67 = vector.load %arg9[%c0_66, %c0_67, %c0_68, %c0_69] : memref<3x5x128x128xbf16, #tpu.memory_space<vmem>>, vector<1x1x128x128xbf16>
    %68 = vector.shape_cast %67 : vector<1x1x128x128xbf16> to vector<128x128xbf16>
    %cst_70 = arith.constant dense<0.000000e+00> : vector<32x128xf32>
    %69 = tpu.matmul %66, %68, %cst_70 {dimension_numbers = #tpu.dot_dimension_numbers<[1], [0], [0], [1], [0, 0, 1, 1], [], []>} : vector<32x128xbf16>, vector<128x128xbf16>, vector<32x128xf32> -> vector<32x128xf32>
    %c1_71 = arith.constant 1 : index
    %c0_72 = arith.constant 0 : index
    %70 = vector.load %arg17[%c1_71, %c0_72] : memref<36x128xbf16, #tpu.memory_space<vmem>>, vector<32x128xbf16>
    %c0_73 = arith.constant 0 : index
    %c1_74 = arith.constant 1 : index
    %c0_75 = arith.constant 0 : index
    %c0_76 = arith.constant 0 : index
    %71 = vector.load %arg9[%c0_73, %c1_74, %c0_75, %c0_76] : memref<3x5x128x128xbf16, #tpu.memory_space<vmem>>, vector<1x1x128x128xbf16>
    %72 = vector.shape_cast %71 : vector<1x1x128x128xbf16> to vector<128x128xbf16>
    %cst_77 = arith.constant dense<0.000000e+00> : vector<32x128xf32>
    %73 = tpu.matmul %70, %72, %cst_77 {dimension_numbers = #tpu.dot_dimension_numbers<[1], [0], [0], [1], [0, 0, 1, 1], [], []>} : vector<32x128xbf16>, vector<128x128xbf16>, vector<32x128xf32> -> vector<32x128xf32>
    %74 = arith.addf %69, %73 : vector<32x128xf32>
    %c2_78 = arith.constant 2 : index
    %c0_79 = arith.constant 0 : index
    %75 = vector.load %arg17[%c2_78, %c0_79] : memref<36x128xbf16, #tpu.memory_space<vmem>>, vector<32x128xbf16>
    %c0_80 = arith.constant 0 : index
    %c2_81 = arith.constant 2 : index
    %c0_82 = arith.constant 0 : index
    %c0_83 = arith.constant 0 : index
    %76 = vector.load %arg9[%c0_80, %c2_81, %c0_82, %c0_83] : memref<3x5x128x128xbf16, #tpu.memory_space<vmem>>, vector<1x1x128x128xbf16>
    %77 = vector.shape_cast %76 : vector<1x1x128x128xbf16> to vector<128x128xbf16>
    %cst_84 = arith.constant dense<0.000000e+00> : vector<32x128xf32>
    %78 = tpu.matmul %75, %77, %cst_84 {dimension_numbers = #tpu.dot_dimension_numbers<[1], [0], [0], [1], [0, 0, 1, 1], [], []>} : vector<32x128xbf16>, vector<128x128xbf16>, vector<32x128xf32> -> vector<32x128xf32>
    %79 = arith.addf %74, %78 : vector<32x128xf32>
    %c3_85 = arith.constant 3 : index
    %c0_86 = arith.constant 0 : index
    %80 = vector.load %arg17[%c3_85, %c0_86] : memref<36x128xbf16, #tpu.memory_space<vmem>>, vector<32x128xbf16>
    %c0_87 = arith.constant 0 : index
    %c3_88 = arith.constant 3 : index
    %c0_89 = arith.constant 0 : index
    %c0_90 = arith.constant 0 : index
    %81 = vector.load %arg9[%c0_87, %c3_88, %c0_89, %c0_90] : memref<3x5x128x128xbf16, #tpu.memory_space<vmem>>, vector<1x1x128x128xbf16>
    %82 = vector.shape_cast %81 : vector<1x1x128x128xbf16> to vector<128x128xbf16>
    %cst_91 = arith.constant dense<0.000000e+00> : vector<32x128xf32>
    %83 = tpu.matmul %80, %82, %cst_91 {dimension_numbers = #tpu.dot_dimension_numbers<[1], [0], [0], [1], [0, 0, 1, 1], [], []>} : vector<32x128xbf16>, vector<128x128xbf16>, vector<32x128xf32> -> vector<32x128xf32>
    %84 = arith.addf %79, %83 : vector<32x128xf32>
    %c4_92 = arith.constant 4 : index
    %c0_93 = arith.constant 0 : index
    %85 = vector.load %arg17[%c4_92, %c0_93] : memref<36x128xbf16, #tpu.memory_space<vmem>>, vector<32x128xbf16>
    %c0_94 = arith.constant 0 : index
    %c4_95 = arith.constant 4 : index
    %c0_96 = arith.constant 0 : index
    %c0_97 = arith.constant 0 : index
    %86 = vector.load %arg9[%c0_94, %c4_95, %c0_96, %c0_97] : memref<3x5x128x128xbf16, #tpu.memory_space<vmem>>, vector<1x1x128x128xbf16>
    %87 = vector.shape_cast %86 : vector<1x1x128x128xbf16> to vector<128x128xbf16>
    %cst_98 = arith.constant dense<0.000000e+00> : vector<32x128xf32>
    %88 = tpu.matmul %85, %87, %cst_98 {dimension_numbers = #tpu.dot_dimension_numbers<[1], [0], [0], [1], [0, 0, 1, 1], [], []>} : vector<32x128xbf16>, vector<128x128xbf16>, vector<32x128xf32> -> vector<32x128xf32>
    %89 = arith.addf %84, %88 : vector<32x128xf32>
    %c0_99 = arith.constant 0 : index
    %c0_100 = arith.constant 0 : index
    %c0_101 = arith.constant 0 : index
    %90 = vector.load %arg10[%c0_99, %c0_100, %c0_101] : memref<3x1x128xf32, #tpu.memory_space<vmem>>, vector<1x1x128xf32>
    %91 = vector.shape_cast %90 : vector<1x1x128xf32> to vector<1x128xf32>
    %92 = vector.broadcast %91 : vector<1x128xf32> to vector<32x128xf32>
    %93 = arith.mulf %89, %92 : vector<32x128xf32>
    %c0_102 = arith.constant 0 : index
    %c0_103 = arith.constant 0 : index
    %c0_104 = arith.constant 0 : index
    %94 = vector.load %arg11[%c0_102, %c0_103, %c0_104] : memref<3x1x128xf32, #tpu.memory_space<vmem>>, vector<1x1x128xf32>
    %95 = vector.shape_cast %94 : vector<1x1x128xf32> to vector<1x128xf32>
    %96 = vector.broadcast %95 : vector<1x128xf32> to vector<32x128xf32>
    %97 = arith.addf %93, %96 : vector<32x128xf32>
    %98 = math.tanh %97 : vector<32x128xf32>
    %99 = arith.truncf %98 : vector<32x128xf32> to vector<32x128xbf16>
    %c4_105 = arith.constant 4 : index
    %c0_106 = arith.constant 0 : index
    %100 = vector.load %arg17[%c4_105, %c0_106] : memref<36x128xbf16, #tpu.memory_space<vmem>>, vector<32x128xbf16>
    tpu.vector_store %arg17[%c4_105, %c0_106], %99 {strides = array<i32>} : memref<36x128xbf16, #tpu.memory_space<vmem>>, vector<32x128xbf16>,
    %101 = arith.extui %0 : i1 to i32
    %c0_i32_107 = arith.constant 0 : i32
    %102 = arith.cmpi ne, %101, %c0_i32_107 : i32
    scf.if %102 {
      %cst_234 = arith.constant 0.000000e+00 : bf16
      %211 = vector.broadcast %cst_234 : bf16 to vector<24x128xbf16>
      %c4_235 = arith.constant 4 : index
      %c0_236 = arith.constant 0 : index
      %212 = vector.load %arg17[%c4_235, %c0_236] : memref<36x128xbf16, #tpu.memory_space<vmem>>, vector<24x128xbf16>
      tpu.vector_store %arg17[%c4_235, %c0_236], %211 {strides = array<i32>} : memref<36x128xbf16, #tpu.memory_space<vmem>>, vector<24x128xbf16>,
    } else {
    }
    %c0_108 = arith.constant 0 : index
    %c0_109 = arith.constant 0 : index
    %103 = vector.load %arg17[%c0_108, %c0_109] : memref<36x128xbf16, #tpu.memory_space<vmem>>, vector<32x128xbf16>
    %c1_110 = arith.constant 1 : index
    %c0_111 = arith.constant 0 : index
    %c0_112 = arith.constant 0 : index
    %c0_113 = arith.constant 0 : index
    %104 = vector.load %arg9[%c1_110, %c0_111, %c0_112, %c0_113] : memref<3x5x128x128xbf16, #tpu.memory_space<vmem>>, vector<1x1x128x128xbf16>
    %105 = vector.shape_cast %104 : vector<1x1x128x128xbf16> to vector<128x128xbf16>
    %cst_114 = arith.constant dense<0.000000e+00> : vector<32x128xf32>
    %106 = tpu.matmul %103, %105, %cst_114 {dimension_numbers = #tpu.dot_dimension_numbers<[1], [0], [0], [1], [0, 0, 1, 1], [], []>} : vector<32x128xbf16>, vector<128x128xbf16>, vector<32x128xf32> -> vector<32x128xf32>
    %c1_115 = arith.constant 1 : index
    %c0_116 = arith.constant 0 : index
    %107 = vector.load %arg17[%c1_115, %c0_116] : memref<36x128xbf16, #tpu.memory_space<vmem>>, vector<32x128xbf16>
    %c1_117 = arith.constant 1 : index
    %c1_118 = arith.constant 1 : index
    %c0_119 = arith.constant 0 : index
    %c0_120 = arith.constant 0 : index
    %108 = vector.load %arg9[%c1_117, %c1_118, %c0_119, %c0_120] : memref<3x5x128x128xbf16, #tpu.memory_space<vmem>>, vector<1x1x128x128xbf16>
    %109 = vector.shape_cast %108 : vector<1x1x128x128xbf16> to vector<128x128xbf16>
    %cst_121 = arith.constant dense<0.000000e+00> : vector<32x128xf32>
    %110 = tpu.matmul %107, %109, %cst_121 {dimension_numbers = #tpu.dot_dimension_numbers<[1], [0], [0], [1], [0, 0, 1, 1], [], []>} : vector<32x128xbf16>, vector<128x128xbf16>, vector<32x128xf32> -> vector<32x128xf32>
    %111 = arith.addf %106, %110 : vector<32x128xf32>
    %c2_122 = arith.constant 2 : index
    %c0_123 = arith.constant 0 : index
    %112 = vector.load %arg17[%c2_122, %c0_123] : memref<36x128xbf16, #tpu.memory_space<vmem>>, vector<32x128xbf16>
    %c1_124 = arith.constant 1 : index
    %c2_125 = arith.constant 2 : index
    %c0_126 = arith.constant 0 : index
    %c0_127 = arith.constant 0 : index
    %113 = vector.load %arg9[%c1_124, %c2_125, %c0_126, %c0_127] : memref<3x5x128x128xbf16, #tpu.memory_space<vmem>>, vector<1x1x128x128xbf16>
    %114 = vector.shape_cast %113 : vector<1x1x128x128xbf16> to vector<128x128xbf16>
    %cst_128 = arith.constant dense<0.000000e+00> : vector<32x128xf32>
    %115 = tpu.matmul %112, %114, %cst_128 {dimension_numbers = #tpu.dot_dimension_numbers<[1], [0], [0], [1], [0, 0, 1, 1], [], []>} : vector<32x128xbf16>, vector<128x128xbf16>, vector<32x128xf32> -> vector<32x128xf32>
    %116 = arith.addf %111, %115 : vector<32x128xf32>
    %c3_129 = arith.constant 3 : index
    %c0_130 = arith.constant 0 : index
    %117 = vector.load %arg17[%c3_129, %c0_130] : memref<36x128xbf16, #tpu.memory_space<vmem>>, vector<32x128xbf16>
    %c1_131 = arith.constant 1 : index
    %c3_132 = arith.constant 3 : index
    %c0_133 = arith.constant 0 : index
    %c0_134 = arith.constant 0 : index
    %118 = vector.load %arg9[%c1_131, %c3_132, %c0_133, %c0_134] : memref<3x5x128x128xbf16, #tpu.memory_space<vmem>>, vector<1x1x128x128xbf16>
    %119 = vector.shape_cast %118 : vector<1x1x128x128xbf16> to vector<128x128xbf16>
    %cst_135 = arith.constant dense<0.000000e+00> : vector<32x128xf32>
    %120 = tpu.matmul %117, %119, %cst_135 {dimension_numbers = #tpu.dot_dimension_numbers<[1], [0], [0], [1], [0, 0, 1, 1], [], []>} : vector<32x128xbf16>, vector<128x128xbf16>, vector<32x128xf32> -> vector<32x128xf32>
    %121 = arith.addf %116, %120 : vector<32x128xf32>
    %c4_136 = arith.constant 4 : index
    %c0_137 = arith.constant 0 : index
    %122 = vector.load %arg17[%c4_136, %c0_137] : memref<36x128xbf16, #tpu.memory_space<vmem>>, vector<32x128xbf16>
    %c1_138 = arith.constant 1 : index
    %c4_139 = arith.constant 4 : index
    %c0_140 = arith.constant 0 : index
    %c0_141 = arith.constant 0 : index
    %123 = vector.load %arg9[%c1_138, %c4_139, %c0_140, %c0_141] : memref<3x5x128x128xbf16, #tpu.memory_space<vmem>>, vector<1x1x128x128xbf16>
    %124 = vector.shape_cast %123 : vector<1x1x128x128xbf16> to vector<128x128xbf16>
    %cst_142 = arith.constant dense<0.000000e+00> : vector<32x128xf32>
    %125 = tpu.matmul %122, %124, %cst_142 {dimension_numbers = #tpu.dot_dimension_numbers<[1], [0], [0], [1], [0, 0, 1, 1], [], []>} : vector<32x128xbf16>, vector<128x128xbf16>, vector<32x128xf32> -> vector<32x128xf32>
    %126 = arith.addf %121, %125 : vector<32x128xf32>
    %c1_143 = arith.constant 1 : index
    %c0_144 = arith.constant 0 : index
    %c0_145 = arith.constant 0 : index
    %127 = vector.load %arg10[%c1_143, %c0_144, %c0_145] : memref<3x1x128xf32, #tpu.memory_space<vmem>>, vector<1x1x128xf32>
    %128 = vector.shape_cast %127 : vector<1x1x128xf32> to vector<1x128xf32>
    %129 = vector.broadcast %128 : vector<1x128xf32> to vector<32x128xf32>
    %130 = arith.mulf %126, %129 : vector<32x128xf32>
    %c1_146 = arith.constant 1 : index
    %c0_147 = arith.constant 0 : index
    %c0_148 = arith.constant 0 : index
    %131 = vector.load %arg11[%c1_146, %c0_147, %c0_148] : memref<3x1x128xf32, #tpu.memory_space<vmem>>, vector<1x1x128xf32>
    %132 = vector.shape_cast %131 : vector<1x1x128xf32> to vector<1x128xf32>
    %133 = vector.broadcast %132 : vector<1x128xf32> to vector<32x128xf32>
    %134 = arith.addf %130, %133 : vector<32x128xf32>
    %135 = math.tanh %134 : vector<32x128xf32>
    %136 = arith.truncf %135 : vector<32x128xf32> to vector<32x128xbf16>
    %c4_149 = arith.constant 4 : index
    %c0_150 = arith.constant 0 : index
    %137 = vector.load %arg17[%c4_149, %c0_150] : memref<36x128xbf16, #tpu.memory_space<vmem>>, vector<32x128xbf16>
    tpu.vector_store %arg17[%c4_149, %c0_150], %136 {strides = array<i32>} : memref<36x128xbf16, #tpu.memory_space<vmem>>, vector<32x128xbf16>,
    %138 = arith.extui %0 : i1 to i32
    %c0_i32_151 = arith.constant 0 : i32
    %139 = arith.cmpi ne, %138, %c0_i32_151 : i32
    scf.if %139 {
      %cst_234 = arith.constant 0.000000e+00 : bf16
      %211 = vector.broadcast %cst_234 : bf16 to vector<24x128xbf16>
      %c4_235 = arith.constant 4 : index
      %c0_236 = arith.constant 0 : index
      %212 = vector.load %arg17[%c4_235, %c0_236] : memref<36x128xbf16, #tpu.memory_space<vmem>>, vector<24x128xbf16>
      tpu.vector_store %arg17[%c4_235, %c0_236], %211 {strides = array<i32>} : memref<36x128xbf16, #tpu.memory_space<vmem>>, vector<24x128xbf16>,
    } else {
    }
    %c0_152 = arith.constant 0 : index
    %c0_153 = arith.constant 0 : index
    %140 = vector.load %arg17[%c0_152, %c0_153] : memref<36x128xbf16, #tpu.memory_space<vmem>>, vector<32x128xbf16>
    %c2_154 = arith.constant 2 : index
    %c0_155 = arith.constant 0 : index
    %c0_156 = arith.constant 0 : index
    %c0_157 = arith.constant 0 : index
    %141 = vector.load %arg9[%c2_154, %c0_155, %c0_156, %c0_157] : memref<3x5x128x128xbf16, #tpu.memory_space<vmem>>, vector<1x1x128x128xbf16>
    %142 = vector.shape_cast %141 : vector<1x1x128x128xbf16> to vector<128x128xbf16>
    %cst_158 = arith.constant dense<0.000000e+00> : vector<32x128xf32>
    %143 = tpu.matmul %140, %142, %cst_158 {dimension_numbers = #tpu.dot_dimension_numbers<[1], [0], [0], [1], [0, 0, 1, 1], [], []>} : vector<32x128xbf16>, vector<128x128xbf16>, vector<32x128xf32> -> vector<32x128xf32>
    %c1_159 = arith.constant 1 : index
    %c0_160 = arith.constant 0 : index
    %144 = vector.load %arg17[%c1_159, %c0_160] : memref<36x128xbf16, #tpu.memory_space<vmem>>, vector<32x128xbf16>
    %c2_161 = arith.constant 2 : index
    %c1_162 = arith.constant 1 : index
    %c0_163 = arith.constant 0 : index
    %c0_164 = arith.constant 0 : index
    %145 = vector.load %arg9[%c2_161, %c1_162, %c0_163, %c0_164] : memref<3x5x128x128xbf16, #tpu.memory_space<vmem>>, vector<1x1x128x128xbf16>
    %146 = vector.shape_cast %145 : vector<1x1x128x128xbf16> to vector<128x128xbf16>
    %cst_165 = arith.constant dense<0.000000e+00> : vector<32x128xf32>
    %147 = tpu.matmul %144, %146, %cst_165 {dimension_numbers = #tpu.dot_dimension_numbers<[1], [0], [0], [1], [0, 0, 1, 1], [], []>} : vector<32x128xbf16>, vector<128x128xbf16>, vector<32x128xf32> -> vector<32x128xf32>
    %148 = arith.addf %143, %147 : vector<32x128xf32>
    %c2_166 = arith.constant 2 : index
    %c0_167 = arith.constant 0 : index
    %149 = vector.load %arg17[%c2_166, %c0_167] : memref<36x128xbf16, #tpu.memory_space<vmem>>, vector<32x128xbf16>
    %c2_168 = arith.constant 2 : index
    %c2_169 = arith.constant 2 : index
    %c0_170 = arith.constant 0 : index
    %c0_171 = arith.constant 0 : index
    %150 = vector.load %arg9[%c2_168, %c2_169, %c0_170, %c0_171] : memref<3x5x128x128xbf16, #tpu.memory_space<vmem>>, vector<1x1x128x128xbf16>
    %151 = vector.shape_cast %150 : vector<1x1x128x128xbf16> to vector<128x128xbf16>
    %cst_172 = arith.constant dense<0.000000e+00> : vector<32x128xf32>
    %152 = tpu.matmul %149, %151, %cst_172 {dimension_numbers = #tpu.dot_dimension_numbers<[1], [0], [0], [1], [0, 0, 1, 1], [], []>} : vector<32x128xbf16>, vector<128x128xbf16>, vector<32x128xf32> -> vector<32x128xf32>
    %153 = arith.addf %148, %152 : vector<32x128xf32>
    %c3_173 = arith.constant 3 : index
    %c0_174 = arith.constant 0 : index
    %154 = vector.load %arg17[%c3_173, %c0_174] : memref<36x128xbf16, #tpu.memory_space<vmem>>, vector<32x128xbf16>
    %c2_175 = arith.constant 2 : index
    %c3_176 = arith.constant 3 : index
    %c0_177 = arith.constant 0 : index
    %c0_178 = arith.constant 0 : index
    %155 = vector.load %arg9[%c2_175, %c3_176, %c0_177, %c0_178] : memref<3x5x128x128xbf16, #tpu.memory_space<vmem>>, vector<1x1x128x128xbf16>
    %156 = vector.shape_cast %155 : vector<1x1x128x128xbf16> to vector<128x128xbf16>
    %cst_179 = arith.constant dense<0.000000e+00> : vector<32x128xf32>
    %157 = tpu.matmul %154, %156, %cst_179 {dimension_numbers = #tpu.dot_dimension_numbers<[1], [0], [0], [1], [0, 0, 1, 1], [], []>} : vector<32x128xbf16>, vector<128x128xbf16>, vector<32x128xf32> -> vector<32x128xf32>
    %158 = arith.addf %153, %157 : vector<32x128xf32>
    %c4_180 = arith.constant 4 : index
    %c0_181 = arith.constant 0 : index
    %159 = vector.load %arg17[%c4_180, %c0_181] : memref<36x128xbf16, #tpu.memory_space<vmem>>, vector<32x128xbf16>
    %c2_182 = arith.constant 2 : index
    %c4_183 = arith.constant 4 : index
    %c0_184 = arith.constant 0 : index
    %c0_185 = arith.constant 0 : index
    %160 = vector.load %arg9[%c2_182, %c4_183, %c0_184, %c0_185] : memref<3x5x128x128xbf16, #tpu.memory_space<vmem>>, vector<1x1x128x128xbf16>
    %161 = vector.shape_cast %160 : vector<1x1x128x128xbf16> to vector<128x128xbf16>
    %cst_186 = arith.constant dense<0.000000e+00> : vector<32x128xf32>
    %162 = tpu.matmul %159, %161, %cst_186 {dimension_numbers = #tpu.dot_dimension_numbers<[1], [0], [0], [1], [0, 0, 1, 1], [], []>} : vector<32x128xbf16>, vector<128x128xbf16>, vector<32x128xf32> -> vector<32x128xf32>
    %163 = arith.addf %158, %162 : vector<32x128xf32>
    %c2_187 = arith.constant 2 : index
    %c0_188 = arith.constant 0 : index
    %c0_189 = arith.constant 0 : index
    %164 = vector.load %arg10[%c2_187, %c0_188, %c0_189] : memref<3x1x128xf32, #tpu.memory_space<vmem>>, vector<1x1x128xf32>
    %165 = vector.shape_cast %164 : vector<1x1x128xf32> to vector<1x128xf32>
    %166 = vector.broadcast %165 : vector<1x128xf32> to vector<32x128xf32>
    %167 = arith.mulf %163, %166 : vector<32x128xf32>
    %c2_190 = arith.constant 2 : index
    %c0_191 = arith.constant 0 : index
    %c0_192 = arith.constant 0 : index
    %168 = vector.load %arg11[%c2_190, %c0_191, %c0_192] : memref<3x1x128xf32, #tpu.memory_space<vmem>>, vector<1x1x128xf32>
    %169 = vector.shape_cast %168 : vector<1x1x128xf32> to vector<1x128xf32>
    %170 = vector.broadcast %169 : vector<1x128xf32> to vector<32x128xf32>
    %171 = arith.addf %167, %170 : vector<32x128xf32>
    %172 = math.tanh %171 : vector<32x128xf32>
    %173 = arith.truncf %172 : vector<32x128xf32> to vector<32x128xbf16>
    %c4_193 = arith.constant 4 : index
    %c0_194 = arith.constant 0 : index
    %174 = vector.load %arg17[%c4_193, %c0_194] : memref<36x128xbf16, #tpu.memory_space<vmem>>, vector<32x128xbf16>
    tpu.vector_store %arg17[%c4_193, %c0_194], %173 {strides = array<i32>} : memref<36x128xbf16, #tpu.memory_space<vmem>>, vector<32x128xbf16>,
    %175 = arith.extui %0 : i1 to i32
    %c0_i32_195 = arith.constant 0 : i32
    %176 = arith.cmpi ne, %175, %c0_i32_195 : i32
    scf.if %176 {
      %cst_234 = arith.constant 0.000000e+00 : bf16
      %211 = vector.broadcast %cst_234 : bf16 to vector<24x128xbf16>
      %c4_235 = arith.constant 4 : index
      %c0_236 = arith.constant 0 : index
      %212 = vector.load %arg17[%c4_235, %c0_236] : memref<36x128xbf16, #tpu.memory_space<vmem>>, vector<24x128xbf16>
      tpu.vector_store %arg17[%c4_235, %c0_236], %211 {strides = array<i32>} : memref<36x128xbf16, #tpu.memory_space<vmem>>, vector<24x128xbf16>,
    } else {
    }
    %c0_196 = arith.constant 0 : index
    %c0_197 = arith.constant 0 : index
    %177 = vector.load %arg17[%c0_196, %c0_197] : memref<36x128xbf16, #tpu.memory_space<vmem>>, vector<32x128xbf16>
    %c0_198 = arith.constant 0 : index
    %c0_199 = arith.constant 0 : index
    %c0_200 = arith.constant 0 : index
    %178 = vector.load %arg12[%c0_198, %c0_199, %c0_200] : memref<5x128x128xbf16, #tpu.memory_space<vmem>>, vector<1x128x128xbf16>
    %179 = vector.shape_cast %178 : vector<1x128x128xbf16> to vector<128x128xbf16>
    %cst_201 = arith.constant dense<0.000000e+00> : vector<32x128xf32>
    %180 = tpu.matmul %177, %179, %cst_201 {dimension_numbers = #tpu.dot_dimension_numbers<[1], [0], [0], [1], [0, 0, 1, 1], [], []>} : vector<32x128xbf16>, vector<128x128xbf16>, vector<32x128xf32> -> vector<32x128xf32>
    %c1_202 = arith.constant 1 : index
    %c0_203 = arith.constant 0 : index
    %181 = vector.load %arg17[%c1_202, %c0_203] : memref<36x128xbf16, #tpu.memory_space<vmem>>, vector<32x128xbf16>
    %c1_204 = arith.constant 1 : index
    %c0_205 = arith.constant 0 : index
    %c0_206 = arith.constant 0 : index
    %182 = vector.load %arg12[%c1_204, %c0_205, %c0_206] : memref<5x128x128xbf16, #tpu.memory_space<vmem>>, vector<1x128x128xbf16>
    %183 = vector.shape_cast %182 : vector<1x128x128xbf16> to vector<128x128xbf16>
    %cst_207 = arith.constant dense<0.000000e+00> : vector<32x128xf32>
    %184 = tpu.matmul %181, %183, %cst_207 {dimension_numbers = #tpu.dot_dimension_numbers<[1], [0], [0], [1], [0, 0, 1, 1], [], []>} : vector<32x128xbf16>, vector<128x128xbf16>, vector<32x128xf32> -> vector<32x128xf32>
    %185 = arith.addf %180, %184 : vector<32x128xf32>
    %c2_208 = arith.constant 2 : index
    %c0_209 = arith.constant 0 : index
    %186 = vector.load %arg17[%c2_208, %c0_209] : memref<36x128xbf16, #tpu.memory_space<vmem>>, vector<32x128xbf16>
    %c2_210 = arith.constant 2 : index
    %c0_211 = arith.constant 0 : index
    %c0_212 = arith.constant 0 : index
    %187 = vector.load %arg12[%c2_210, %c0_211, %c0_212] : memref<5x128x128xbf16, #tpu.memory_space<vmem>>, vector<1x128x128xbf16>
    %188 = vector.shape_cast %187 : vector<1x128x128xbf16> to vector<128x128xbf16>
    %cst_213 = arith.constant dense<0.000000e+00> : vector<32x128xf32>
    %189 = tpu.matmul %186, %188, %cst_213 {dimension_numbers = #tpu.dot_dimension_numbers<[1], [0], [0], [1], [0, 0, 1, 1], [], []>} : vector<32x128xbf16>, vector<128x128xbf16>, vector<32x128xf32> -> vector<32x128xf32>
    %190 = arith.addf %185, %189 : vector<32x128xf32>
    %c3_214 = arith.constant 3 : index
    %c0_215 = arith.constant 0 : index
    %191 = vector.load %arg17[%c3_214, %c0_215] : memref<36x128xbf16, #tpu.memory_space<vmem>>, vector<32x128xbf16>
    %c3_216 = arith.constant 3 : index
    %c0_217 = arith.constant 0 : index
    %c0_218 = arith.constant 0 : index
    %192 = vector.load %arg12[%c3_216, %c0_217, %c0_218] : memref<5x128x128xbf16, #tpu.memory_space<vmem>>, vector<1x128x128xbf16>
    %193 = vector.shape_cast %192 : vector<1x128x128xbf16> to vector<128x128xbf16>
    %cst_219 = arith.constant dense<0.000000e+00> : vector<32x128xf32>
    %194 = tpu.matmul %191, %193, %cst_219 {dimension_numbers = #tpu.dot_dimension_numbers<[1], [0], [0], [1], [0, 0, 1, 1], [], []>} : vector<32x128xbf16>, vector<128x128xbf16>, vector<32x128xf32> -> vector<32x128xf32>
    %195 = arith.addf %190, %194 : vector<32x128xf32>
    %c4_220 = arith.constant 4 : index
    %c0_221 = arith.constant 0 : index
    %196 = vector.load %arg17[%c4_220, %c0_221] : memref<36x128xbf16, #tpu.memory_space<vmem>>, vector<32x128xbf16>
    %c4_222 = arith.constant 4 : index
    %c0_223 = arith.constant 0 : index
    %c0_224 = arith.constant 0 : index
    %197 = vector.load %arg12[%c4_222, %c0_223, %c0_224] : memref<5x128x128xbf16, #tpu.memory_space<vmem>>, vector<1x128x128xbf16>
    %198 = vector.shape_cast %197 : vector<1x128x128xbf16> to vector<128x128xbf16>
    %cst_225 = arith.constant dense<0.000000e+00> : vector<32x128xf32>
    %199 = tpu.matmul %196, %198, %cst_225 {dimension_numbers = #tpu.dot_dimension_numbers<[1], [0], [0], [1], [0, 0, 1, 1], [], []>} : vector<32x128xbf16>, vector<128x128xbf16>, vector<32x128xf32> -> vector<32x128xf32>
    %200 = arith.addf %195, %199 : vector<32x128xf32>
    %c0_226 = arith.constant 0 : index
    %c0_227 = arith.constant 0 : index
    %201 = vector.load %arg13[%c0_226, %c0_227] : memref<1x128xf32, #tpu.memory_space<vmem>>, vector<1x128xf32>
    %202 = vector.broadcast %201 : vector<1x128xf32> to vector<32x128xf32>
    %203 = arith.addf %200, %202 : vector<32x128xf32>
    %c0_228 = arith.constant 0 : index
    %c0_229 = arith.constant 0 : index
    %c0_230 = arith.constant 0 : index
    %204 = vector.load %arg15[%c0_228, %c0_229, %c0_230] : memref<1x8x128xf32, #tpu.memory_space<vmem>>, vector<1x8x128xf32>
    %205 = vector.shape_cast %204 : vector<1x8x128xf32> to vector<8x128xf32>
    %206 = vector.extract_strided_slice %203 {offsets = [24, 0], sizes = [8, 128], strides = [1, 1]} : vector<32x128xf32> to vector<8x128xf32>
    %207 = arith.addf %205, %206 : vector<8x128xf32>
    %c0_231 = arith.constant 0 : index
    %c0_232 = arith.constant 0 : index
    %c0_233 = arith.constant 0 : index
    %208 = vector.load %arg15[%c0_231, %c0_232, %c0_233] : memref<1x8x128xf32, #tpu.memory_space<vmem>>, vector<1x8x128xf32>
    %209 = vector.shape_cast %208 : vector<1x8x128xf32> to vector<8x128xf32>
    %210 = vector.shape_cast %207 : vector<8x128xf32> to vector<1x8x128xf32>
    tpu.vector_store %arg15[%c0_231, %c0_232, %c0_233], %210 {strides = array<i32>} : memref<1x8x128xf32, #tpu.memory_space<vmem>>, vector<1x8x128xf32>,
    return
  }
  func.func @transform_0(%arg0: i32, %arg1: i32) -> (i32, i32, i32) {
    %c0_i32 = arith.constant 0 : i32
    %c0_i32_0 = arith.constant 0 : i32
    return %arg0, %arg1, %c0_i32 : i32, i32, i32
  }
  func.func @transform_1(%arg0: i32, %arg1: i32) -> (i32, i32, i32, i32) {
    %c0_i32 = arith.constant 0 : i32
    %c0_i32_0 = arith.constant 0 : i32
    %c0_i32_1 = arith.constant 0 : i32
    return %arg0, %arg1, %c0_i32, %c0_i32_0 : i32, i32, i32, i32
  }
  func.func @transform_2(%arg0: i32, %arg1: i32) -> (i32, i32) {
    %c0_i32 = arith.constant 0 : i32
    %c0_i32_0 = arith.constant 0 : i32
    %c0_i32_1 = arith.constant 0 : i32
    return %c0_i32, %c0_i32_0 : i32, i32
  }
  func.func @transform_3(%arg0: i32, %arg1: i32) -> (i32, i32) {
    %c0_i32 = arith.constant 0 : i32
    %c0_i32_0 = arith.constant 0 : i32
    %c0_i32_1 = arith.constant 0 : i32
    return %c0_i32, %c0_i32_0 : i32, i32
  }
  func.func @transform_4(%arg0: i32, %arg1: i32) -> (i32, i32, i32) {
    %c0_i32 = arith.constant 0 : i32
    %c0_i32_0 = arith.constant 0 : i32
    %c0_i32_1 = arith.constant 0 : i32
    %c0_i32_2 = arith.constant 0 : i32
    return %c0_i32, %c0_i32_0, %c0_i32_1 : i32, i32, i32
  }
  func.func @transform_5(%arg0: i32, %arg1: i32) -> (i32, i32) {
    %c0_i32 = arith.constant 0 : i32
    %c0_i32_0 = arith.constant 0 : i32
    %c0_i32_1 = arith.constant 0 : i32
    return %c0_i32, %c0_i32_0 : i32, i32
  }
  func.func @transform_6(%arg0: i32, %arg1: i32) -> (i32, i32) {
    %c0_i32 = arith.constant 0 : i32
    %c0_i32_0 = arith.constant 0 : i32
    %c0_i32_1 = arith.constant 0 : i32
    return %c0_i32, %c0_i32_0 : i32, i32
  }
  func.func @transform_7(%arg0: i32, %arg1: i32) -> (i32, i32, i32, i32) {
    %c0_i32 = arith.constant 0 : i32
    %c0_i32_0 = arith.constant 0 : i32
    %c0_i32_1 = arith.constant 0 : i32
    %c0_i32_2 = arith.constant 0 : i32
    %c0_i32_3 = arith.constant 0 : i32
    return %c0_i32, %c0_i32_0, %c0_i32_1, %c0_i32_2 : i32, i32, i32, i32
  }
  func.func @transform_8(%arg0: i32, %arg1: i32) -> (i32, i32, i32) {
    %c0_i32 = arith.constant 0 : i32
    %c0_i32_0 = arith.constant 0 : i32
    %c0_i32_1 = arith.constant 0 : i32
    %c0_i32_2 = arith.constant 0 : i32
    return %c0_i32, %c0_i32_0, %c0_i32_1 : i32, i32, i32
  }
  func.func @transform_9(%arg0: i32, %arg1: i32) -> (i32, i32, i32) {
    %c0_i32 = arith.constant 0 : i32
    %c0_i32_0 = arith.constant 0 : i32
    %c0_i32_1 = arith.constant 0 : i32
    %c0_i32_2 = arith.constant 0 : i32
    return %c0_i32, %c0_i32_0, %c0_i32_1 : i32, i32, i32
  }
  func.func @transform_10(%arg0: i32, %arg1: i32) -> (i32, i32, i32) {
    %c0_i32 = arith.constant 0 : i32
    %c0_i32_0 = arith.constant 0 : i32
    %c0_i32_1 = arith.constant 0 : i32
    %c0_i32_2 = arith.constant 0 : i32
    return %c0_i32, %c0_i32_0, %c0_i32_1 : i32, i32, i32
  }
  func.func @transform_11(%arg0: i32, %arg1: i32) -> (i32, i32) {
    %c0_i32 = arith.constant 0 : i32
    %c0_i32_0 = arith.constant 0 : i32
    %c0_i32_1 = arith.constant 0 : i32
    return %c0_i32, %c0_i32_0 : i32, i32
  }
  func.func @transform_12(%arg0: i32, %arg1: i32) -> (i32, i32, i32) {
    %c0_i32 = arith.constant 0 : i32
    %c0_i32_0 = arith.constant 0 : i32
    return %arg0, %arg1, %c0_i32 : i32, i32, i32
  }
  func.func @transform_13(%arg0: i32, %arg1: i32) -> (i32, i32, i32) {
    %c0_i32 = arith.constant 0 : i32
    %c0_i32_0 = arith.constant 0 : i32
    return %arg0, %arg1, %c0_i32 : i32, i32, i32
  }
}

module attributes {stable_mosaic.version = 11 : i64} {
  func.func @postconvnet_kernel(%arg0: i32, %arg1: i32, %arg2: memref<1x8x128xbf16, #tpu.memory_space<vmem>>, %arg3: memref<1x1x24x128xbf16, #tpu.memory_space<vmem>>, %arg4: memref<128x128xbf16, #tpu.memory_space<vmem>>, %arg5: memref<1x128xf32, #tpu.memory_space<vmem>>, %arg6: memref<5x128x128xbf16, #tpu.memory_space<vmem>>, %arg7: memref<1x128xf32, #tpu.memory_space<vmem>>, %arg8: memref<1x128xf32, #tpu.memory_space<vmem>>, %arg9: memref<3x5x128x128xbf16, #tpu.memory_space<vmem>>, %arg10: memref<3x1x128xf32, #tpu.memory_space<vmem>>, %arg11: memref<3x1x128xf32, #tpu.memory_space<vmem>>, %arg12: memref<5x128x128xbf16, #tpu.memory_space<vmem>>, %arg13: memref<1x128xf32, #tpu.memory_space<vmem>>, %arg14: memref<1x8x128xf32, #tpu.memory_space<vmem>>, %arg15: memref<1x8x128xf32, #tpu.memory_space<vmem>>, %arg16: memref<36x128xbf16, #tpu.memory_space<vmem>>, %arg17: memref<36x128xbf16, #tpu.memory_space<vmem>>) attributes {dimension_semantics = [#tpu.dimension_semantics<parallel>, #tpu.dimension_semantics<parallel>], iteration_bounds = array<i64: 2, 1>, scalar_prefetch = 0 : i64, scratch_operands = 2 : i64, tpu.core_type = #tpu.core_type<tc>, window_params = [{transform_indices = @transform_0, window_bounds = array<i64: 1, 8, 128>}, {transform_indices = @transform_1, window_bounds = array<i64: 1, 1, 24, 128>}, {pipeline_mode = #tpu.pipeline_mode<synchronous>, transform_indices = @transform_2, window_bounds = array<i64: 128, 128>}, {pipeline_mode = #tpu.pipeline_mode<synchronous>, transform_indices = @transform_3, window_bounds = array<i64: 1, 128>}, {pipeline_mode = #tpu.pipeline_mode<synchronous>, transform_indices = @transform_4, window_bounds = array<i64: 5, 128, 128>}, {pipeline_mode = #tpu.pipeline_mode<synchronous>, transform_indices = @transform_5, window_bounds = array<i64: 1, 128>}, {pipeline_mode = #tpu.pipeline_mode<synchronous>, transform_indices = @transform_6, window_bounds = array<i64: 1, 128>}, {pipeline_mode = #tpu.pipeline_mode<synchronous>, transform_indices = @transform_7, window_bounds = array<i64: 3, 5, 128, 128>}, {pipeline_mode = #tpu.pipeline_mode<synchronous>, transform_indices = @transform_8, window_bounds = array<i64: 3, 1, 128>}, {pipeline_mode = #tpu.pipeline_mode<synchronous>, transform_indices = @transform_9, window_bounds = array<i64: 3, 1, 128>}, {pipeline_mode = #tpu.pipeline_mode<synchronous>, transform_indices = @transform_10, window_bounds = array<i64: 5, 128, 128>}, {pipeline_mode = #tpu.pipeline_mode<synchronous>, transform_indices = @transform_11, window_bounds = array<i64: 1, 128>}, {transform_indices = @transform_12, window_bounds = array<i64: 1, 8, 128>}, {transform_indices = @transform_13, window_bounds = array<i64: 1, 8, 128>}]} {
    %c0_i32 = arith.constant 0 : i32
    %0 = arith.cmpi eq, %arg1, %c0_i32 : i32
    %cst = arith.constant 0.000000e+00 : bf16
    %1 = vector.broadcast %cst : bf16 to vector<4x128xbf16>
    %c0 = arith.constant 0 : index
    %c0_0 = arith.constant 0 : index
    %2 = vector.load %arg16[%c0, %c0_0] : memref<36x128xbf16, #tpu.memory_space<vmem>>, vector<4x128xbf16>
    tpu.vector_store %arg16[%c0, %c0_0], %1 {strides = array<i32>} : memref<36x128xbf16, #tpu.memory_space<vmem>>, vector<4x128xbf16>,
    %cst_1 = arith.constant 0.000000e+00 : bf16
    %3 = vector.broadcast %cst_1 : bf16 to vector<4x128xbf16>
    %c0_2 = arith.constant 0 : index
    %c0_3 = arith.constant 0 : index
    %4 = vector.load %arg17[%c0_2, %c0_3] : memref<36x128xbf16, #tpu.memory_space<vmem>>, vector<4x128xbf16>
    tpu.vector_store %arg17[%c0_2, %c0_3], %3 {strides = array<i32>} : memref<36x128xbf16, #tpu.memory_space<vmem>>, vector<4x128xbf16>,
    %c0_4 = arith.constant 0 : index
    %c0_5 = arith.constant 0 : index
    %c0_6 = arith.constant 0 : index
    %5 = vector.load %arg2[%c0_4, %c0_5, %c0_6] : memref<1x8x128xbf16, #tpu.memory_space<vmem>>, vector<1x8x128xbf16>
    %6 = vector.shape_cast %5 : vector<1x8x128xbf16> to vector<8x128xbf16>
    %c0_7 = arith.constant 0 : index
    %c0_8 = arith.constant 0 : index
    %7 = vector.load %arg4[%c0_7, %c0_8] : memref<128x128xbf16, #tpu.memory_space<vmem>>, vector<128x128xbf16>
    %cst_9 = arith.constant dense<0.000000e+00> : vector<8x128xf32>
    %8 = tpu.matmul %6, %7, %cst_9 {dimension_numbers = #tpu.dot_dimension_numbers<[1], [0], [0], [1], [0, 0, 1, 1], [], []>} : vector<8x128xbf16>, vector<128x128xbf16>, vector<8x128xf32> -> vector<8x128xf32>
    %c0_10 = arith.constant 0 : index
    %c0_11 = arith.constant 0 : index
    %9 = vector.load %arg5[%c0_10, %c0_11] : memref<1x128xf32, #tpu.memory_space<vmem>>, vector<1x128xf32>
    %10 = vector.broadcast %9 : vector<1x128xf32> to vector<8x128xf32>
    %11 = arith.addf %8, %10 : vector<8x128xf32>
    %c0_12 = arith.constant 0 : index
    %c0_13 = arith.constant 0 : index
    %c0_14 = arith.constant 0 : index
    %c0_15 = arith.constant 0 : index
    %12 = vector.load %arg3[%c0_12, %c0_13, %c0_14, %c0_15] : memref<1x1x24x128xbf16, #tpu.memory_space<vmem>>, vector<1x1x24x128xbf16>
    %13 = vector.shape_cast %12 : vector<1x1x24x128xbf16> to vector<24x128xbf16>
    %c0_16 = arith.constant 0 : index
    %c0_17 = arith.constant 0 : index
    %14 = vector.load %arg4[%c0_16, %c0_17] : memref<128x128xbf16, #tpu.memory_space<vmem>>, vector<128x128xbf16>
    %cst_18 = arith.constant dense<0.000000e+00> : vector<24x128xf32>
    %15 = tpu.matmul %13, %14, %cst_18 {dimension_numbers = #tpu.dot_dimension_numbers<[1], [0], [0], [1], [0, 0, 1, 1], [], []>} : vector<24x128xbf16>, vector<128x128xbf16>, vector<24x128xf32> -> vector<24x128xf32>
    %c0_19 = arith.constant 0 : index
    %c0_20 = arith.constant 0 : index
    %16 = vector.load %arg5[%c0_19, %c0_20] : memref<1x128xf32, #tpu.memory_space<vmem>>, vector<1x128xf32>
    %17 = vector.broadcast %16 : vector<1x128xf32> to vector<24x128xf32>
    %18 = arith.addf %15, %17 : vector<24x128xf32>
    %c0_21 = arith.constant 0 : index
    %c0_22 = arith.constant 0 : index
    %c0_23 = arith.constant 0 : index
    %19 = vector.load %arg14[%c0_21, %c0_22, %c0_23] : memref<1x8x128xf32, #tpu.memory_space<vmem>>, vector<1x8x128xf32>
    %20 = vector.shape_cast %19 : vector<1x8x128xf32> to vector<8x128xf32>
    %21 = vector.shape_cast %11 : vector<8x128xf32> to vector<1x8x128xf32>
    tpu.vector_store %arg14[%c0_21, %c0_22, %c0_23], %21 {strides = array<i32>} : memref<1x8x128xf32, #tpu.memory_space<vmem>>, vector<1x8x128xf32>,
    %c0_24 = arith.constant 0 : index
    %c0_25 = arith.constant 0 : index
    %c0_26 = arith.constant 0 : index
    %22 = vector.load %arg15[%c0_24, %c0_25, %c0_26] : memref<1x8x128xf32, #tpu.memory_space<vmem>>, vector<1x8x128xf32>
    %23 = vector.shape_cast %22 : vector<1x8x128xf32> to vector<8x128xf32>
    %24 = vector.shape_cast %11 : vector<8x128xf32> to vector<1x8x128xf32>
    tpu.vector_store %arg15[%c0_24, %c0_25, %c0_26], %24 {strides = array<i32>} : memref<1x8x128xf32, #tpu.memory_space<vmem>>, vector<1x8x128xf32>,
    %25 = arith.truncf %18 : vector<24x128xf32> to vector<24x128xbf16>
    %c4 = arith.constant 4 : index
    %c0_27 = arith.constant 0 : index
    %26 = vector.load %arg16[%c4, %c0_27] : memref<36x128xbf16, #tpu.memory_space<vmem>>, vector<24x128xbf16>
    tpu.vector_store %arg16[%c4, %c0_27], %25 {strides = array<i32>} : memref<36x128xbf16, #tpu.memory_space<vmem>>, vector<24x128xbf16>,
    %27 = arith.truncf %11 : vector<8x128xf32> to vector<8x128xbf16>
    %c28 = arith.constant 28 : index
    %c0_28 = arith.constant 0 : index
    %28 = vector.load %arg16[%c28, %c0_28] : memref<36x128xbf16, #tpu.memory_space<vmem>>, vector<8x128xbf16>
    tpu.vector_store %arg16[%c28, %c0_28], %27 {strides = array<i32>} : memref<36x128xbf16, #tpu.memory_space<vmem>>, vector<8x128xbf16>,
    %29 = arith.extui %0 : i1 to i32
    %c0_i32_29 = arith.constant 0 : i32
    %30 = arith.cmpi ne, %29, %c0_i32_29 : i32
    scf.if %30 {
      %cst_234 = arith.constant 0.000000e+00 : bf16
      %211 = vector.broadcast %cst_234 : bf16 to vector<24x128xbf16>
      %c4_235 = arith.constant 4 : index
      %c0_236 = arith.constant 0 : index
      %212 = vector.load %arg16[%c4_235, %c0_236] : memref<36x128xbf16, #tpu.memory_space<vmem>>, vector<24x128xbf16>
      tpu.vector_store %arg16[%c4_235, %c0_236], %211 {strides = array<i32>} : memref<36x128xbf16, #tpu.memory_space<vmem>>, vector<24x128xbf16>,
    } else {
    }
    %c0_30 = arith.constant 0 : index
    %c0_31 = arith.constant 0 : index
    %31 = vector.load %arg16[%c0_30, %c0_31] : memref<36x128xbf16, #tpu.memory_space<vmem>>, vector<32x128xbf16>
    %c0_32 = arith.constant 0 : index
    %c0_33 = arith.constant 0 : index
    %c0_34 = arith.constant 0 : index
    %32 = vector.load %arg6[%c0_32, %c0_33, %c0_34] : memref<5x128x128xbf16, #tpu.memory_space<vmem>>, vector<1x128x128xbf16>
    %33 = vector.shape_cast %32 : vector<1x128x128xbf16> to vector<128x128xbf16>
    %cst_35 = arith.constant dense<0.000000e+00> : vector<32x128xf32>
    %34 = tpu.matmul %31, %33, %cst_35 {dimension_numbers = #tpu.dot_dimension_numbers<[1], [0], [0], [1], [0, 0, 1, 1], [], []>} : vector<32x128xbf16>, vector<128x128xbf16>, vector<32x128xf32> -> vector<32x128xf32>
    %c1 = arith.constant 1 : index
    %c0_36 = arith.constant 0 : index
    %35 = vector.load %arg16[%c1, %c0_36] : memref<36x128xbf16, #tpu.memory_space<vmem>>, vector<32x128xbf16>
    %c1_37 = arith.constant 1 : index
    %c0_38 = arith.constant 0 : index
    %c0_39 = arith.constant 0 : index
    %36 = vector.load %arg6[%c1_37, %c0_38, %c0_39] : memref<5x128x128xbf16, #tpu.memory_space<vmem>>, vector<1x128x128xbf16>
    %37 = vector.shape_cast %36 : vector<1x128x128xbf16> to vector<128x128xbf16>
    %cst_40 = arith.constant dense<0.000000e+00> : vector<32x128xf32>
    %38 = tpu.matmul %35, %37, %cst_40 {dimension_numbers = #tpu.dot_dimension_numbers<[1], [0], [0], [1], [0, 0, 1, 1], [], []>} : vector<32x128xbf16>, vector<128x128xbf16>, vector<32x128xf32> -> vector<32x128xf32>
    %39 = arith.addf %34, %38 : vector<32x128xf32>
    %c2 = arith.constant 2 : index
    %c0_41 = arith.constant 0 : index
    %40 = vector.load %arg16[%c2, %c0_41] : memref<36x128xbf16, #tpu.memory_space<vmem>>, vector<32x128xbf16>
    %c2_42 = arith.constant 2 : index
    %c0_43 = arith.constant 0 : index
    %c0_44 = arith.constant 0 : index
    %41 = vector.load %arg6[%c2_42, %c0_43, %c0_44] : memref<5x128x128xbf16, #tpu.memory_space<vmem>>, vector<1x128x128xbf16>
    %42 = vector.shape_cast %41 : vector<1x128x128xbf16> to vector<128x128xbf16>
    %cst_45 = arith.constant dense<0.000000e+00> : vector<32x128xf32>
    %43 = tpu.matmul %40, %42, %cst_45 {dimension_numbers = #tpu.dot_dimension_numbers<[1], [0], [0], [1], [0, 0, 1, 1], [], []>} : vector<32x128xbf16>, vector<128x128xbf16>, vector<32x128xf32> -> vector<32x128xf32>
    %44 = arith.addf %39, %43 : vector<32x128xf32>
    %c3 = arith.constant 3 : index
    %c0_46 = arith.constant 0 : index
    %45 = vector.load %arg16[%c3, %c0_46] : memref<36x128xbf16, #tpu.memory_space<vmem>>, vector<32x128xbf16>
    %c3_47 = arith.constant 3 : index
    %c0_48 = arith.constant 0 : index
    %c0_49 = arith.constant 0 : index
    %46 = vector.load %arg6[%c3_47, %c0_48, %c0_49] : memref<5x128x128xbf16, #tpu.memory_space<vmem>>, vector<1x128x128xbf16>
    %47 = vector.shape_cast %46 : vector<1x128x128xbf16> to vector<128x128xbf16>
    %cst_50 = arith.constant dense<0.000000e+00> : vector<32x128xf32>
    %48 = tpu.matmul %45, %47, %cst_50 {dimension_numbers = #tpu.dot_dimension_numbers<[1], [0], [0], [1], [0, 0, 1, 1], [], []>} : vector<32x128xbf16>, vector<128x128xbf16>, vector<32x128xf32> -> vector<32x128xf32>
    %49 = arith.addf %44, %48 : vector<32x128xf32>
    %c4_51 = arith.constant 4 : index
    %c0_52 = arith.constant 0 : index
    %50 = vector.load %arg16[%c4_51, %c0_52] : memref<36x128xbf16, #tpu.memory_space<vmem>>, vector<32x128xbf16>
    %c4_53 = arith.constant 4 : index
    %c0_54 = arith.constant 0 : index
    %c0_55 = arith.constant 0 : index
    %51 = vector.load %arg6[%c4_53, %c0_54, %c0_55] : memref<5x128x128xbf16, #tpu.memory_space<vmem>>, vector<1x128x128xbf16>
    %52 = vector.shape_cast %51 : vector<1x128x128xbf16> to vector<128x128xbf16>
    %cst_56 = arith.constant dense<0.000000e+00> : vector<32x128xf32>
    %53 = tpu.matmul %50, %52, %cst_56 {dimension_numbers = #tpu.dot_dimension_numbers<[1], [0], [0], [1], [0, 0, 1, 1], [], []>} : vector<32x128xbf16>, vector<128x128xbf16>, vector<32x128xf32> -> vector<32x128xf32>
    %54 = arith.addf %49, %53 : vector<32x128xf32>
    %c0_57 = arith.constant 0 : index
    %c0_58 = arith.constant 0 : index
    %55 = vector.load %arg7[%c0_57, %c0_58] : memref<1x128xf32, #tpu.memory_space<vmem>>, vector<1x128xf32>
    %56 = vector.broadcast %55 : vector<1x128xf32> to vector<32x128xf32>
    %57 = arith.mulf %54, %56 : vector<32x128xf32>
    %c0_59 = arith.constant 0 : index
    %c0_60 = arith.constant 0 : index
    %58 = vector.load %arg8[%c0_59, %c0_60] : memref<1x128xf32, #tpu.memory_space<vmem>>, vector<1x128xf32>
    %59 = vector.broadcast %58 : vector<1x128xf32> to vector<32x128xf32>
    %60 = arith.addf %57, %59 : vector<32x128xf32>
    %61 = math.tanh %60 : vector<32x128xf32>
    %62 = arith.truncf %61 : vector<32x128xf32> to vector<32x128xbf16>
    %c4_61 = arith.constant 4 : index
    %c0_62 = arith.constant 0 : index
    %63 = vector.load %arg17[%c4_61, %c0_62] : memref<36x128xbf16, #tpu.memory_space<vmem>>, vector<32x128xbf16>
    tpu.vector_store %arg17[%c4_61, %c0_62], %62 {strides = array<i32>} : memref<36x128xbf16, #tpu.memory_space<vmem>>, vector<32x128xbf16>,
    %64 = arith.extui %0 : i1 to i32
    %c0_i32_63 = arith.constant 0 : i32
    %65 = arith.cmpi ne, %64, %c0_i32_63 : i32
    scf.if %65 {
      %cst_234 = arith.constant 0.000000e+00 : bf16
      %211 = vector.broadcast %cst_234 : bf16 to vector<24x128xbf16>
      %c4_235 = arith.constant 4 : index
      %c0_236 = arith.constant 0 : index
      %212 = vector.load %arg17[%c4_235, %c0_236] : memref<36x128xbf16, #tpu.memory_space<vmem>>, vector<24x128xbf16>
      tpu.vector_store %arg17[%c4_235, %c0_236], %211 {strides = array<i32>} : memref<36x128xbf16, #tpu.memory_space<vmem>>, vector<24x128xbf16>,
    } else {
    }
    %c0_64 = arith.constant 0 : index
    %c0_65 = arith.constant 0 : index
    %66 = vector.load %arg17[%c0_64, %c0_65] : memref<36x128xbf16, #tpu.memory_space<vmem>>, vector<32x128xbf16>
    %c0_66 = arith.constant 0 : index
    %c0_67 = arith.constant 0 : index
    %c0_68 = arith.constant 0 : index
    %c0_69 = arith.constant 0 : index
    %67 = vector.load %arg9[%c0_66, %c0_67, %c0_68, %c0_69] : memref<3x5x128x128xbf16, #tpu.memory_space<vmem>>, vector<1x1x128x128xbf16>
    %68 = vector.shape_cast %67 : vector<1x1x128x128xbf16> to vector<128x128xbf16>
    %cst_70 = arith.constant dense<0.000000e+00> : vector<32x128xf32>
    %69 = tpu.matmul %66, %68, %cst_70 {dimension_numbers = #tpu.dot_dimension_numbers<[1], [0], [0], [1], [0, 0, 1, 1], [], []>} : vector<32x128xbf16>, vector<128x128xbf16>, vector<32x128xf32> -> vector<32x128xf32>
    %c1_71 = arith.constant 1 : index
    %c0_72 = arith.constant 0 : index
    %70 = vector.load %arg17[%c1_71, %c0_72] : memref<36x128xbf16, #tpu.memory_space<vmem>>, vector<32x128xbf16>
    %c0_73 = arith.constant 0 : index
    %c1_74 = arith.constant 1 : index
    %c0_75 = arith.constant 0 : index
    %c0_76 = arith.constant 0 : index
    %71 = vector.load %arg9[%c0_73, %c1_74, %c0_75, %c0_76] : memref<3x5x128x128xbf16, #tpu.memory_space<vmem>>, vector<1x1x128x128xbf16>
    %72 = vector.shape_cast %71 : vector<1x1x128x128xbf16> to vector<128x128xbf16>
    %cst_77 = arith.constant dense<0.000000e+00> : vector<32x128xf32>
    %73 = tpu.matmul %70, %72, %cst_77 {dimension_numbers = #tpu.dot_dimension_numbers<[1], [0], [0], [1], [0, 0, 1, 1], [], []>} : vector<32x128xbf16>, vector<128x128xbf16>, vector<32x128xf32> -> vector<32x128xf32>
    %74 = arith.addf %69, %73 : vector<32x128xf32>
    %c2_78 = arith.constant 2 : index
    %c0_79 = arith.constant 0 : index
    %75 = vector.load %arg17[%c2_78, %c0_79] : memref<36x128xbf16, #tpu.memory_space<vmem>>, vector<32x128xbf16>
    %c0_80 = arith.constant 0 : index
    %c2_81 = arith.constant 2 : index
    %c0_82 = arith.constant 0 : index
    %c0_83 = arith.constant 0 : index
    %76 = vector.load %arg9[%c0_80, %c2_81, %c0_82, %c0_83] : memref<3x5x128x128xbf16, #tpu.memory_space<vmem>>, vector<1x1x128x128xbf16>
    %77 = vector.shape_cast %76 : vector<1x1x128x128xbf16> to vector<128x128xbf16>
    %cst_84 = arith.constant dense<0.000000e+00> : vector<32x128xf32>
    %78 = tpu.matmul %75, %77, %cst_84 {dimension_numbers = #tpu.dot_dimension_numbers<[1], [0], [0], [1], [0, 0, 1, 1], [], []>} : vector<32x128xbf16>, vector<128x128xbf16>, vector<32x128xf32> -> vector<32x128xf32>
    %79 = arith.addf %74, %78 : vector<32x128xf32>
    %c3_85 = arith.constant 3 : index
    %c0_86 = arith.constant 0 : index
    %80 = vector.load %arg17[%c3_85, %c0_86] : memref<36x128xbf16, #tpu.memory_space<vmem>>, vector<32x128xbf16>
    %c0_87 = arith.constant 0 : index
    %c3_88 = arith.constant 3 : index
    %c0_89 = arith.constant 0 : index
    %c0_90 = arith.constant 0 : index
    %81 = vector.load %arg9[%c0_87, %c3_88, %c0_89, %c0_90] : memref<3x5x128x128xbf16, #tpu.memory_space<vmem>>, vector<1x1x128x128xbf16>
    %82 = vector.shape_cast %81 : vector<1x1x128x128xbf16> to vector<128x128xbf16>
    %cst_91 = arith.constant dense<0.000000e+00> : vector<32x128xf32>
    %83 = tpu.matmul %80, %82, %cst_91 {dimension_numbers = #tpu.dot_dimension_numbers<[1], [0], [0], [1], [0, 0, 1, 1], [], []>} : vector<32x128xbf16>, vector<128x128xbf16>, vector<32x128xf32> -> vector<32x128xf32>
    %84 = arith.addf %79, %83 : vector<32x128xf32>
    %c4_92 = arith.constant 4 : index
    %c0_93 = arith.constant 0 : index
    %85 = vector.load %arg17[%c4_92, %c0_93] : memref<36x128xbf16, #tpu.memory_space<vmem>>, vector<32x128xbf16>
    %c0_94 = arith.constant 0 : index
    %c4_95 = arith.constant 4 : index
    %c0_96 = arith.constant 0 : index
    %c0_97 = arith.constant 0 : index
    %86 = vector.load %arg9[%c0_94, %c4_95, %c0_96, %c0_97] : memref<3x5x128x128xbf16, #tpu.memory_space<vmem>>, vector<1x1x128x128xbf16>
    %87 = vector.shape_cast %86 : vector<1x1x128x128xbf16> to vector<128x128xbf16>
    %cst_98 = arith.constant dense<0.000000e+00> : vector<32x128xf32>
    %88 = tpu.matmul %85, %87, %cst_98 {dimension_numbers = #tpu.dot_dimension_numbers<[1], [0], [0], [1], [0, 0, 1, 1], [], []>} : vector<32x128xbf16>, vector<128x128xbf16>, vector<32x128xf32> -> vector<32x128xf32>
    %89 = arith.addf %84, %88 : vector<32x128xf32>
    %c0_99 = arith.constant 0 : index
    %c0_100 = arith.constant 0 : index
    %c0_101 = arith.constant 0 : index
    %90 = vector.load %arg10[%c0_99, %c0_100, %c0_101] : memref<3x1x128xf32, #tpu.memory_space<vmem>>, vector<1x1x128xf32>
    %91 = vector.shape_cast %90 : vector<1x1x128xf32> to vector<1x128xf32>
    %92 = vector.broadcast %91 : vector<1x128xf32> to vector<32x128xf32>
    %93 = arith.mulf %89, %92 : vector<32x128xf32>
    %c0_102 = arith.constant 0 : index
    %c0_103 = arith.constant 0 : index
    %c0_104 = arith.constant 0 : index
    %94 = vector.load %arg11[%c0_102, %c0_103, %c0_104] : memref<3x1x128xf32, #tpu.memory_space<vmem>>, vector<1x1x128xf32>
    %95 = vector.shape_cast %94 : vector<1x1x128xf32> to vector<1x128xf32>
    %96 = vector.broadcast %95 : vector<1x128xf32> to vector<32x128xf32>
    %97 = arith.addf %93, %96 : vector<32x128xf32>
    %98 = math.tanh %97 : vector<32x128xf32>
    %99 = arith.truncf %98 : vector<32x128xf32> to vector<32x128xbf16>
    %c4_105 = arith.constant 4 : index
    %c0_106 = arith.constant 0 : index
    %100 = vector.load %arg17[%c4_105, %c0_106] : memref<36x128xbf16, #tpu.memory_space<vmem>>, vector<32x128xbf16>
    tpu.vector_store %arg17[%c4_105, %c0_106], %99 {strides = array<i32>} : memref<36x128xbf16, #tpu.memory_space<vmem>>, vector<32x128xbf16>,
    %101 = arith.extui %0 : i1 to i32
    %c0_i32_107 = arith.constant 0 : i32
    %102 = arith.cmpi ne, %101, %c0_i32_107 : i32
    scf.if %102 {
      %cst_234 = arith.constant 0.000000e+00 : bf16
      %211 = vector.broadcast %cst_234 : bf16 to vector<24x128xbf16>
      %c4_235 = arith.constant 4 : index
      %c0_236 = arith.constant 0 : index
      %212 = vector.load %arg17[%c4_235, %c0_236] : memref<36x128xbf16, #tpu.memory_space<vmem>>, vector<24x128xbf16>
      tpu.vector_store %arg17[%c4_235, %c0_236], %211 {strides = array<i32>} : memref<36x128xbf16, #tpu.memory_space<vmem>>, vector<24x128xbf16>,
    } else {
    }
    %c0_108 = arith.constant 0 : index
    %c0_109 = arith.constant 0 : index
    %103 = vector.load %arg17[%c0_108, %c0_109] : memref<36x128xbf16, #tpu.memory_space<vmem>>, vector<32x128xbf16>
    %c1_110 = arith.constant 1 : index
    %c0_111 = arith.constant 0 : index
    %c0_112 = arith.constant 0 : index
    %c0_113 = arith.constant 0 : index
    %104 = vector.load %arg9[%c1_110, %c0_111, %c0_112, %c0_113] : memref<3x5x128x128xbf16, #tpu.memory_space<vmem>>, vector<1x1x128x128xbf16>
    %105 = vector.shape_cast %104 : vector<1x1x128x128xbf16> to vector<128x128xbf16>
    %cst_114 = arith.constant dense<0.000000e+00> : vector<32x128xf32>
    %106 = tpu.matmul %103, %105, %cst_114 {dimension_numbers = #tpu.dot_dimension_numbers<[1], [0], [0], [1], [0, 0, 1, 1], [], []>} : vector<32x128xbf16>, vector<128x128xbf16>, vector<32x128xf32> -> vector<32x128xf32>
    %c1_115 = arith.constant 1 : index
    %c0_116 = arith.constant 0 : index
    %107 = vector.load %arg17[%c1_115, %c0_116] : memref<36x128xbf16, #tpu.memory_space<vmem>>, vector<32x128xbf16>
    %c1_117 = arith.constant 1 : index
    %c1_118 = arith.constant 1 : index
    %c0_119 = arith.constant 0 : index
    %c0_120 = arith.constant 0 : index
    %108 = vector.load %arg9[%c1_117, %c1_118, %c0_119, %c0_120] : memref<3x5x128x128xbf16, #tpu.memory_space<vmem>>, vector<1x1x128x128xbf16>
    %109 = vector.shape_cast %108 : vector<1x1x128x128xbf16> to vector<128x128xbf16>
    %cst_121 = arith.constant dense<0.000000e+00> : vector<32x128xf32>
    %110 = tpu.matmul %107, %109, %cst_121 {dimension_numbers = #tpu.dot_dimension_numbers<[1], [0], [0], [1], [0, 0, 1, 1], [], []>} : vector<32x128xbf16>, vector<128x128xbf16>, vector<32x128xf32> -> vector<32x128xf32>
    %111 = arith.addf %106, %110 : vector<32x128xf32>
    %c2_122 = arith.constant 2 : index
    %c0_123 = arith.constant 0 : index
    %112 = vector.load %arg17[%c2_122, %c0_123] : memref<36x128xbf16, #tpu.memory_space<vmem>>, vector<32x128xbf16>
    %c1_124 = arith.constant 1 : index
    %c2_125 = arith.constant 2 : index
    %c0_126 = arith.constant 0 : index
    %c0_127 = arith.constant 0 : index
    %113 = vector.load %arg9[%c1_124, %c2_125, %c0_126, %c0_127] : memref<3x5x128x128xbf16, #tpu.memory_space<vmem>>, vector<1x1x128x128xbf16>
    %114 = vector.shape_cast %113 : vector<1x1x128x128xbf16> to vector<128x128xbf16>
    %cst_128 = arith.constant dense<0.000000e+00> : vector<32x128xf32>
    %115 = tpu.matmul %112, %114, %cst_128 {dimension_numbers = #tpu.dot_dimension_numbers<[1], [0], [0], [1], [0, 0, 1, 1], [], []>} : vector<32x128xbf16>, vector<128x128xbf16>, vector<32x128xf32> -> vector<32x128xf32>
    %116 = arith.addf %111, %115 : vector<32x128xf32>
    %c3_129 = arith.constant 3 : index
    %c0_130 = arith.constant 0 : index
    %117 = vector.load %arg17[%c3_129, %c0_130] : memref<36x128xbf16, #tpu.memory_space<vmem>>, vector<32x128xbf16>
    %c1_131 = arith.constant 1 : index
    %c3_132 = arith.constant 3 : index
    %c0_133 = arith.constant 0 : index
    %c0_134 = arith.constant 0 : index
    %118 = vector.load %arg9[%c1_131, %c3_132, %c0_133, %c0_134] : memref<3x5x128x128xbf16, #tpu.memory_space<vmem>>, vector<1x1x128x128xbf16>
    %119 = vector.shape_cast %118 : vector<1x1x128x128xbf16> to vector<128x128xbf16>
    %cst_135 = arith.constant dense<0.000000e+00> : vector<32x128xf32>
    %120 = tpu.matmul %117, %119, %cst_135 {dimension_numbers = #tpu.dot_dimension_numbers<[1], [0], [0], [1], [0, 0, 1, 1], [], []>} : vector<32x128xbf16>, vector<128x128xbf16>, vector<32x128xf32> -> vector<32x128xf32>
    %121 = arith.addf %116, %120 : vector<32x128xf32>
    %c4_136 = arith.constant 4 : index
    %c0_137 = arith.constant 0 : index
    %122 = vector.load %arg17[%c4_136, %c0_137] : memref<36x128xbf16, #tpu.memory_space<vmem>>, vector<32x128xbf16>
    %c1_138 = arith.constant 1 : index
    %c4_139 = arith.constant 4 : index
    %c0_140 = arith.constant 0 : index
    %c0_141 = arith.constant 0 : index
    %123 = vector.load %arg9[%c1_138, %c4_139, %c0_140, %c0_141] : memref<3x5x128x128xbf16, #tpu.memory_space<vmem>>, vector<1x1x128x128xbf16>
    %124 = vector.shape_cast %123 : vector<1x1x128x128xbf16> to vector<128x128xbf16>
    %cst_142 = arith.constant dense<0.000000e+00> : vector<32x128xf32>
    %125 = tpu.matmul %122, %124, %cst_142 {dimension_numbers = #tpu.dot_dimension_numbers<[1], [0], [0], [1], [0, 0, 1, 1], [], []>} : vector<32x128xbf16>, vector<128x128xbf16>, vector<32x128xf32> -> vector<32x128xf32>
    %126 = arith.addf %121, %125 : vector<32x128xf32>
    %c1_143 = arith.constant 1 : index
    %c0_144 = arith.constant 0 : index
    %c0_145 = arith.constant 0 : index
    %127 = vector.load %arg10[%c1_143, %c0_144, %c0_145] : memref<3x1x128xf32, #tpu.memory_space<vmem>>, vector<1x1x128xf32>
    %128 = vector.shape_cast %127 : vector<1x1x128xf32> to vector<1x128xf32>
    %129 = vector.broadcast %128 : vector<1x128xf32> to vector<32x128xf32>
    %130 = arith.mulf %126, %129 : vector<32x128xf32>
    %c1_146 = arith.constant 1 : index
    %c0_147 = arith.constant 0 : index
    %c0_148 = arith.constant 0 : index
    %131 = vector.load %arg11[%c1_146, %c0_147, %c0_148] : memref<3x1x128xf32, #tpu.memory_space<vmem>>, vector<1x1x128xf32>
    %132 = vector.shape_cast %131 : vector<1x1x128xf32> to vector<1x128xf32>
    %133 = vector.broadcast %132 : vector<1x128xf32> to vector<32x128xf32>
    %134 = arith.addf %130, %133 : vector<32x128xf32>
    %135 = math.tanh %134 : vector<32x128xf32>
    %136 = arith.truncf %135 : vector<32x128xf32> to vector<32x128xbf16>
    %c4_149 = arith.constant 4 : index
    %c0_150 = arith.constant 0 : index
    %137 = vector.load %arg17[%c4_149, %c0_150] : memref<36x128xbf16, #tpu.memory_space<vmem>>, vector<32x128xbf16>
    tpu.vector_store %arg17[%c4_149, %c0_150], %136 {strides = array<i32>} : memref<36x128xbf16, #tpu.memory_space<vmem>>, vector<32x128xbf16>,
    %138 = arith.extui %0 : i1 to i32
    %c0_i32_151 = arith.constant 0 : i32
    %139 = arith.cmpi ne, %138, %c0_i32_151 : i32
    scf.if %139 {
      %cst_234 = arith.constant 0.000000e+00 : bf16
      %211 = vector.broadcast %cst_234 : bf16 to vector<24x128xbf16>
      %c4_235 = arith.constant 4 : index
      %c0_236 = arith.constant 0 : index
      %212 = vector.load %arg17[%c4_235, %c0_236] : memref<36x128xbf16, #tpu.memory_space<vmem>>, vector<24x128xbf16>
      tpu.vector_store %arg17[%c4_235, %c0_236], %211 {strides = array<i32>} : memref<36x128xbf16, #tpu.memory_space<vmem>>, vector<24x128xbf16>,
    } else {
    }
    %c0_152 = arith.constant 0 : index
    %c0_153 = arith.constant 0 : index
    %140 = vector.load %arg17[%c0_152, %c0_153] : memref<36x128xbf16, #tpu.memory_space<vmem>>, vector<32x128xbf16>
    %c2_154 = arith.constant 2 : index
    %c0_155 = arith.constant 0 : index
    %c0_156 = arith.constant 0 : index
    %c0_157 = arith.constant 0 : index
    %141 = vector.load %arg9[%c2_154, %c0_155, %c0_156, %c0_157] : memref<3x5x128x128xbf16, #tpu.memory_space<vmem>>, vector<1x1x128x128xbf16>
    %142 = vector.shape_cast %141 : vector<1x1x128x128xbf16> to vector<128x128xbf16>
    %cst_158 = arith.constant dense<0.000000e+00> : vector<32x128xf32>
    %143 = tpu.matmul %140, %142, %cst_158 {dimension_numbers = #tpu.dot_dimension_numbers<[1], [0], [0], [1], [0, 0, 1, 1], [], []>} : vector<32x128xbf16>, vector<128x128xbf16>, vector<32x128xf32> -> vector<32x128xf32>
    %c1_159 = arith.constant 1 : index
    %c0_160 = arith.constant 0 : index
    %144 = vector.load %arg17[%c1_159, %c0_160] : memref<36x128xbf16, #tpu.memory_space<vmem>>, vector<32x128xbf16>
    %c2_161 = arith.constant 2 : index
    %c1_162 = arith.constant 1 : index
    %c0_163 = arith.constant 0 : index
    %c0_164 = arith.constant 0 : index
    %145 = vector.load %arg9[%c2_161, %c1_162, %c0_163, %c0_164] : memref<3x5x128x128xbf16, #tpu.memory_space<vmem>>, vector<1x1x128x128xbf16>
    %146 = vector.shape_cast %145 : vector<1x1x128x128xbf16> to vector<128x128xbf16>
    %cst_165 = arith.constant dense<0.000000e+00> : vector<32x128xf32>
    %147 = tpu.matmul %144, %146, %cst_165 {dimension_numbers = #tpu.dot_dimension_numbers<[1], [0], [0], [1], [0, 0, 1, 1], [], []>} : vector<32x128xbf16>, vector<128x128xbf16>, vector<32x128xf32> -> vector<32x128xf32>
    %148 = arith.addf %143, %147 : vector<32x128xf32>
    %c2_166 = arith.constant 2 : index
    %c0_167 = arith.constant 0 : index
    %149 = vector.load %arg17[%c2_166, %c0_167] : memref<36x128xbf16, #tpu.memory_space<vmem>>, vector<32x128xbf16>
    %c2_168 = arith.constant 2 : index
    %c2_169 = arith.constant 2 : index
    %c0_170 = arith.constant 0 : index
    %c0_171 = arith.constant 0 : index
    %150 = vector.load %arg9[%c2_168, %c2_169, %c0_170, %c0_171] : memref<3x5x128x128xbf16, #tpu.memory_space<vmem>>, vector<1x1x128x128xbf16>
    %151 = vector.shape_cast %150 : vector<1x1x128x128xbf16> to vector<128x128xbf16>
    %cst_172 = arith.constant dense<0.000000e+00> : vector<32x128xf32>
    %152 = tpu.matmul %149, %151, %cst_172 {dimension_numbers = #tpu.dot_dimension_numbers<[1], [0], [0], [1], [0, 0, 1, 1], [], []>} : vector<32x128xbf16>, vector<128x128xbf16>, vector<32x128xf32> -> vector<32x128xf32>
    %153 = arith.addf %148, %152 : vector<32x128xf32>
    %c3_173 = arith.constant 3 : index
    %c0_174 = arith.constant 0 : index
    %154 = vector.load %arg17[%c3_173, %c0_174] : memref<36x128xbf16, #tpu.memory_space<vmem>>, vector<32x128xbf16>
    %c2_175 = arith.constant 2 : index
    %c3_176 = arith.constant 3 : index
    %c0_177 = arith.constant 0 : index
    %c0_178 = arith.constant 0 : index
    %155 = vector.load %arg9[%c2_175, %c3_176, %c0_177, %c0_178] : memref<3x5x128x128xbf16, #tpu.memory_space<vmem>>, vector<1x1x128x128xbf16>
    %156 = vector.shape_cast %155 : vector<1x1x128x128xbf16> to vector<128x128xbf16>
    %cst_179 = arith.constant dense<0.000000e+00> : vector<32x128xf32>
    %157 = tpu.matmul %154, %156, %cst_179 {dimension_numbers = #tpu.dot_dimension_numbers<[1], [0], [0], [1], [0, 0, 1, 1], [], []>} : vector<32x128xbf16>, vector<128x128xbf16>, vector<32x128xf32> -> vector<32x128xf32>
    %158 = arith.addf %153, %157 : vector<32x128xf32>
    %c4_180 = arith.constant 4 : index
    %c0_181 = arith.constant 0 : index
    %159 = vector.load %arg17[%c4_180, %c0_181] : memref<36x128xbf16, #tpu.memory_space<vmem>>, vector<32x128xbf16>
    %c2_182 = arith.constant 2 : index
    %c4_183 = arith.constant 4 : index
    %c0_184 = arith.constant 0 : index
    %c0_185 = arith.constant 0 : index
    %160 = vector.load %arg9[%c2_182, %c4_183, %c0_184, %c0_185] : memref<3x5x128x128xbf16, #tpu.memory_space<vmem>>, vector<1x1x128x128xbf16>
    %161 = vector.shape_cast %160 : vector<1x1x128x128xbf16> to vector<128x128xbf16>
    %cst_186 = arith.constant dense<0.000000e+00> : vector<32x128xf32>
    %162 = tpu.matmul %159, %161, %cst_186 {dimension_numbers = #tpu.dot_dimension_numbers<[1], [0], [0], [1], [0, 0, 1, 1], [], []>} : vector<32x128xbf16>, vector<128x128xbf16>, vector<32x128xf32> -> vector<32x128xf32>
    %163 = arith.addf %158, %162 : vector<32x128xf32>
    %c2_187 = arith.constant 2 : index
    %c0_188 = arith.constant 0 : index
    %c0_189 = arith.constant 0 : index
    %164 = vector.load %arg10[%c2_187, %c0_188, %c0_189] : memref<3x1x128xf32, #tpu.memory_space<vmem>>, vector<1x1x128xf32>
    %165 = vector.shape_cast %164 : vector<1x1x128xf32> to vector<1x128xf32>
    %166 = vector.broadcast %165 : vector<1x128xf32> to vector<32x128xf32>
    %167 = arith.mulf %163, %166 : vector<32x128xf32>
    %c2_190 = arith.constant 2 : index
    %c0_191 = arith.constant 0 : index
    %c0_192 = arith.constant 0 : index
    %168 = vector.load %arg11[%c2_190, %c0_191, %c0_192] : memref<3x1x128xf32, #tpu.memory_space<vmem>>, vector<1x1x128xf32>
    %169 = vector.shape_cast %168 : vector<1x1x128xf32> to vector<1x128xf32>
    %170 = vector.broadcast %169 : vector<1x128xf32> to vector<32x128xf32>
    %171 = arith.addf %167, %170 : vector<32x128xf32>
    %172 = math.tanh %171 : vector<32x128xf32>
    %173 = arith.truncf %172 : vector<32x128xf32> to vector<32x128xbf16>
    %c4_193 = arith.constant 4 : index
    %c0_194 = arith.constant 0 : index
    %174 = vector.load %arg17[%c4_193, %c0_194] : memref<36x128xbf16, #tpu.memory_space<vmem>>, vector<32x128xbf16>
    tpu.vector_store %arg17[%c4_193, %c0_194], %173 {strides = array<i32>} : memref<36x128xbf16, #tpu.memory_space<vmem>>, vector<32x128xbf16>,
    %175 = arith.extui %0 : i1 to i32
    %c0_i32_195 = arith.constant 0 : i32
    %176 = arith.cmpi ne, %175, %c0_i32_195 : i32
    scf.if %176 {
      %cst_234 = arith.constant 0.000000e+00 : bf16
      %211 = vector.broadcast %cst_234 : bf16 to vector<24x128xbf16>
      %c4_235 = arith.constant 4 : index
      %c0_236 = arith.constant 0 : index
      %212 = vector.load %arg17[%c4_235, %c0_236] : memref<36x128xbf16, #tpu.memory_space<vmem>>, vector<24x128xbf16>
      tpu.vector_store %arg17[%c4_235, %c0_236], %211 {strides = array<i32>} : memref<36x128xbf16, #tpu.memory_space<vmem>>, vector<24x128xbf16>,
    } else {
    }
    %c0_196 = arith.constant 0 : index
    %c0_197 = arith.constant 0 : index
    %177 = vector.load %arg17[%c0_196, %c0_197] : memref<36x128xbf16, #tpu.memory_space<vmem>>, vector<32x128xbf16>
    %c0_198 = arith.constant 0 : index
    %c0_199 = arith.constant 0 : index
    %c0_200 = arith.constant 0 : index
    %178 = vector.load %arg12[%c0_198, %c0_199, %c0_200] : memref<5x128x128xbf16, #tpu.memory_space<vmem>>, vector<1x128x128xbf16>
    %179 = vector.shape_cast %178 : vector<1x128x128xbf16> to vector<128x128xbf16>
    %cst_201 = arith.constant dense<0.000000e+00> : vector<32x128xf32>
    %180 = tpu.matmul %177, %179, %cst_201 {dimension_numbers = #tpu.dot_dimension_numbers<[1], [0], [0], [1], [0, 0, 1, 1], [], []>} : vector<32x128xbf16>, vector<128x128xbf16>, vector<32x128xf32> -> vector<32x128xf32>
    %c1_202 = arith.constant 1 : index
    %c0_203 = arith.constant 0 : index
    %181 = vector.load %arg17[%c1_202, %c0_203] : memref<36x128xbf16, #tpu.memory_space<vmem>>, vector<32x128xbf16>
    %c1_204 = arith.constant 1 : index
    %c0_205 = arith.constant 0 : index
    %c0_206 = arith.constant 0 : index
    %182 = vector.load %arg12[%c1_204, %c0_205, %c0_206] : memref<5x128x128xbf16, #tpu.memory_space<vmem>>, vector<1x128x128xbf16>
    %183 = vector.shape_cast %182 : vector<1x128x128xbf16> to vector<128x128xbf16>
    %cst_207 = arith.constant dense<0.000000e+00> : vector<32x128xf32>
    %184 = tpu.matmul %181, %183, %cst_207 {dimension_numbers = #tpu.dot_dimension_numbers<[1], [0], [0], [1], [0, 0, 1, 1], [], []>} : vector<32x128xbf16>, vector<128x128xbf16>, vector<32x128xf32> -> vector<32x128xf32>
    %185 = arith.addf %180, %184 : vector<32x128xf32>
    %c2_208 = arith.constant 2 : index
    %c0_209 = arith.constant 0 : index
    %186 = vector.load %arg17[%c2_208, %c0_209] : memref<36x128xbf16, #tpu.memory_space<vmem>>, vector<32x128xbf16>
    %c2_210 = arith.constant 2 : index
    %c0_211 = arith.constant 0 : index
    %c0_212 = arith.constant 0 : index
    %187 = vector.load %arg12[%c2_210, %c0_211, %c0_212] : memref<5x128x128xbf16, #tpu.memory_space<vmem>>, vector<1x128x128xbf16>
    %188 = vector.shape_cast %187 : vector<1x128x128xbf16> to vector<128x128xbf16>
    %cst_213 = arith.constant dense<0.000000e+00> : vector<32x128xf32>
    %189 = tpu.matmul %186, %188, %cst_213 {dimension_numbers = #tpu.dot_dimension_numbers<[1], [0], [0], [1], [0, 0, 1, 1], [], []>} : vector<32x128xbf16>, vector<128x128xbf16>, vector<32x128xf32> -> vector<32x128xf32>
    %190 = arith.addf %185, %189 : vector<32x128xf32>
    %c3_214 = arith.constant 3 : index
    %c0_215 = arith.constant 0 : index
    %191 = vector.load %arg17[%c3_214, %c0_215] : memref<36x128xbf16, #tpu.memory_space<vmem>>, vector<32x128xbf16>
    %c3_216 = arith.constant 3 : index
    %c0_217 = arith.constant 0 : index
    %c0_218 = arith.constant 0 : index
    %192 = vector.load %arg12[%c3_216, %c0_217, %c0_218] : memref<5x128x128xbf16, #tpu.memory_space<vmem>>, vector<1x128x128xbf16>
    %193 = vector.shape_cast %192 : vector<1x128x128xbf16> to vector<128x128xbf16>
    %cst_219 = arith.constant dense<0.000000e+00> : vector<32x128xf32>
    %194 = tpu.matmul %191, %193, %cst_219 {dimension_numbers = #tpu.dot_dimension_numbers<[1], [0], [0], [1], [0, 0, 1, 1], [], []>} : vector<32x128xbf16>, vector<128x128xbf16>, vector<32x128xf32> -> vector<32x128xf32>
    %195 = arith.addf %190, %194 : vector<32x128xf32>
    %c4_220 = arith.constant 4 : index
    %c0_221 = arith.constant 0 : index
    %196 = vector.load %arg17[%c4_220, %c0_221] : memref<36x128xbf16, #tpu.memory_space<vmem>>, vector<32x128xbf16>
    %c4_222 = arith.constant 4 : index
    %c0_223 = arith.constant 0 : index
    %c0_224 = arith.constant 0 : index
    %197 = vector.load %arg12[%c4_222, %c0_223, %c0_224] : memref<5x128x128xbf16, #tpu.memory_space<vmem>>, vector<1x128x128xbf16>
    %198 = vector.shape_cast %197 : vector<1x128x128xbf16> to vector<128x128xbf16>
    %cst_225 = arith.constant dense<0.000000e+00> : vector<32x128xf32>
    %199 = tpu.matmul %196, %198, %cst_225 {dimension_numbers = #tpu.dot_dimension_numbers<[1], [0], [0], [1], [0, 0, 1, 1], [], []>} : vector<32x128xbf16>, vector<128x128xbf16>, vector<32x128xf32> -> vector<32x128xf32>
    %200 = arith.addf %195, %199 : vector<32x128xf32>
    %c0_226 = arith.constant 0 : index
    %c0_227 = arith.constant 0 : index
    %201 = vector.load %arg13[%c0_226, %c0_227] : memref<1x128xf32, #tpu.memory_space<vmem>>, vector<1x128xf32>
    %202 = vector.broadcast %201 : vector<1x128xf32> to vector<32x128xf32>
    %203 = arith.addf %200, %202 : vector<32x128xf32>
    %c0_228 = arith.constant 0 : index
    %c0_229 = arith.constant 0 : index
    %c0_230 = arith.constant 0 : index
    %204 = vector.load %arg15[%c0_228, %c0_229, %c0_230] : memref<1x8x128xf32, #tpu.memory_space<vmem>>, vector<1x8x128xf32>
    %205 = vector.shape_cast %204 : vector<1x8x128xf32> to vector<8x128xf32>
    %206 = vector.extract_strided_slice %203 {offsets = [24, 0], sizes = [8, 128], strides = [1, 1]} : vector<32x128xf32> to vector<8x128xf32>
    %207 = arith.addf %205, %206 : vector<8x128xf32>
    %c0_231 = arith.constant 0 : index
    %c0_232 = arith.constant 0 : index
    %c0_233 = arith.constant 0 : index
    %208 = vector.load %arg15[%c0_231, %c0_232, %c0_233] : memref<1x8x128xf32, #tpu.memory_space<vmem>>, vector<1x8x128xf32>
    %209 = vector.shape_cast %208 : vector<1x8x128xf32> to vector<8x128xf32>
    %210 = vector.shape_cast %207 : vector<8x128xf32> to vector<1x8x128xf32>
    tpu.vector_store %arg15[%c0_231, %c0_232, %c0_233], %210 {strides = array<i32>} : memref<1x8x128xf32, #tpu.memory_space<vmem>>, vector<1x8x128xf32>,
    return
  }
  func.func @transform_0(%arg0: i32, %arg1: i32) -> (i32, i32, i32) {
    %c0_i32 = arith.constant 0 : i32
    %c0_i32_0 = arith.constant 0 : i32
    return %arg0, %arg1, %c0_i32 : i32, i32, i32
  }
  func.func @transform_1(%arg0: i32, %arg1: i32) -> (i32, i32, i32, i32) {
    %c0_i32 = arith.constant 0 : i32
    %c0_i32_0 = arith.constant 0 : i32
    %c0_i32_1 = arith.constant 0 : i32
    return %arg0, %arg1, %c0_i32, %c0_i32_0 : i32, i32, i32, i32
  }
  func.func @transform_2(%arg0: i32, %arg1: i32) -> (i32, i32) {
    %c0_i32 = arith.constant 0 : i32
    %c0_i32_0 = arith.constant 0 : i32
    %c0_i32_1 = arith.constant 0 : i32
    return %c0_i32, %c0_i32_0 : i32, i32
  }
  func.func @transform_3(%arg0: i32, %arg1: i32) -> (i32, i32) {
    %c0_i32 = arith.constant 0 : i32
    %c0_i32_0 = arith.constant 0 : i32
    %c0_i32_1 = arith.constant 0 : i32
    return %c0_i32, %c0_i32_0 : i32, i32
  }
  func.func @transform_4(%arg0: i32, %arg1: i32) -> (i32, i32, i32) {
    %c0_i32 = arith.constant 0 : i32
    %c0_i32_0 = arith.constant 0 : i32
    %c0_i32_1 = arith.constant 0 : i32
    %c0_i32_2 = arith.constant 0 : i32
    return %c0_i32, %c0_i32_0, %c0_i32_1 : i32, i32, i32
  }
  func.func @transform_5(%arg0: i32, %arg1: i32) -> (i32, i32) {
    %c0_i32 = arith.constant 0 : i32
    %c0_i32_0 = arith.constant 0 : i32
    %c0_i32_1 = arith.constant 0 : i32
    return %c0_i32, %c0_i32_0 : i32, i32
  }
  func.func @transform_6(%arg0: i32, %arg1: i32) -> (i32, i32) {
    %c0_i32 = arith.constant 0 : i32
    %c0_i32_0 = arith.constant 0 : i32
    %c0_i32_1 = arith.constant 0 : i32
    return %c0_i32, %c0_i32_0 : i32, i32
  }
  func.func @transform_7(%arg0: i32, %arg1: i32) -> (i32, i32, i32, i32) {
    %c0_i32 = arith.constant 0 : i32
    %c0_i32_0 = arith.constant 0 : i32
    %c0_i32_1 = arith.constant 0 : i32
    %c0_i32_2 = arith.constant 0 : i32
    %c0_i32_3 = arith.constant 0 : i32
    return %c0_i32, %c0_i32_0, %c0_i32_1, %c0_i32_2 : i32, i32, i32, i32
  }
  func.func @transform_8(%arg0: i32, %arg1: i32) -> (i32, i32, i32) {
    %c0_i32 = arith.constant 0 : i32
    %c0_i32_0 = arith.constant 0 : i32
    %c0_i32_1 = arith.constant 0 : i32
    %c0_i32_2 = arith.constant 0 : i32
    return %c0_i32, %c0_i32_0, %c0_i32_1 : i32, i32, i32
  }
  func.func @transform_9(%arg0: i32, %arg1: i32) -> (i32, i32, i32) {
    %c0_i32 = arith.constant 0 : i32
    %c0_i32_0 = arith.constant 0 : i32
    %c0_i32_1 = arith.constant 0 : i32
    %c0_i32_2 = arith.constant 0 : i32
    return %c0_i32, %c0_i32_0, %c0_i32_1 : i32, i32, i32
  }
  func.func @transform_10(%arg0: i32, %arg1: i32) -> (i32, i32, i32) {
    %c0_i32 = arith.constant 0 : i32
    %c0_i32_0 = arith.constant 0 : i32
    %c0_i32_1 = arith.constant 0 : i32
    %c0_i32_2 = arith.constant 0 : i32
    return %c0_i32, %c0_i32_0, %c0_i32_1 : i32, i32, i32
  }
  func.func @transform_11(%arg0: i32, %arg1: i32) -> (i32, i32) {
    %c0_i32 = arith.constant 0 : i32
    %c0_i32_0 = arith.constant 0 : i32
    %c0_i32_1 = arith.constant 0 : i32
    return %c0_i32, %c0_i32_0 : i32, i32
  }
  func.func @transform_12(%arg0: i32, %arg1: i32) -> (i32, i32, i32) {
    %c0_i32 = arith.constant 0 : i32
    %c0_i32_0 = arith.constant 0 : i32
    return %arg0, %arg1, %c0_i32 : i32, i32, i32
  }
  func.func @transform_13(%arg0: i32, %arg1: i32) -> (i32, i32, i32) {
    %c0_i32 = arith.constant 0 : i32
    %c0_i32_0 = arith.constant 0 : i32
    return %arg0, %arg1, %c0_i32 : i32, i32, i32
  }
}

</mosaic_0001>

<bundles_post_ra>
// kernel: tpu_custom_call.1
= control target key start
LH: loop header
LB: loop body
LE: loop exit
PB: predicated region body
PF: predicated region fallthrough
CT: control target
= control target key end

     0   :  { %s6161_s0 = inlined_call_operand.hbm [shape: bf16[2,8,128], index: 0, kind: input, shape index: {}]   ;;  %s6162_s1 = inlined_call_operand.hbm [shape: bf16[2,1,24,128], index: 1, kind: input, shape index: {}]   ;;  %s6163_s2 = inlined_call_operand.hbm [shape: bf16[128,128], index: 2, kind: input, shape index: {}]   ;;  %s6164_s3 = inlined_call_operand.hbm [shape: f32[1,128], index: 3, kind: input, shape index: {}]   ;;  %s6165_s4 = inlined_call_operand.hbm [shape: bf16[5,128,128], index: 4, kind: input, shape index: {}]   ;;  %s6166_s5 = inlined_call_operand.hbm [shape: f32[1,128], index: 5, kind: input, shape index: {}]   ;;  %s6167_s6 = inlined_call_operand.hbm [shape: f32[1,128], index: 6, kind: input, shape index: {}]   ;;  %s6168_s7 = inlined_call_operand.hbm [shape: bf16[3,5,128,128], index: 7, kind: input, shape index: {}]   ;;  %s6169_s8 = inlined_call_operand.vmem [shape: f32[3,1,128], index: 8, kind: input, shape index: {}]   ;;  %s6170_s9 = inlined_call_operand.vmem [shape: f32[3,1,128], index: 9, kind: input, shape index: {}]   ;;  %s6171_s10 = inlined_call_operand.hbm [shape: bf16[5,128,128], index: 10, kind: input, shape index: {}]   ;;  %s6172_s11 = inlined_call_operand.vmem [shape: f32[1,128], index: 11, kind: input, shape index: {}]   ;;  %s6173_s12 = inlined_call_operand.hbm [shape: f32[2,8,128], index: 12, kind: output, shape index: {0}]   ;;  %s6174_s13 = inlined_call_operand.hbm [shape: f32[2,8,128], index: 13, kind: output, shape index: {1}]  }
   0x1   :  { %6183 = sst [smem:[#allocation34_spill]] %s6163_s2 }
   0x2   :  { %6184 = sst [smem:[#allocation35_spill]] %s6164_s3 }
   0x3   :  { %6185 = sst [smem:[#allocation36_spill]] %s6165_s4 }
   0x4   :  { %6186 = sst [smem:[#allocation37_spill]] %s6166_s5 }
   0x5   :  { %6187 = sst [smem:[#allocation38_spill]] %s6167_s6 }
   0x6   :  { %6188 = sst [smem:[#allocation39_spill]] %s6168_s7 }
   0x7   :  { %6189 = sst [smem:[#allocation40_spill]] %s6170_s9 }
   0x8   :  { %6190 = sst [smem:[#allocation41_spill]] %s6171_s10 }
   0x9   :  { %6191 = sst [smem:[#allocation42_spill]] %s6172_s11 }
   0xa   :  { %6192 = sst [smem:[#allocation43_spill]] %s6173_s12 }
   0xb   :  { %6193 = sst [smem:[#allocation44_spill]] %s6174_s13 }
   0xc   :  { %19 = vsyncpa [#allocation5], 0 }
   0xd   :  { %21 = vsyncpa [#allocation5 + $0x1], 0 }
   0xe   :  { %22 = vsyncpa [#allocation8], 0 }
   0xf   :  { %24 = vsyncpa [#allocation8 + $0x1], 0 }
  0x10   :  { %25 = vsyncpa [#allocation11], 0 }
  0x11   :  { %26 = vsyncpa [#allocation14], 0 }
  0x12   :  { %27 = vsyncpa [#allocation17], 0 }
  0x13   :  { %28 = vsyncpa [#allocation6], 0 }
  0x14   :  { %30 = vsyncpa [#allocation6 + $0x1], 0 }
  0x15   :  { %31 = vsyncpa [#allocation21], 0 }
  0x16   :  { %33 = vsyncpa [#allocation21 + $0x1], 0  ;;  %s5683_s25 = smov 0   ;;  %s5685_s26 = smov 0  }
  0x17   :  { %s5687_s27 = smov 0   ;;  %s5689_s28 = smov 0  }
  0x18   :  { %s5691_s29 = smov 0   ;;  %s5693_s30 = smov 0  }
  0x19 LB: > { %6194 = sst [smem:[#allocation30_spill]] %s5589_s27  ;;  %s5714_s14 = sadd.s32 4294967295, %s5601_s30   ;;  %s5601_s30 = sphi %s5693_s30, %s39_s30   ;;  %s5597_s29 = sphi %s5691_s29, %s6226_s29   ;;  %s5593_s28 = sphi %s5689_s28, %s6225_s28   ;;  %s5589_s27 = sphi %s5687_s27, %s6221_s27   ;;  %s5585_s26 = sphi %s5685_s26, %s6224_s26   ;;  %s5581_s25 = sphi %s5683_s25, %s6223_s25  }
  0x1a   : > { %6195 = sst [smem:[#allocation31_spill]] %s5593_s28  ;;  %p3875_p0 = scmp.ge.s32.totalorder %s5601_s30, 1 }
  0x1b   : > { %p74_p1 = scmp.eq.s32.totalorder %s5714_s14, 0  ;;  %p378_p2 = scmp.lt.s32.totalorder %s5601_s30, 3 }
  0x1c   : > { %s6196_s2 = sld [smem:[#allocation34_spill]]  ;;  %s5603_s19 = smov [#allocation9]  }
  0x1d   : > { %p5722_p3 = pnand %p3875_p0, %p378_p2  ;;  %s391_s20 = sshll.u32 %s5603_s19, 4  ;;  %s392_s20 = int_to_ptr.vmem [resolvable:$true] %s391_s20 }
  0x1e   : > { %p3883_p6 = scmp.ge.s32.totalorder %s5601_s30, 2  ;;  %s6199_s3 = sld [smem:[#allocation35_spill]] }
  0x1f   : > { %p5045_p4 = pneg %p5722_p3  ;;  %s6179_s15 = smov 64  }
  0x20   : > { %s6180_s16 = smov 4   ;;  %s5606_s19 = smov [#allocation10]  }
  0x21   : > { %p5730_p5 = pnand %p5045_p4, %p74_p1  ;;  %s6200_s5 = sld [smem:[#allocation37_spill]] }
  0x22   : > { %s389_s17 = sshll.u32 %s6196_s2, 4  ;;  %s406_s2 = sshll.u32 %s5606_s19, 4  ;;  %s390_s17 = int_to_ptr.hbm [resolvable:$true] %s389_s17  ;;  %s407_s2 = int_to_ptr.vmem [resolvable:$true] %s406_s2 }
  0x23   : > { %5048 = dma.hbm_to_vmem [thread:$0]  (!%p5730_p5), %s390_s17, 1024, %s392_s20, [#allocation8], %s6179_s15, %s6179_s15, %s6180_s16  }
  0x24   : > { %s404_s24 = sshll.u32 %s6199_s3, 4  ;;  %s6201_s7 = sld [smem:[#allocation39_spill]]  ;;  %s405_s24 = int_to_ptr.hbm [resolvable:$true] %s404_s24 }
  0x25   : > { %5051 = dma.hbm_to_vmem [thread:$0]  (!%p5730_p5), %s405_s24, 16, %s407_s2, [#allocation11]  }
  0x26   : > { %s5607_s28 = smov [#allocation13]   ;;  %s5608_s17 = smov [#allocation16]  }
  0x27   : > { %s430_s12 = sshll.u32 %s6200_s5, 4  ;;  %s432_s9 = sshll.u32 %s5607_s28, 4  ;;  %s431_s12 = int_to_ptr.hbm [resolvable:$true] %s430_s12  ;;  %s433_s9 = int_to_ptr.vmem [resolvable:$true] %s432_s9 }
  0x28   : > { %5057 = dma.hbm_to_vmem [thread:$0]  (!%p5730_p5), %s431_s12, 16, %s433_s9, [#allocation14]  }
  0x29   : > { %s455_s20 = sshll.u32 %s5608_s17, 4  ;;  %s6202_s4 = sld [smem:[#allocation36_spill]]  ;;  %s456_s20 = int_to_ptr.vmem [resolvable:$true] %s455_s20 }
  0x2a   : > { %s453_s3 = sshll.u32 %s6201_s7, 4  ;;  %s6203_s6 = sld [smem:[#allocation38_spill]]  ;;  %s454_s3 = int_to_ptr.hbm [resolvable:$true] %s453_s3 }
  0x2b   : > { %5063 = dma.hbm_to_vmem [thread:$0]  (!%p5730_p5), %s454_s3, 15360, %s456_s20, [#allocation17], %s6179_s15, %s6179_s15, %s6180_s16  }
  0x2c   : > { %s5609_s9 = smov [#allocation12]   ;;  %s5610_s3 = smov [#allocation15]  }
  0x2d   : > { %s417_s12 = sshll.u32 %s5609_s9, 4  ;;  %s444_s22 = sshll.u32 %s5610_s3, 4  ;;  %s418_s12 = int_to_ptr.vmem [resolvable:$true] %s417_s12  ;;  %s445_s22 = int_to_ptr.vmem [resolvable:$true] %s444_s22 }
  0x2e   : > { %s6204_s10 = sld [smem:[#allocation41_spill]]  ;;  %s5611_s11 = smov [#allocation18]  }
  0x2f   : > { %s415_s19 = sshll.u32 %s6202_s4, 4  ;;  %s475_s13 = sshll.u32 %s5611_s11, 4  ;;  %s416_s19 = int_to_ptr.hbm [resolvable:$true] %s415_s19  ;;  %s476_s13 = int_to_ptr.vmem [resolvable:$true] %s475_s13 }
  0x30   : > { %s442_s24 = sshll.u32 %s6203_s6, 4  ;;  %s51_s2 = sadd.s32 1, %s5597_s29  ;;  %s443_s24 = int_to_ptr.hbm [resolvable:$true] %s442_s24 }
  0x31   : > { %5054 = dma.hbm_to_vmem [thread:$0]  (!%p5730_p5), %s416_s19, 5120, %s418_s12, [#allocation11], %s6179_s15, %s6179_s15, %s6180_s16  }
  0x32   : > { %5060 = dma.hbm_to_vmem [thread:$0]  (!%p5730_p5), %s443_s24, 16, %s445_s22, [#allocation14]  }
  0x33   : > { %s3874_s19 = sadd.s32 4294967294, %s5601_s30   ;;  %s60_s28 = sadd.s32 1, %s5589_s27 }
  0x34   : > { %s473_s20 = sshll.u32 %s6204_s10, 4  ;;  %p53_p7 = scmp.ge.s32.totalorder %s51_s2, 2  ;;  %s474_s20 = int_to_ptr.hbm [resolvable:$true] %s473_s20 }
  0x35   : > { %5066 = dma.hbm_to_vmem [thread:$0]  (!%p5730_p5), %s474_s20, 5120, %s476_s13, [#allocation17], %s6179_s15, %s6179_s15, %s6180_s16  }
  0x36   : > { %p67_p8 = scmp.ne.s32.totalorder %s5589_s27, %s5585_s26  ;;  %p68_p9 = scmp.eq.s32.totalorder %s5601_s30, 0 }
  0x37   : > { %p73_p10 = scmp.ne.s32.totalorder %s5585_s26, %s5581_s25  ;;  %s6228_s2 = smov (%p53_p7, %s51_s2), 0 }
  0x38   : > { %6205 = sst [smem:[#allocation32_spill]] %s6228_s2  ;;  %p5789_p11 = por %p68_p9, %p67_p8 }
  0x39   : > { %p5795_p12 = por %p74_p1, %p73_p10  ;;  %s55_s9 = ssub.s32 %s5597_s29, %s6228_s2 }
  0x3a   : > { %p337_p13 = scmp.eq.s32.totalorder %s5714_s14, 1  ;;  %p58_p0 = scmp.eq.s32.totalorder %s55_s9, 0 }
  0x3b   : > { %p343_p2 = scmp.eq.s32.totalorder %s3874_s19, 1  ;;  %p5088_p5 = scmp.lt.s32.totalorder %s5601_s30, 2 }
  0x3c   : > { %p5802_p4 = por %p337_p13, %p67_p8  ;;  %s492_s23 = sand.u32 1, %s5589_s27  }
  0x3d   : > { %s5808_s3 = scalar_select %p58_p0, %s5589_s27, %s60_s28  }
  0x3e   : > { %p5810_p7 = por %p343_p2, %p73_p10  ;;  %s3884_s17 = sshll.u32 %s492_s23, 2 }
  0x3f   : > { %6209 = sst [smem:[#allocation33_spill]] %s5808_s3  ;;  %s3885_s20 = sshll.u32 %s5597_s29, 2 }
  0x40   : > { %s501_s19 = scalar_lea.hbm %s6161_s0, %s3885_s20  ;;  %s496_s9 = scalar_lea.vmem [#allocation4], %s3884_s17 }
  0x41   : > { %s505_s15 = sshll.u32 %s496_s9, 4  ;;  %s503_s16 = sshll.u32 %s501_s19, 4  ;;  %s506_s15 = int_to_ptr.vmem [resolvable:$true] %s505_s15  ;;  %s504_s16 = int_to_ptr.hbm [resolvable:$true] %s503_s16 }
  0x42   : > { %p5068_p8 = pnand %p5088_p5, %p5789_p11  ;;  %s5006_s28 = smul.u32 12, %s492_s23 }
  0x43   : > { %s512_s4 = sand.u32 1, %s5601_s30   ;;  %s5007_s5 = smul.u32 12, %s5597_s29 }
  0x44   : > { %s493_s6 = scalar_lea.sflag [#allocation5], %s492_s23  ;;  %s516_s7 = scalar_lea.vmem [#allocation7], %s5006_s28 }
  0x45   : > { %5070 = dma.hbm_to_vmem [thread:$0]  (!%p5068_p8), %s504_s16, 64, %s506_s15, %s493_s6  }
  0x46   : > { %s526_s10 = sshll.u32 %s516_s7, 4  ;;  %s523_s27 = scalar_lea.hbm %s6162_s1, %s5007_s5  ;;  %s527_s10 = int_to_ptr.vmem [resolvable:$true] %s526_s10 }
  0x47   : > { %s524_s20 = sshll.u32 %s523_s27, 4  ;;  %s513_s17 = scalar_lea.sflag [#allocation8], %s512_s4  ;;  %s525_s20 = int_to_ptr.hbm [resolvable:$true] %s524_s20 }
  0x48   : > { %s6211_s11 = smov 4   ;;  %s6212_s13 = smov 64  }
  0x49   : > { %5073 = dma.hbm_to_vmem [thread:$0]  (!%p5068_p8), %s525_s20, 192, %s527_s10, %s513_s17, %s6212_s13, %s6212_s13, %s6211_s11  }
  0x4a   : > { %538 = sbr.rel (%p5722_p3) target bundleno = 1357 (0x54d), region = 68  ;;  %s5832_s6 = sand.u32 (!%p5722_p3), 1, %s5585_s26  }
  0x4b   : > { %s3888_s7 = sshll.u32 (!%p5722_p3), %s5832_s6, 2  ;;  %s541_s15 = scalar_lea.sflag (!%p5722_p3), [#allocation5], %s5832_s6 }
  0x4c   : > { %s5836_s5 = scalar_lea.vmem (!%p5722_p3), [#allocation4], %s3888_s7 }
  0x4f   : > { %5548 = dma.done.wait (%p5795_p12), %s541_s15, 64  }
  0x50   : > { %5550 = vsyncadd (%p5795_p12), %s541_s15, 4294967232  ;;  %s550_s4 = sand.u32 1, %s5714_s14   ;;  %s5008_s10 = smul.u32 12, %s5832_s6 }
  0x51   : > { %s551_s27 = scalar_lea.sflag [#allocation8], %s550_s4 }
  0x52   : > { %s5844_s18 = scalar_lea.vmem [#allocation7], %s5008_s10 }
  0x53   : > { %5552 = dma.done.wait (%p5795_p12), %s551_s27, 192  }
  0x54   : > { %5554 = vsyncadd (%p5795_p12), %s551_s27, 4294967104 }
  0x55   : > { %5556 = dma.done.wait (%p74_p1), [#allocation8], 1024  }
  0x56   : > { %5558 = vsyncadd (%p74_p1), [#allocation8], 4294966272 }
  0x57   : > { %5560 = dma.done.wait (%p74_p1), [#allocation11], 5136  }
  0x58   : > { %5562 = vsyncadd (%p74_p1), [#allocation11], 4294962160 }
  0x59   : > { %5564 = dma.done.wait (%p74_p1), [#allocation14], 32  }
  0x5a   : > { %5566 = vsyncadd (%p74_p1), [#allocation14], 4294967264 }
  0x5b   : > { %5568 = dma.done.wait (%p74_p1), [#allocation17], 20480  }
  0x5c   : > { %5570 = vsyncadd (%p74_p1), [#allocation17], 4294946816  ;;  %v4771_v0 = vld [vmem:[#allocation9 + $0x38] sm:$0xff]  ;;  %v4770_v1 = vld [vmem:[#allocation9 + $0x30] sm:$0xff]  ;;  %v5612_v7 = vmov 0   ;;  %s3896_s14 = sshll.u32 %s5832_s6, 3 }
  0x5d   : > { %742 = vmatpush.bf16.msra.mxu1 %v4771_v0  ;;  %716 = vmatpush.bf16.msra.mxu0 %v4771_v0  ;;  %v4769_v2 = vld [vmem:[#allocation9 + $0x28] sm:$0xff]  ;;  %v4768_v3 = vld [vmem:[#allocation9 + $0x20] sm:$0xff]  ;;  %v4767_v4 = vld [vmem:[#allocation9 + $0x18] sm:$0xff]  ;;  %645 = vst [vmem:[#allocation2] sm:$0x3] %v5612_v7  ;;  %s5872_s16 = scalar_lea.vmem [#allocation19], %s3896_s14 }
  0x5e   : > { %v4781_v5 = vld [vmem:[#allocation12 + $0x38] sm:$0xff]  ;;  %v4766_v6 = vld [vmem:[#allocation9 + $0x10] sm:$0xff]  ;;  %646 = vst [vmem:[#allocation3] sm:$0x3] %v5612_v7  ;;  %v4765_v9 = vld [vmem:[#allocation9 + $0x8] sm:$0xff]  ;;  %s5875_s2 = scalar_lea.vmem [#allocation20], %s3896_s14 }
  0x5f   : > { %993 = vmatpush.bf16.msra.mxu3 %v4781_v5  ;;  %v4780_v8 = vld [vmem:[#allocation12 + $0x30] sm:$0xff]  ;;  %v4764_v10 = vld [vmem:[#allocation9] sm:$0xff]  ;;  %v4779_v16 = vld [vmem:[#allocation12 + $0x28] sm:$0xff]  ;;  %vm768_vm0 = vcmask 1041408   ;;  %vm769_vm1 = vcmask 1045508   ;;  %vm1033_vm3 = vcmask 1046528  }
  0x60   : > { %v4772_v11 = vld [vmem:[%s5844_s18] sm:$0xff]  ;;  %v647_v12 = vld [vmem:[%s5836_s5] sm:$0xf]  ;;  %v731_v13 = vld [vmem:[%s5844_s18 + $0x8] sm:$0xf]  ;;  %vm1249_vm6 = vcmask 1045504  }
  0x61   : > { %743 = vmatpush.bf16.msra.mxu1 %v4770_v1  ;;  %717 = vmatpush.bf16.msra.mxu0 %v4770_v1  ;;  %v737_v14 = vunpack.c.l.b16 %v731_v13  ;;  %v4778_v17 = vld [vmem:[#allocation12 + $0x20] sm:$0xff]  ;;  %v4797_v18 = vld [vmem:[#allocation12 + $0xb8] sm:$0xff]  ;;  %v4796_v21 = vld [vmem:[#allocation12 + $0xb0] sm:$0xff]  ;;  %vm853_vm4 = vsmask.f32 7424  ;;  %s6215_s19 = sld [smem:[#allocation40_spill]] }
  0x62   : > { %v4789_v19 = vld [vmem:[#allocation12 + $0x78] sm:$0xff]  ;;  %v4788_v23 = vld [vmem:[#allocation12 + $0x70] sm:$0xff]  ;;  %v4795_v25 = vld [vmem:[#allocation12 + $0xa8] sm:$0xff]  ;;  %vm1133_vm5 = vsmask.f32 6400  ;;  %s6216_s5 = sld [smem:[#allocation31_spill]] }
  0x63   : > { %994 = vmatpush.bf16.msra.mxu3 %v4780_v8  ;;  %v739_v15 = vpack.c.b16 %v737_v14, %v737_v14  ;;  %v4777_v20 = vld [vmem:[#allocation12 + $0x18] sm:$0xff]  ;;  %924 = vmatpush.bf16.msra.mxu2 %v4789_v19  ;;  %v4776_v24 = vld [vmem:[#allocation12 + $0x10] sm:$0xff]  ;;  %v4787_v27 = vld [vmem:[#allocation12 + $0x68] sm:$0xff]  ;;  %s6217_s18 = sld [smem:[#allocation43_spill]]  ;;  %s3649_s21 = sshll.u32 %s5872_s16, 4  ;;  %s3650_s21 = int_to_ptr.vmem [resolvable:$true] %s3649_s21 }
  0x64   : > { %v4805_v22 = vld [vmem:[#allocation12 + $0xf8] sm:$0xff]  ;;  %v4804_v26 = vld [vmem:[#allocation12 + $0xf0] sm:$0xff]  ;;  %v4775_v28 = vld [vmem:[#allocation12 + $0x8] sm:$0xff]  ;;  %s3631_s3 = scalar_lea.sflag [#allocation6], %s5832_s6 }
  0x65   : > { %744 = vmatpush.bf16.msra.mxu1 %v4769_v2  ;;  %718 = vmatpush.bf16.msra.mxu0 %v4769_v2  ;;  %v4794_v29 = vld [vmem:[#allocation12 + $0xa0] sm:$0xff]  ;;  %v4803_v30 = vld [vmem:[#allocation12 + $0xe8] sm:$0xff]  ;;  %v4793_v33 = vld [vmem:[#allocation12 + $0x98] sm:$0xff] }
  0x66   : > { %v4786_v31 = vld [vmem:[#allocation12 + $0x60] sm:$0xff]  ;;  %v4785_v35 = vld [vmem:[#allocation12 + $0x58] sm:$0xff]  ;;  %v4792_v36 = vld [vmem:[#allocation12 + $0x90] sm:$0xff] }
  0x67   : > { %995 = vmatpush.bf16.msra.mxu3 %v4779_v16  ;;  %925 = vmatpush.bf16.msra.mxu2 %v4788_v23  ;;  %v4774_v32 = vld [vmem:[#allocation12] sm:$0xff]  ;;  %v4801_v37 = vld [vmem:[#allocation12 + $0xd8] sm:$0xff]  ;;  %v4784_v38 = vld [vmem:[#allocation12 + $0x50] sm:$0xff] }
  0x68   : > { %v4802_v34 = vld [vmem:[#allocation12 + $0xe0] sm:$0xff]  ;;  %v4791_v39 = vld [vmem:[#allocation12 + $0x88] sm:$0xff]  ;;  %v4800_v40 = vld [vmem:[#allocation12 + $0xd0] sm:$0xff]  ;;  %s4760_s4 = sshll.u32 %s6216_s5, 3 }
  0x69   : > { %745 = vmatpush.bf16.msra.mxu1 %v4768_v3  ;;  %719 = vmatpush.bf16.msra.mxu0 %v4768_v3  ;;  %v5155_v41 = vld [vmem:[#allocation10] ss:$0 sm:$0xff]  ;;  %v4783_v42 = vld [vmem:[#allocation12 + $0x48] sm:$0xff]  ;;  %v4790_v45 = vld [vmem:[#allocation12 + $0x80] sm:$0xff]  ;;  %s3647_s14 = scalar_lea.hbm %s6217_s18, %s4760_s4  ;;  %s5487_s17 = scalar_lea.hbm %s6217_s18, 16 }
  0x6a   : > { %v4799_v46 = vld [vmem:[#allocation12 + $0xc8] sm:$0xff]  ;;  %v4782_v49 = vld [vmem:[#allocation12 + $0x40] sm:$0xff]  ;;  %v4813_v58 = vld [vmem:[#allocation12 + $0x138] sm:$0xff]  ;;  %s3651_s24 = sshll.u32 %s3647_s14, 4  ;;  %s3652_s24 = int_to_ptr.hbm [resolvable:$true] %s3651_s24 }
  0x6b   : > { %996 = vmatpush.bf16.msra.mxu3 %v4778_v17  ;;  %926 = vmatpush.bf16.msra.mxu2 %v4787_v27  ;;  %v4798_v54 = vld [vmem:[#allocation12 + $0xc0] sm:$0xff]  ;;  %v4812_v61 = vld [vmem:[#allocation12 + $0x130] sm:$0xff]  ;;  %vm5879_vm2 = vmor %vm768_vm0, %vm769_vm1  ;;  %s5481_s23 = sshra.s32 %s3652_s24, 4  ;;  %s5482_s23 = int_to_ptr.hbm [resolvable:$true] %s5481_s23 }
  0x6c   : > { %v4811_v1 = vld [vmem:[#allocation12 + $0x128] sm:$0xff]  ;;  %v4810_v5 = vld [vmem:[#allocation12 + $0x120] sm:$0xff]  ;;  %v4809_v17 = vld [vmem:[#allocation12 + $0x118] sm:$0xff]  ;;  %s5483_s9 = scalar_lea.hbm %s5482_s23, 8  ;;  %p5488_p10 = scmp.lt.s32.totalorder %s5482_s23, %s6217_s18 }
  0x6d   : > { %746 = vmatpush.bf16.msra.mxu1 %v4767_v4  ;;  %720 = vmatpush.bf16.msra.mxu0 %v4767_v4  ;;  %v4808_v19 = vld [vmem:[#allocation12 + $0x110] sm:$0xff]  ;;  %v4807_v23 = vld [vmem:[#allocation12 + $0x108] sm:$0xff]  ;;  %p5484_p1 = scmp.ne.s32.totalorder %s5482_s23, %s5483_s9  ;;  %p5489_p11 = scmp.lt.s32.totalorder %s5487_s17, %s5483_s9 }
  0x6f   : > { %997 = vmatpush.bf16.msra.mxu3 %v4777_v20  ;;  %927 = vmatpush.bf16.msra.mxu2 %v4786_v31  ;;  %v4806_v31 = vld [vmem:[#allocation12 + $0x100] sm:$0xff]  ;;  %p5485_p3 = pnand %p5484_p1, %p5802_p4  ;;  %p5490_p12 = por %p5489_p11, %p5488_p10 }
  0x71   : > { %747 = vmatpush.bf16.msra.mxu1 %v4766_v6  ;;  %721 = vmatpush.bf16.msra.mxu0 %v4766_v6  ;;  %p5486_p9 = pneg %p5485_p3 }
  0x73   : > { %998 = vmatpush.bf16.msra.mxu3 %v4776_v24  ;;  %928 = vmatpush.bf16.msra.mxu2 %v4785_v35  ;;  %p5491_p13 = pnand %p5490_p12, %p5486_p9 }
  0x75   : > { %748 = vmatpush.bf16.msra.mxu1 %v4765_v9  ;;  %722 = vmatpush.bf16.msra.mxu0 %v4765_v9 }
  0x77   : > { %999 = vmatpush.bf16.msra.mxu3 %v4775_v28  ;;  %929 = vmatpush.bf16.msra.mxu2 %v4784_v38 }
  0x79   : > { %749 = vmatpush.bf16.msra.mxu1 %v4764_v10  ;;  %723 = vmatpush.bf16.msra.mxu0 %v4764_v10 }
  0x7b   : > { %1000 = vmatpush.bf16.msra.mxu3 %v4774_v32  ;;  %930 = vmatpush.bf16.msra.mxu2 %v4783_v42 }
  0x7c   : > { %750 = vmatmul.bf16.vlgmr.msra.gmra.mxu1 %v4772_v11  ;;  %724 = vmatmul.bf16.vlgmr.msra.gmra.mxu0 %v647_v12 }
  0x7d   : > { %1089 = vmatpush.bf16.msrb.mxu0 %v4797_v18  ;;  %1205 = vmatpush.bf16.msrb.mxu1 %v4805_v22 }
  0x7f   : > { %931 = vmatpush.bf16.msra.mxu2 %v4782_v49 }
  0x81   : > { %1090 = vmatpush.bf16.msrb.mxu0 %v4796_v21  ;;  %1206 = vmatpush.bf16.msrb.mxu1 %v4804_v26 }
  0x83   : > { %1305 = vmatpush.bf16.msrb.mxu2 %v4813_v58 }
  0x85   : > { %1091 = vmatpush.bf16.msrb.mxu0 %v4795_v25  ;;  %1207 = vmatpush.bf16.msrb.mxu1 %v4803_v30 }
  0x87   : > { %1306 = vmatpush.bf16.msrb.mxu2 %v4812_v61 }
  0x89   : > { %1092 = vmatpush.bf16.msrb.mxu0 %v4794_v29  ;;  %1208 = vmatpush.bf16.msrb.mxu1 %v4802_v34 }
  0x8b   : > { %1307 = vmatpush.bf16.msrb.mxu2 %v4811_v1 }
  0x8c   : > { %755 = vmatmul.bf16.gmra.mxu1 %v739_v15 }
  0x8d   : > { %1093 = vmatpush.bf16.msrb.mxu0 %v4793_v33  ;;  %1209 = vmatpush.bf16.msrb.mxu1 %v4801_v37 }
  0x8f   : > { %1308 = vmatpush.bf16.msrb.mxu2 %v4810_v5 }
  0x91   : > { %1094 = vmatpush.bf16.msrb.mxu0 %v4792_v36  ;;  %1210 = vmatpush.bf16.msrb.mxu1 %v4800_v40 }
  0x93   : > { %1309 = vmatpush.bf16.msrb.mxu2 %v4809_v17 }
  0x95   : > { %1095 = vmatpush.bf16.msrb.mxu0 %v4791_v39  ;;  %1211 = vmatpush.bf16.msrb.mxu1 %v4799_v46 }
  0x97   : > { %1310 = vmatpush.bf16.msrb.mxu2 %v4808_v19 }
  0x99   : > { %1096 = vmatpush.bf16.msrb.mxu0 %v4790_v45  ;;  %1212 = vmatpush.bf16.msrb.mxu1 %v4798_v54 }
  0x9b   : > { %1311 = vmatpush.bf16.msrb.mxu2 %v4807_v23  ;;  %v4830_v23 = vld [vmem:[#allocation16 + $0x78] sm:$0xff] }
  0x9c   : > { %1505 = vmatpush.bf16.msrb.mxu3 %v4830_v23 }
  0x9f   : > { %1312 = vmatpush.bf16.msrb.mxu2 %v4806_v31 }
  0xf9   : > { %v751_v43 = vpop.f32.mrf.mxu1  ;;  %v725_v44 = vpop.f32.mrf.mxu0 }
  0xfa   : > { %v752_v47 = vadd.f32 %v5155_v41, %v751_v43  ;;  %v726_v48 = vadd.f32 %v5155_v41, %v725_v44 }
  0xfc   : > { %v762_v50 = vpack.c.bf16 %v752_v47, %v752_v47  ;;  %760 = vst [vmem:[%s5872_s16] sm:$0xff] %v726_v48  ;;  %v787_v51 = vpack.c.bf16 %v726_v48, %v726_v48 }
  0xfd   : > { %761 = vst [vmem:[%s5875_s2] sm:$0xff] %v726_v48 }
  0xfe   : > { %v771_v52 = vrot.slane %v762_v50, 6  ;;  %v789_v53 = vrot.slane %v787_v51, 6 }
 0x100   : > { %783 = vst [vmem:[#allocation2] sm:$0xc] %v771_v52  ;;  %v790_v55 = vrot.slane %v789_v53, 4  ;;  %v772_v63 = vrot.slane %v771_v52, 4 }
 0x101   : > { %798 = vst [vmem:[#allocation2] sm:$0xc] %v5612_v7  ;;  %v753_v56 = vpop.f32.mrf.mxu1  ;;  %v727_v57 = vpop.f32.mrf.mxu0 }
 0x102   : > { %v754_v59 = vadd.f32 %v5155_v41, %v753_v56  ;;  %793 = vst [vmem:[#allocation2 + $0xc] sm:$0xc] %v789_v53 }
 0x103   : > { %794 = vst [vmem:[#allocation2 + $0x10] sm:$0x3] %v790_v55 }
 0x104   : > { %v763_v60 = vpack.c.bf16 %v754_v59, %v754_v59 }
 0x106   : > { %v773_v0 = vrot.slane %v763_v60, 6 }
 0x108   : > { %v774_v2 = vsel %vm5879_vm2, %v772_v63, %v773_v0  ;;  %v1012_v8 = vld [vmem:[#allocation2] sm:$0xe]  ;;  %v775_v9 = vrot.slane %v773_v0, 4 }
 0x109   : > { %784 = vst [vmem:[#allocation2 + $0x4] sm:$0xf] %v774_v2  ;;  %v756_v3 = vpop.f32.mrf.mxu1  ;;  %v1031_v13 = vunpack.c.l.b16 %v1012_v8  ;;  %v1228_v60 = vld [vmem:[#allocation2] sm:$0xc]  ;;  %v4822_v8 = vld [vmem:[#allocation16 + $0x38] sm:$0xff] }
 0x10a   : > { %799 = vst [vmem:[#allocation2 + $0x4] sm:$0xf] %v5612_v7  ;;  %v757_v4 = vadd.f32 %v5155_v41, %v756_v3  ;;  %v1112_v30 = vld [vmem:[#allocation2 + $0x10] sm:$0x3]  ;;  %v1247_v63 = vunpack.c.l.b16 %v1228_v60  ;;  %1574 = vmatpush.bf16.msra.mxu0 %v4822_v8  ;;  %v4842_v60 = vld [vmem:[#allocation16 + $0xd8] sm:$0xff] }
 0x10b   : > { %v1131_v37 = vunpack.c.l.b16 %v1112_v30  ;;  %v822_v42 = vld [vmem:[#allocation2 + $0x10] sm:$0x1] }
 0x10c   : > { %v764_v6 = vpack.c.bf16 %v757_v4, %v757_v4  ;;  %v849_v46 = vunpack.c.l.b16 %v822_v42 }
 0x10d   : > { %v1132_v47 = vpack.c.b16 %v1131_v37, %v1131_v37  ;;  %v5912_v37 = vld [vmem:[#allocation15] ss:$0 sm:$0xff] }
 0x10e   : > { %v776_v10 = vrot.slane %v764_v6, 6  ;;  %v852_v48 = vpack.c.b16 %v849_v46, %v849_v46 }
 0x10f   : > { %v1147_v49 = vshrl.u32 %v1132_v47, 16  ;;  %v1150_v50 = vshll.u32 %v1132_v47, 16  ;;  %v1253_v4 = vrot.slane %v1132_v47, 2  ;;  %v4827_v47 = vld [vmem:[#allocation16 + $0x60] sm:$0xff] }
 0x110   : > { %v777_v11 = vsel %vm5879_vm2, %v775_v9, %v776_v10  ;;  %v778_v12 = vrot.slane %v776_v10, 4  ;;  %v870_v51 = vshll.u32 %v852_v48, 16  ;;  %v1037_v52 = vrot.slane %v852_v48, 1  ;;  %v4821_v10 = vld [vmem:[#allocation16 + $0x30] sm:$0xff] }
 0x111   : > { %785 = vst [vmem:[#allocation2 + $0x8] sm:$0xf] %v777_v11  ;;  %v758_v14 = vpop.f32.mrf.mxu1  ;;  %v5888_v15 = vld [vmem:[#allocation2] sm:$0xff]   ;;  %v1149_v53 = vrot.slane %v1147_v49, 1  ;;  %v1152_v54 = vrot.slane %v1150_v50, 2  ;;  %1575 = vmatpush.bf16.msra.mxu0 %v4821_v10  ;;  %v4820_v11 = vld [vmem:[#allocation16 + $0x28] sm:$0xff] }
 0x112   : > { %786 = vst [vmem:[#allocation2 + $0xc] sm:$0x3] %v778_v12  ;;  %v4981_v16 = vunpack.c.h.b16 %v5888_v15  ;;  %1001 = vmatmul.bf16.vlgmr.msra.gmra.mxu3 %v5888_v15  ;;  %v857_v20 = vshll.u32 %v5888_v15, 16  ;;  %v855_v24 = vshrl.u32 %v5888_v15, 16  ;;  %v872_v56 = vrot.slane %v870_v51, 1  ;;  %v4819_v14 = vld [vmem:[#allocation16 + $0x20] sm:$0xff] }
 0x113   : > { %800 = vst [vmem:[#allocation2 + $0x8] sm:$0xf] %v5612_v7  ;;  %v1153_v58 = vor.u32 %v1152_v54, %v1149_v53  ;;  %v4843_v53 = vld [vmem:[#allocation16 + $0xe0] sm:$0xff]  ;;  %v4824_v10 = vld [vmem:[#allocation16 + $0x48] sm:$0xff] }
 0x114   : > { %801 = vst [vmem:[#allocation2 + $0xc] sm:$0x3] %v5612_v7  ;;  %v1032_v18 = vpack.c.b16 %v4981_v16, %v1031_v13  ;;  %v859_v25 = vrot.slane %v857_v20, 1  ;;  %v1248_v0 = vpack.c.b16 %v4981_v16, %v1247_v63  ;;  %v4818_v16 = vld [vmem:[#allocation16 + $0x18] sm:$0xff] }
 0x115   : > { %1576 = vmatpush.bf16.msra.mxu0 %v4820_v11  ;;  %v4838_v20 = vld [vmem:[#allocation16 + $0xb8] sm:$0xff] }
 0x116   : > { %v1135_v21 = vshrl.u32 %v1032_v18, 16  ;;  %v1138_v22 = vshll.u32 %v1032_v18, 16  ;;  %v1034_v29 = vrot.slane %v1032_v18, 1  ;;  %v860_v33 = vor.u32 %v859_v25, %v855_v24  ;;  %1669 = vmatpush.bf16.msra.mxu1 %v4838_v20  ;;  %v4837_v25 = vld [vmem:[#allocation16 + $0xb0] sm:$0xff] }
 0x117   : > { %v1250_v1 = vrot.slane %v1248_v0, 2  ;;  %v4825_v0 = vld [vmem:[#allocation16 + $0x50] sm:$0xff] }
 0x118   : > { %v1137_v26 = vrot.slane %v1135_v21, 1  ;;  %v1140_v27 = vrot.slane %v1138_v22, 2  ;;  %v4817_v21 = vld [vmem:[#allocation16 + $0x10] sm:$0xff] }
 0x119   : > { %1577 = vmatpush.bf16.msra.mxu0 %v4819_v14 }
 0x11a   : > { %v1141_v36 = vor.u32 %v1140_v27, %v1137_v26  ;;  %v4846_v26 = vld [vmem:[#allocation16 + $0xf8] sm:$0xff]  ;;  %v4816_v27 = vld [vmem:[#allocation16 + $0x8] sm:$0xff]  ;;  %1670 = vmatpush.bf16.msra.mxu1 %v4837_v25 }
 0x11b   : > { %v4773_v28 = vld [vmem:[#allocation2 + $0x8] sm:$0xff] }
 0x11c   : > { %v1035_v32 = vrot.slane %v4773_v28, 1  ;;  %v862_v34 = vshll.u32 %v4773_v28, 16  ;;  %v866_v35 = vshrl.u32 %v4773_v28, 16  ;;  %v1251_v2 = vrot.slane %v4773_v28, 2 }
 0x11d   : > { %1578 = vmatpush.bf16.msra.mxu0 %v4818_v16  ;;  %v4840_v16 = vld [vmem:[#allocation16 + $0xc8] sm:$0xff] }
 0x11e   : > { %v1036_v38 = vsel %vm1033_vm3, %v1034_v29, %v1035_v32  ;;  %v864_v39 = vrot.slane %v862_v34, 1  ;;  %v1142_v40 = vrot.slane %v866_v35, 1  ;;  %v1143_v41 = vrot.slane %v862_v34, 2  ;;  %v4829_v29 = vld [vmem:[#allocation16 + $0x70] sm:$0xff]  ;;  %v4836_v34 = vld [vmem:[#allocation16 + $0xa8] sm:$0xff] }
 0x11f   : > { %1097 = vmatmul.bf16.vlgmr.msrb.gmra.mxu0 %v1036_v38  ;;  %v1038_v57 = vsel %vm1033_vm3, %v1035_v32, %v1037_v52  ;;  %v1252_v3 = vsel %vm1249_vm6, %v1250_v1, %v1251_v2  ;;  %v1254_v5 = vsel %vm1249_vm6, %v1251_v2, %v1253_v4  ;;  %v5910_v32 = vld [vmem:[#allocation13] ss:$0 sm:$0xff]  ;;  %1506 = vmatpush.bf16.msrb.mxu3 %v4829_v29  ;;  %v4815_v38 = vld [vmem:[#allocation16] sm:$0xff]  ;;  %v4841_v4 = vld [vmem:[#allocation16 + $0xd0] sm:$0xff] }
 0x120   : > { %v865_v43 = vsel %vm853_vm4, %v860_v33, %v864_v39  ;;  %v1144_v44 = vor.u32 %v1143_v41, %v1142_v40  ;;  %v868_v55 = vor.u32 %v866_v35, %v864_v39  ;;  %v4845_v35 = vld [vmem:[#allocation16 + $0xf0] sm:$0xff]  ;;  %1671 = vmatpush.bf16.msra.mxu1 %v4836_v34  ;;  %v4828_v40 = vld [vmem:[#allocation16 + $0x68] sm:$0xff]  ;;  %v4834_v52 = vld [vmem:[#allocation16 + $0x98] sm:$0xff] }
 0x121   : > { %932 = vmatmul.bf16.vlgmr.msra.gmra.mxu2 %v865_v43  ;;  %1579 = vmatpush.bf16.msra.mxu0 %v4817_v21  ;;  %v4823_v21 = vld [vmem:[#allocation16 + $0x40] sm:$0xff]  ;;  %v4854_v29 = vld [vmem:[#allocation16 + $0x138] sm:$0xff]  ;;  %v4853_v34 = vld [vmem:[#allocation16 + $0x130] sm:$0xff] }
 0x122   : > { %1006 = vmatmul.bf16.gmra.mxu3 %v4773_v28  ;;  %v1145_v45 = vsel %vm1133_vm5, %v1141_v36, %v1144_v44  ;;  %v873_v59 = vsel %vm853_vm4, %v868_v55, %v872_v56  ;;  %v1154_v61 = vsel %vm1133_vm5, %v1144_v44, %v1153_v58  ;;  %1784 = vmatpush.bf16.msra.mxu2 %v4846_v26  ;;  %v4835_v44 = vld [vmem:[#allocation16 + $0xa0] sm:$0xff]  ;;  %v4826_v55 = vld [vmem:[#allocation16 + $0x58] sm:$0xff] }
 0x123   : > { %1213 = vmatmul.bf16.vlgmr.msrb.gmra.mxu1 %v1145_v45  ;;  %1507 = vmatpush.bf16.msrb.mxu3 %v4828_v40  ;;  %v4844_v45 = vld [vmem:[#allocation16 + $0xe8] sm:$0xff]  ;;  %v4839_v26 = vld [vmem:[#allocation16 + $0xc0] sm:$0xff] }
 0x124   : > { %1672 = vmatpush.bf16.msra.mxu1 %v4835_v44 }
 0x125   : > { %1580 = vmatpush.bf16.msra.mxu0 %v4816_v27 }
 0x126   : > { %1785 = vmatpush.bf16.msra.mxu2 %v4845_v35 }
 0x127   : > { %1508 = vmatpush.bf16.msrb.mxu3 %v4827_v47 }
 0x128   : > { %1673 = vmatpush.bf16.msra.mxu1 %v4834_v52  ;;  %v4849_v52 = vld [vmem:[#allocation16 + $0x110] sm:$0xff] }
 0x129   : > { %1581 = vmatpush.bf16.msra.mxu0 %v4815_v38 }
 0x12a   : > { %1786 = vmatpush.bf16.msra.mxu2 %v4844_v45 }
 0x12b   : > { %1509 = vmatpush.bf16.msrb.mxu3 %v4826_v55 }
 0x12e   : > { %1787 = vmatpush.bf16.msra.mxu2 %v4843_v53 }
 0x12f   : > { %1102 = vmatmul.bf16.gmra.mxu0 %v1038_v57  ;;  %1510 = vmatpush.bf16.msrb.mxu3 %v4825_v0 }
 0x131   : > { %937 = vmatmul.bf16.gmra.mxu2 %v873_v59  ;;  %v4833_v59 = vld [vmem:[#allocation16 + $0x90] sm:$0xff] }
 0x132   : > { %1674 = vmatpush.bf16.msra.mxu1 %v4833_v59  ;;  %1788 = vmatpush.bf16.msra.mxu2 %v4842_v60 }
 0x133   : > { %1218 = vmatmul.bf16.gmra.mxu1 %v1154_v61  ;;  %1511 = vmatpush.bf16.msrb.mxu3 %v4824_v10 }
 0x136   : > { %1789 = vmatpush.bf16.msra.mxu2 %v4841_v4 }
 0x137   : > { %1512 = vmatpush.bf16.msrb.mxu3 %v4823_v21 }
 0x13a   : > { %1790 = vmatpush.bf16.msra.mxu2 %v4840_v16 }
 0x13b   : > { %1883 = vmatpush.bf16.msra.mxu3 %v4854_v29 }
 0x13e   : > { %1791 = vmatpush.bf16.msra.mxu2 %v4839_v26 }
 0x13f   : > { %1884 = vmatpush.bf16.msra.mxu3 %v4853_v34 }
 0x141   : > { %1313 = vmatmul.bf16.vlgmr.msrb.gmra.mxu2 %v1252_v3  ;;  %v4832_v3 = vld [vmem:[#allocation16 + $0x88] sm:$0xff] }
 0x142   : > { %1675 = vmatpush.bf16.msra.mxu1 %v4832_v3 }
 0x151   : > { %1318 = vmatmul.bf16.gmra.mxu2 %v1254_v5 }
 0x195   : > { %v1002_v12 = vpop.f32.mrf.mxu3 }
 0x19c   : > { %v1098_v15 = vpop.f32.mrf.mxu0 }
 0x19d   : > { %v1004_v22 = vpop.f32.mrf.mxu3 }
 0x1a0   : > { %v1214_v18 = vpop.f32.mrf.mxu1 }
 0x1a4   : > { %v933_v6 = vpop.f32.mrf.mxu2  ;;  %v1100_v28 = vpop.f32.mrf.mxu0 }
 0x1a5   : > { %v1003_v17 = vadd.f32 %v1002_v12, %v933_v6  ;;  %v1007_v43 = vpop.f32.mrf.mxu3 }
 0x1a7   : > { %v1108_v24 = vadd.f32 %v1098_v15, %v1003_v17  ;;  %v4831_v15 = vld [vmem:[#allocation16 + $0x80] sm:$0xff] }
 0x1a8   : > { %v1216_v39 = vpop.f32.mrf.mxu1  ;;  %1676 = vmatpush.bf16.msra.mxu1 %v4831_v15 }
 0x1a9   : > { %v1224_v31 = vadd.f32 %v1214_v18, %v1108_v24 }
 0x1ac   : > { %v935_v9 = vpop.f32.mrf.mxu2  ;;  %v1103_v50 = vpop.f32.mrf.mxu0 }
 0x1ad   : > { %v1005_v30 = vadd.f32 %v1004_v22, %v935_v9  ;;  %v1009_v1 = vpop.f32.mrf.mxu3 }
 0x1af   : > { %v1109_v41 = vadd.f32 %v1100_v28, %v1005_v30 }
 0x1b0   : > { %v1219_v58 = vpop.f32.mrf.mxu1 }
 0x1b1   : > { %v1225_v49 = vadd.f32 %v1216_v39, %v1109_v41  ;;  %v4852_v39 = vld [vmem:[#allocation16 + $0x128] sm:$0xff] }
 0x1b2   : > { %1885 = vmatpush.bf16.msra.mxu3 %v4852_v39 }
 0x1b4   : > { %v938_v13 = vpop.f32.mrf.mxu2  ;;  %v1105_v12 = vpop.f32.mrf.mxu0 }
 0x1b5   : > { %v1008_v48 = vadd.f32 %v1007_v43, %v938_v13 }
 0x1b7   : > { %v1110_v56 = vadd.f32 %v1103_v50, %v1008_v48  ;;  %v4850_v50 = vld [vmem:[#allocation16 + $0x118] sm:$0xff] }
 0x1b9   : > { %v1226_v6 = vadd.f32 %v1219_v58, %v1110_v56  ;;  %v4848_v56 = vld [vmem:[#allocation16 + $0x108] sm:$0xff] }
 0x1bc   : > { %v5908_v19 = vpop.f32.mrf.mxu2 }
 0x1bd   : > { %v1010_v5 = vadd.f32 %v1009_v1, %v5908_v19  ;;  %v1221_v19 = vpop.f32.mrf.mxu1  ;;  %v4847_v1 = vld [vmem:[#allocation16 + $0x100] sm:$0xff] }
 0x1bf   : > { %v1111_v13 = vadd.f32 %v1105_v12, %v1010_v5 }
 0x1c1   : > { %v1227_v22 = vadd.f32 %v1221_v19, %v1111_v13 }
 0x1c4   : > { %v1314_v33 = vpop.f32.mrf.mxu2 }
 0x1c5   : > { %v1324_v36 = vadd.f32 %v1314_v33, %v1224_v31 }
 0x1c7   : > { %v1332_v42 = vmul.f32 %v5910_v32, %v1324_v36 }
 0x1c9   : > { %v1340_v46 = vadd.f32 %v5912_v37, %v1332_v42 }
 0x1cb   : > { %5165 = vtanh.f32 %v1340_v46 }
 0x1cc   : > { %v1316_v51 = vpop.f32.mrf.mxu2 }
 0x1cd   : > { %v1325_v54 = vadd.f32 %v1316_v51, %v1225_v49 }
 0x1cf   : > { %v1333_v57 = vmul.f32 %v5910_v32, %v1325_v54 }
 0x1d1   : > { %v5166_v61 = vpop.eup %5165  ;;  %v1341_v63 = vadd.f32 %v5912_v37, %v1333_v57 }
 0x1d2   : > { %v1348_v2 = vpack.c.bf16 %v5166_v61, %v5166_v61 }
 0x1d3   : > { %5167 = vtanh.f32 %v1341_v63 }
 0x1d4   : > { %v1356_v8 = vrot.slane %v1348_v2, 6  ;;  %v1319_v9 = vpop.f32.mrf.mxu2 }
 0x1d5   : > { %v1326_v11 = vadd.f32 %v1319_v9, %v1226_v6 }
 0x1d6   : > { %1372 = vst [vmem:[#allocation3] sm:$0xc] %v1356_v8  ;;  %v1357_v23 = vrot.slane %v1356_v8, 4 }
 0x1d7   : > { %1380 = vst [vmem:[#allocation3] sm:$0xc] %v5612_v7  ;;  %v1334_v14 = vmul.f32 %v5910_v32, %v1326_v11 }
 0x1d9   : > { %v5168_v17 = vpop.eup %5167  ;;  %v1342_v18 = vadd.f32 %v5912_v37, %v1334_v14 }
 0x1da   : > { %v1349_v20 = vpack.c.bf16 %v5168_v17, %v5168_v17 }
 0x1db   : > { %5169 = vtanh.f32 %v1342_v18 }
 0x1dc   : > { %v1358_v24 = vrot.slane %v1349_v20, 6  ;;  %v1321_v25 = vpop.f32.mrf.mxu2 }
 0x1dd   : > { %v1327_v27 = vadd.f32 %v1321_v25, %v1227_v22 }
 0x1de   : > { %v1359_v28 = vsel %vm5879_vm2, %v1357_v23, %v1358_v24  ;;  %v1360_v36 = vrot.slane %v1358_v24, 4 }
 0x1df   : > { %1373 = vst [vmem:[#allocation3 + $0x4] sm:$0xf] %v1359_v28  ;;  %v1335_v30 = vmul.f32 %v5910_v32, %v1327_v27  ;;  %v1593_v32 = vld [vmem:[#allocation3] sm:$0xe] }
 0x1e0   : > { %1381 = vst [vmem:[#allocation3 + $0x4] sm:$0xf] %v5612_v7  ;;  %v1612_v45 = vunpack.c.l.b16 %v1593_v32 }
 0x1e1   : > { %v5170_v31 = vpop.eup %5169  ;;  %v1343_v33 = vadd.f32 %v5912_v37, %v1335_v30  ;;  %v4851_v37 = vld [vmem:[#allocation16 + $0x120] sm:$0xff] }
 0x1e2   : > { %v1350_v35 = vpack.c.bf16 %v5170_v31, %v5170_v31  ;;  %1886 = vmatpush.bf16.msra.mxu3 %v4851_v37  ;;  %v1807_v31 = vld [vmem:[#allocation3] sm:$0xc] }
 0x1e3   : > { %5171 = vtanh.f32 %v1343_v33  ;;  %v1826_v34 = vunpack.c.l.b16 %v1807_v31 }
 0x1e4   : > { %v1361_v38 = vrot.slane %v1350_v35, 6 }
 0x1e6   : > { %v1362_v40 = vsel %vm5879_vm2, %v1360_v36, %v1361_v38  ;;  %v1363_v46 = vrot.slane %v1361_v38, 4  ;;  %1887 = vmatpush.bf16.msra.mxu3 %v4850_v50  ;;  %v4859_v50 = vld [vmem:[#allocation16 + $0x158] sm:$0xff] }
 0x1e7   : > { %v5929_v41 = vld [vmem:[#allocation3] sm:$0xff]   ;;  %1374 = vst [vmem:[#allocation3 + $0x8] sm:$0xf] %v1362_v40 }
 0x1e8   : > { %1382 = vst [vmem:[#allocation3 + $0x8] sm:$0xf] %v5612_v7  ;;  %1582 = vmatmul.bf16.vlgmr.msra.gmra.mxu0 %v5929_v41  ;;  %v4985_v44 = vunpack.c.h.b16 %v5929_v41  ;;  %v1438_v53 = vshll.u32 %v5929_v41, 16  ;;  %v1436_v57 = vshrl.u32 %v5929_v41, 16  ;;  %v4860_v41 = vld [vmem:[#allocation16 + $0x160] sm:$0xff] }
 0x1e9   : > { %v5172_v42 = vpop.eup %5171 }
 0x1ea   : > { %v1351_v43 = vpack.c.bf16 %v5172_v42, %v5172_v42  ;;  %v1613_v51 = vpack.c.b16 %v4985_v44, %v1612_v45  ;;  %1888 = vmatpush.bf16.msra.mxu3 %v4849_v52  ;;  %v1440_v58 = vrot.slane %v1438_v53, 1  ;;  %v1827_v35 = vpack.c.b16 %v4985_v44, %v1826_v34  ;;  %v4863_v42 = vld [vmem:[#allocation16 + $0x178] sm:$0xff]  ;;  %v4862_v45 = vld [vmem:[#allocation16 + $0x170] sm:$0xff] }
 0x1eb   : > { %2153 = vmatpush.bf16.msrb.mxu1 %v4863_v42  ;;  %v4883_v34 = vld [vmem:[#allocation16 + $0x218] sm:$0xff]  ;;  %v4873_v42 = vld [vmem:[#allocation16 + $0x1c8] sm:$0xff] }
 0x1ec   : > { %v1364_v47 = vrot.slane %v1351_v43, 6  ;;  %v1714_v54 = vshrl.u32 %v1613_v51, 16  ;;  %v1717_v55 = vshll.u32 %v1613_v51, 16  ;;  %v1614_v63 = vrot.slane %v1613_v51, 1 }
 0x1ed   : > { %v1441_v3 = vor.u32 %v1440_v58, %v1436_v57  ;;  %v1828_v36 = vrot.slane %v1827_v35, 2  ;;  %v4871_v57 = vld [vmem:[#allocation16 + $0x1b8] sm:$0xff] }
 0x1ee   : > { %v1365_v48 = vsel %vm5879_vm2, %v1363_v46, %v1364_v47  ;;  %v1366_v49 = vrot.slane %v1364_v47, 4  ;;  %v1716_v59 = vrot.slane %v1714_v54, 1  ;;  %v1719_v60 = vrot.slane %v1717_v55, 2  ;;  %1889 = vmatpush.bf16.msra.mxu3 %v4848_v56  ;;  %v4861_v46 = vld [vmem:[#allocation16 + $0x168] sm:$0xff]  ;;  %v4879_v54 = vld [vmem:[#allocation16 + $0x1f8] sm:$0xff]  ;;  %v4858_v56 = vld [vmem:[#allocation16 + $0x150] sm:$0xff]  ;;  %2084 = vmatpush.bf16.msrb.mxu0 %v4871_v57 }
 0x1ef   : > { %1375 = vst [vmem:[#allocation3 + $0xc] sm:$0xf] %v1365_v48  ;;  %2154 = vmatpush.bf16.msrb.mxu1 %v4862_v45  ;;  %2248 = vmatpush.bf16.msrb.mxu2 %v4879_v54  ;;  %v4864_v54 = vld [vmem:[#allocation16 + $0x180] sm:$0xff] }
 0x1f0   : > { %1376 = vst [vmem:[#allocation3 + $0x10] sm:$0x3] %v1366_v49  ;;  %v1720_v6 = vor.u32 %v1719_v60, %v1716_v59  ;;  %v4878_v59 = vld [vmem:[#allocation16 + $0x1f0] sm:$0xff]  ;;  %v4887_v60 = vld [vmem:[#allocation16 + $0x238] sm:$0xff] }
 0x1f1   : > { %1383 = vst [vmem:[#allocation3 + $0xc] sm:$0x3] %v5612_v7 }
 0x1f2   : > { %1890 = vmatpush.bf16.msra.mxu3 %v4847_v1  ;;  %v4857_v1 = vld [vmem:[#allocation16 + $0x148] sm:$0xff] }
 0x1f3   : > { %2155 = vmatpush.bf16.msrb.mxu1 %v4861_v46  ;;  %2249 = vmatpush.bf16.msrb.mxu2 %v4878_v59 }
 0x1f7   : > { %v1692_v0 = vld [vmem:[#allocation3 + $0x10] sm:$0x3]  ;;  %2156 = vmatpush.bf16.msrb.mxu1 %v4860_v41 }
 0x1f8   : > { %v4814_v61 = vld [vmem:[#allocation3 + $0x8] sm:$0xff]  ;;  %v1404_v8 = vld [vmem:[#allocation3 + $0x10] sm:$0x1]  ;;  %v1711_v9 = vunpack.c.l.b16 %v1692_v0 }
 0x1f9   : > { %1587 = vmatmul.bf16.gmra.mxu0 %v4814_v61  ;;  %v1615_v2 = vrot.slane %v4814_v61, 1  ;;  %v1443_v4 = vshll.u32 %v4814_v61, 16  ;;  %v1447_v5 = vshrl.u32 %v4814_v61, 16  ;;  %v1431_v16 = vunpack.c.l.b16 %v1404_v8  ;;  %v5956_v0 = vld [vmem:[%s6169_s8] ss:$0 sm:$0xff]  ;;  %v4877_v8 = vld [vmem:[#allocation16 + $0x1e8] sm:$0xff] }
 0x1fa   : > { %v1712_v18 = vpack.c.b16 %v1711_v9, %v1711_v9  ;;  %v1829_v38 = vrot.slane %v4814_v61, 2  ;;  %v4886_v9 = vld [vmem:[#allocation16 + $0x230] sm:$0xff]  ;;  %2250 = vmatpush.bf16.msrb.mxu2 %v4877_v8 }
 0x1fb   : > { %v1616_v10 = vsel %vm1033_vm3, %v1614_v63, %v1615_v2  ;;  %v1445_v11 = vrot.slane %v1443_v4, 1  ;;  %v1721_v12 = vrot.slane %v1447_v5, 1  ;;  %v1722_v13 = vrot.slane %v1443_v4, 2  ;;  %2157 = vmatpush.bf16.msrb.mxu1 %v4859_v50 }
 0x1fc   : > { %1677 = vmatmul.bf16.vlgmr.msra.gmra.mxu1 %v1616_v10  ;;  %v1434_v19 = vpack.c.b16 %v1431_v16, %v1431_v16  ;;  %v1726_v20 = vshrl.u32 %v1712_v18, 16  ;;  %v1729_v21 = vshll.u32 %v1712_v18, 16  ;;  %v1830_v39 = vsel %vm1249_vm6, %v1828_v36, %v1829_v38  ;;  %v4876_v16 = vld [vmem:[#allocation16 + $0x1e0] sm:$0xff] }
 0x1fd   : > { %v1446_v14 = vsel %vm853_vm4, %v1441_v3, %v1445_v11  ;;  %v1723_v15 = vor.u32 %v1722_v13, %v1721_v12  ;;  %v1449_v26 = vor.u32 %v1447_v5, %v1445_v11  ;;  %v1831_v40 = vrot.slane %v1712_v18, 2  ;;  %v4870_v3 = vld [vmem:[#allocation16 + $0x1b0] sm:$0xff]  ;;  %v4856_v12 = vld [vmem:[#allocation16 + $0x140] sm:$0xff] }
 0x1fe   : > { %1513 = vmatmul.bf16.vlgmr.msrb.gmra.mxu3 %v1446_v14  ;;  %v1451_v22 = vshll.u32 %v1434_v19, 16  ;;  %v1617_v23 = vrot.slane %v1434_v19, 1  ;;  %v1728_v24 = vrot.slane %v1726_v20, 1  ;;  %v1731_v25 = vrot.slane %v1729_v21, 2  ;;  %v5961_v5 = vld [vmem:[%s6215_s19] ss:$0 sm:$0xff]  ;;  %2085 = vmatpush.bf16.msrb.mxu0 %v4870_v3 }
 0x1ff   : > { %v1724_v17 = vsel %vm1133_vm5, %v1720_v6, %v1723_v15  ;;  %v1832_v32 = vsel %vm1249_vm6, %v1829_v38, %v1831_v40  ;;  %2158 = vmatpush.bf16.msrb.mxu1 %v4858_v56  ;;  %2363 = vmatpush.bf16.msrb.mxu3 %v4887_v60  ;;  %v4869_v14 = vld [vmem:[#allocation16 + $0x1a8] sm:$0xff]  ;;  %v4866_v38 = vld [vmem:[#allocation16 + $0x190] sm:$0xff]  ;;  %v4880_v60 = vld [vmem:[#allocation16 + $0x200] sm:$0xff] }
 0x200   : > { %1792 = vmatmul.bf16.vlgmr.msra.gmra.mxu2 %v1724_v17  ;;  %v1453_v27 = vrot.slane %v1451_v22, 1  ;;  %v1618_v28 = vsel %vm1033_vm3, %v1615_v2, %v1617_v23  ;;  %v1732_v29 = vor.u32 %v1731_v25, %v1728_v24  ;;  %v4885_v17 = vld [vmem:[#allocation16 + $0x228] sm:$0xff]  ;;  %v4868_v22 = vld [vmem:[#allocation16 + $0x1a0] sm:$0xff]  ;;  %v4875_v24 = vld [vmem:[#allocation16 + $0x1d8] sm:$0xff] }
 0x201   : > { %2251 = vmatpush.bf16.msrb.mxu2 %v4876_v16  ;;  %v4884_v25 = vld [vmem:[#allocation16 + $0x220] sm:$0xff] }
 0x202   : > { %v1454_v30 = vsel %vm853_vm4, %v1449_v26, %v1453_v27  ;;  %v1733_v33 = vsel %vm1133_vm5, %v1723_v15, %v1732_v29  ;;  %2086 = vmatpush.bf16.msrb.mxu0 %v4869_v14  ;;  %v4867_v29 = vld [vmem:[#allocation16 + $0x198] sm:$0xff] }
 0x203   : > { %2159 = vmatpush.bf16.msrb.mxu1 %v4857_v1  ;;  %2364 = vmatpush.bf16.msrb.mxu3 %v4886_v9  ;;  %v4895_v1 = vld [vmem:[#allocation16 + $0x278] sm:$0xff] }
 0x205   : > { %2252 = vmatpush.bf16.msrb.mxu2 %v4875_v24 }
 0x206   : > { %2087 = vmatpush.bf16.msrb.mxu0 %v4868_v22  ;;  %v4891_v22 = vld [vmem:[#allocation16 + $0x258] sm:$0xff] }
 0x207   : > { %2160 = vmatpush.bf16.msrb.mxu1 %v4856_v12  ;;  %2365 = vmatpush.bf16.msrb.mxu3 %v4885_v17 }
 0x20a   : > { %2088 = vmatpush.bf16.msrb.mxu0 %v4867_v29 }
 0x20b   : > { %2366 = vmatpush.bf16.msrb.mxu3 %v4884_v25 }
 0x20c   : > { %1682 = vmatmul.bf16.gmra.mxu1 %v1618_v28 }
 0x20e   : > { %1518 = vmatmul.bf16.gmra.mxu3 %v1454_v30  ;;  %2089 = vmatpush.bf16.msrb.mxu0 %v4866_v38 }
 0x20f   : > { %2367 = vmatpush.bf16.msrb.mxu3 %v4883_v34 }
 0x210   : > { %1797 = vmatmul.bf16.gmra.mxu2 %v1733_v33  ;;  %v4874_v33 = vld [vmem:[#allocation16 + $0x1d0] sm:$0xff] }
 0x211   : > { %2253 = vmatpush.bf16.msrb.mxu2 %v4874_v33 }
 0x215   : > { %2254 = vmatpush.bf16.msrb.mxu2 %v4873_v42 }
 0x21e   : > { %1891 = vmatmul.bf16.vlgmr.msra.gmra.mxu3 %v1830_v39 }
 0x22e   : > { %1896 = vmatmul.bf16.gmra.mxu3 %v1832_v32 }
 0x265   : > { %v1583_v47 = vpop.f32.mrf.mxu0 }
 0x26d   : > { %v1585_v53 = vpop.f32.mrf.mxu0 }
 0x276   : > { %v1588_v13 = vpop.f32.mrf.mxu0 }
 0x279   : > { %v1678_v44 = vpop.f32.mrf.mxu1 }
 0x27e   : > { %v1590_v35 = vpop.f32.mrf.mxu0 }
 0x281   : > { %v1514_v37 = vpop.f32.mrf.mxu3  ;;  %v1680_v58 = vpop.f32.mrf.mxu1 }
 0x282   : > { %v1584_v49 = vadd.f32 %v1583_v47, %v1514_v37  ;;  %v4865_v47 = vld [vmem:[#allocation16 + $0x188] sm:$0xff] }
 0x283   : > { %v1793_v51 = vpop.f32.mrf.mxu2  ;;  %2090 = vmatpush.bf16.msrb.mxu0 %v4865_v47 }
 0x284   : > { %v1688_v55 = vadd.f32 %v1678_v44, %v1584_v49 }
 0x286   : > { %v1803_v61 = vadd.f32 %v1793_v51, %v1688_v55 }
 0x287   : > { %2091 = vmatpush.bf16.msrb.mxu0 %v4864_v54 }
 0x289   : > { %v1516_v43 = vpop.f32.mrf.mxu3  ;;  %v1683_v20 = vpop.f32.mrf.mxu1 }
 0x28a   : > { %v1586_v63 = vadd.f32 %v1585_v53, %v1516_v43  ;;  %v4882_v43 = vld [vmem:[#allocation16 + $0x210] sm:$0xff]  ;;  %v4881_v53 = vld [vmem:[#allocation16 + $0x208] sm:$0xff] }
 0x28b   : > { %v1795_v6 = vpop.f32.mrf.mxu2  ;;  %2368 = vmatpush.bf16.msrb.mxu3 %v4882_v43  ;;  %2462 = vmatpush.bf16.msra.mxu0 %v4895_v1 }
 0x28c   : > { %v1689_v10 = vadd.f32 %v1680_v58, %v1586_v63 }
 0x28e   : > { %v1804_v18 = vadd.f32 %v1795_v6, %v1689_v10  ;;  %v4893_v10 = vld [vmem:[#allocation16 + $0x268] sm:$0xff] }
 0x28f   : > { %2369 = vmatpush.bf16.msrb.mxu3 %v4881_v53 }
 0x291   : > { %v1519_v48 = vpop.f32.mrf.mxu3  ;;  %v1685_v46 = vpop.f32.mrf.mxu1 }
 0x292   : > { %v1589_v19 = vadd.f32 %v1588_v13, %v1519_v48  ;;  %v4892_v13 = vld [vmem:[#allocation16 + $0x260] sm:$0xff] }
 0x293   : > { %v1798_v28 = vpop.f32.mrf.mxu2  ;;  %2370 = vmatpush.bf16.msrb.mxu3 %v4880_v60 }
 0x294   : > { %v1690_v26 = vadd.f32 %v1683_v20, %v1589_v19 }
 0x296   : > { %v1805_v39 = vadd.f32 %v1798_v28, %v1690_v26 }
 0x299   : > { %v5951_v52 = vpop.f32.mrf.mxu3 }
 0x29a   : > { %v1591_v40 = vadd.f32 %v1590_v35, %v5951_v52  ;;  %v4872_v52 = vld [vmem:[#allocation16 + $0x1c0] sm:$0xff] }
 0x29b   : > { %v1800_v50 = vpop.f32.mrf.mxu2  ;;  %2255 = vmatpush.bf16.msrb.mxu2 %v4872_v52 }
 0x29c   : > { %v1691_v48 = vadd.f32 %v1685_v46, %v1591_v40 }
 0x29e   : > { %v1806_v55 = vadd.f32 %v1800_v50, %v1691_v48 }
 0x2a1   : > { %v1892_v2 = vpop.f32.mrf.mxu3 }
 0x2a2   : > { %v1902_v4 = vadd.f32 %v1892_v2, %v1803_v61 }
 0x2a4   : > { %v1910_v11 = vmul.f32 %v5956_v0, %v1902_v4  ;;  %v4894_v4 = vld [vmem:[#allocation16 + $0x270] sm:$0xff] }
 0x2a5   : > { %2463 = vmatpush.bf16.msra.mxu0 %v4894_v4 }
 0x2a6   : > { %v1918_v15 = vadd.f32 %v5961_v5, %v1910_v11 }
 0x2a8   : > { %5173 = vtanh.f32 %v1918_v15 }
 0x2a9   : > { %v1894_v21 = vpop.f32.mrf.mxu3  ;;  %2464 = vmatpush.bf16.msra.mxu0 %v4893_v10 }
 0x2aa   : > { %v1903_v23 = vadd.f32 %v1894_v21, %v1804_v18 }
 0x2ac   : > { %v1911_v27 = vmul.f32 %v5956_v0, %v1903_v23  ;;  %v4890_v23 = vld [vmem:[#allocation16 + $0x250] sm:$0xff] }
 0x2ad   : > { %2465 = vmatpush.bf16.msra.mxu0 %v4892_v13  ;;  %v4904_v13 = vld [vmem:[#allocation16 + $0x2b8] sm:$0xff] }
 0x2ae   : > { %v5174_v30 = vpop.eup %5173  ;;  %v1919_v31 = vadd.f32 %v5961_v5, %v1911_v27  ;;  %v4889_v27 = vld [vmem:[#allocation16 + $0x248] sm:$0xff]  ;;  %2734 = vmatpush.bf16.msra.mxu2 %v4904_v13 }
 0x2af   : > { %v1926_v36 = vpack.c.bf16 %v5174_v30, %v5174_v30 }
 0x2b0   : > { %5175 = vtanh.f32 %v1919_v31 }
 0x2b1   : > { %v1934_v32 = vrot.slane %v1926_v36, 6  ;;  %v1897_v37 = vpop.f32.mrf.mxu3  ;;  %2466 = vmatpush.bf16.msra.mxu0 %v4891_v22  ;;  %v4888_v36 = vld [vmem:[#allocation16 + $0x240] sm:$0xff] }
 0x2b2   : > { %v1904_v45 = vadd.f32 %v1897_v37, %v1805_v39 }
 0x2b3   : > { %1950 = vst [vmem:[#allocation3] sm:$0xc] %v1934_v32  ;;  %v1935_v56 = vrot.slane %v1934_v32, 4 }
 0x2b4   : > { %1958 = vst [vmem:[#allocation3] sm:$0xc] %v5612_v7  ;;  %v1912_v41 = vmul.f32 %v5956_v0, %v1904_v45 }
 0x2b5   : > { %2467 = vmatpush.bf16.msra.mxu0 %v4890_v23  ;;  %v4920_v23 = vld [vmem:[#allocation16 + $0x338] sm:$0xff] }
 0x2b6   : > { %v5176_v44 = vpop.eup %5175  ;;  %v1920_v49 = vadd.f32 %v5961_v5, %v1912_v41  ;;  %2829 = vmatpush.bf16.msra.mxu3 %v4920_v23 }
 0x2b7   : > { %v1927_v51 = vpack.c.bf16 %v5176_v44, %v5176_v44 }
 0x2b8   : > { %5177 = vtanh.f32 %v1920_v49 }
 0x2b9   : > { %v1936_v57 = vrot.slane %v1927_v51, 6  ;;  %v1899_v58 = vpop.f32.mrf.mxu3  ;;  %2468 = vmatpush.bf16.msra.mxu0 %v4889_v27 }
 0x2ba   : > { %v1905_v59 = vadd.f32 %v1899_v58, %v1806_v55 }
 0x2bb   : > { %v1937_v61 = vsel %vm5879_vm2, %v1935_v56, %v1936_v57  ;;  %v1938_v8 = vrot.slane %v1936_v57, 4  ;;  %v2172_v12 = vld [vmem:[#allocation3] sm:$0xe] }
 0x2bc   : > { %1951 = vst [vmem:[#allocation3 + $0x4] sm:$0xf] %v1937_v61  ;;  %v1913_v63 = vmul.f32 %v5956_v0, %v1905_v59  ;;  %v2191_v16 = vunpack.c.l.b16 %v2172_v12 }
 0x2bd   : > { %1959 = vst [vmem:[#allocation3 + $0x4] sm:$0xf] %v5612_v7  ;;  %2469 = vmatpush.bf16.msra.mxu0 %v4888_v36 }
 0x2be   : > { %v5178_v2 = vpop.eup %5177  ;;  %v1921_v3 = vadd.f32 %v5961_v5, %v1913_v63 }
 0x2bf   : > { %v1928_v6 = vpack.c.bf16 %v5178_v2, %v5178_v2  ;;  %v2386_v2 = vld [vmem:[#allocation3] sm:$0xc] }
 0x2c0   : > { %5179 = vtanh.f32 %v1921_v3  ;;  %v2405_v4 = vunpack.c.l.b16 %v2386_v2 }
 0x2c1   : > { %v1939_v9 = vrot.slane %v1928_v6, 6 }
 0x2c3   : > { %v1940_v11 = vsel %vm5879_vm2, %v1938_v8, %v1939_v9  ;;  %v1941_v17 = vrot.slane %v1939_v9, 4 }
 0x2c4   : > { %1952 = vst [vmem:[#allocation3 + $0x8] sm:$0xf] %v1940_v11  ;;  %v5978_v0 = vld [vmem:[#allocation3] sm:$0xff]  }
 0x2c5   : > { %1960 = vst [vmem:[#allocation3 + $0x8] sm:$0xf] %v5612_v7  ;;  %2161 = vmatmul.bf16.vlgmr.msrb.gmra.mxu1 %v5978_v0  ;;  %v4989_v15 = vunpack.c.h.b16 %v5978_v0  ;;  %v2017_v24 = vshll.u32 %v5978_v0, 16  ;;  %v2015_v28 = vshrl.u32 %v5978_v0, 16 }
 0x2c6   : > { %v5180_v5 = vpop.eup %5179 }
 0x2c7   : > { %v1929_v14 = vpack.c.bf16 %v5180_v5, %v5180_v5  ;;  %v2192_v21 = vpack.c.b16 %v4989_v15, %v2191_v16  ;;  %v2019_v29 = vrot.slane %v2017_v24, 1  ;;  %v2406_v6 = vpack.c.b16 %v4989_v15, %v2405_v4  ;;  %v4903_v16 = vld [vmem:[#allocation16 + $0x2b0] sm:$0xff]  ;;  %v4901_v15 = vld [vmem:[#allocation16 + $0x2a0] sm:$0xff]  ;;  %v4924_v4 = vld [vmem:[#allocation16 + $0x358] sm:$0xff] }
 0x2c8   : > { %2735 = vmatpush.bf16.msra.mxu2 %v4903_v16 }
 0x2c9   : > { %v1942_v18 = vrot.slane %v1929_v14, 6  ;;  %v2293_v25 = vshrl.u32 %v2192_v21, 16  ;;  %v2296_v26 = vshll.u32 %v2192_v21, 16  ;;  %v2193_v34 = vrot.slane %v2192_v21, 1  ;;  %v4900_v21 = vld [vmem:[#allocation16 + $0x298] sm:$0xff] }
 0x2ca   : > { %v2020_v39 = vor.u32 %v2019_v29, %v2015_v28  ;;  %v2407_v8 = vrot.slane %v2406_v6, 2 }
 0x2cb   : > { %v1943_v19 = vsel %vm5879_vm2, %v1941_v17, %v1942_v18  ;;  %v1944_v20 = vrot.slane %v1942_v18, 4  ;;  %v2295_v30 = vrot.slane %v2293_v25, 1  ;;  %v2298_v31 = vrot.slane %v2296_v26, 2  ;;  %v4902_v17 = vld [vmem:[#allocation16 + $0x2a8] sm:$0xff]  ;;  %v4899_v25 = vld [vmem:[#allocation16 + $0x290] sm:$0xff]  ;;  %v4912_v26 = vld [vmem:[#allocation16 + $0x2f8] sm:$0xff] }
 0x2cc   : > { %1953 = vst [vmem:[#allocation3 + $0xc] sm:$0xf] %v1943_v19  ;;  %2736 = vmatpush.bf16.msra.mxu2 %v4902_v17  ;;  %2665 = vmatpush.bf16.msra.mxu1 %v4912_v26  ;;  %v4906_v17 = vld [vmem:[#allocation16 + $0x2c8] sm:$0xff]  ;;  %v4905_v26 = vld [vmem:[#allocation16 + $0x2c0] sm:$0xff] }
 0x2cd   : > { %1954 = vst [vmem:[#allocation3 + $0x10] sm:$0x3] %v1944_v20  ;;  %v2299_v37 = vor.u32 %v2298_v31, %v2295_v30  ;;  %v4919_v30 = vld [vmem:[#allocation16 + $0x330] sm:$0xff]  ;;  %v4928_v31 = vld [vmem:[#allocation16 + $0x378] sm:$0xff] }
 0x2ce   : > { %1961 = vst [vmem:[#allocation3 + $0xc] sm:$0x3] %v5612_v7  ;;  %2830 = vmatpush.bf16.msra.mxu3 %v4919_v30 }
 0x2d0   : > { %2737 = vmatpush.bf16.msra.mxu2 %v4901_v15 }
 0x2d4   : > { %v2271_v35 = vld [vmem:[#allocation3 + $0x10] sm:$0x3]  ;;  %2738 = vmatpush.bf16.msra.mxu2 %v4900_v21 }
 0x2d5   : > { %v4855_v33 = vld [vmem:[#allocation3 + $0x8] sm:$0xff]  ;;  %v1983_v42 = vld [vmem:[#allocation3 + $0x10] sm:$0x1]  ;;  %v2290_v43 = vunpack.c.l.b16 %v2271_v35 }
 0x2d6   : > { %2166 = vmatmul.bf16.gmra.mxu1 %v4855_v33  ;;  %v2194_v38 = vrot.slane %v4855_v33, 1  ;;  %v2022_v40 = vshll.u32 %v4855_v33, 16  ;;  %v2026_v32 = vshrl.u32 %v4855_v33, 16  ;;  %v2010_v49 = vunpack.c.l.b16 %v1983_v42  ;;  %v4898_v35 = vld [vmem:[#allocation16 + $0x288] sm:$0xff]  ;;  %v4927_v42 = vld [vmem:[#allocation16 + $0x370] sm:$0xff] }
 0x2d7   : > { %v2291_v51 = vpack.c.b16 %v2290_v43, %v2290_v43  ;;  %v2408_v9 = vrot.slane %v4855_v33, 2 }
 0x2d8   : > { %v2195_v45 = vsel %vm1033_vm3, %v2193_v34, %v2194_v38  ;;  %v2024_v46 = vrot.slane %v2022_v40, 1  ;;  %v2300_v47 = vrot.slane %v2026_v32, 1  ;;  %v2301_v48 = vrot.slane %v2022_v40, 2  ;;  %2739 = vmatpush.bf16.msra.mxu2 %v4899_v25  ;;  %v6005_v34 = vld [vmem:[%s6169_s8 + $0x1] ss:$0 sm:$0xff]  ;;  %v4922_v25 = vld [vmem:[#allocation16 + $0x348] sm:$0xff] }
 0x2d9   : > { %2256 = vmatmul.bf16.vlgmr.msrb.gmra.mxu2 %v2195_v45  ;;  %v2013_v52 = vpack.c.b16 %v2010_v49, %v2010_v49  ;;  %v2305_v53 = vshrl.u32 %v2291_v51, 16  ;;  %v2308_v54 = vshll.u32 %v2291_v51, 16  ;;  %v2409_v10 = vsel %vm1249_vm6, %v2407_v8, %v2408_v9  ;;  %v4926_v49 = vld [vmem:[#allocation16 + $0x368] sm:$0xff]  ;;  %v4907_v8 = vld [vmem:[#allocation16 + $0x2d0] sm:$0xff] }
 0x2da   : > { %v2025_v41 = vsel %vm853_vm4, %v2020_v39, %v2024_v46  ;;  %v2302_v44 = vor.u32 %v2301_v48, %v2300_v47  ;;  %v2028_v59 = vor.u32 %v2026_v32, %v2024_v46  ;;  %v2410_v11 = vrot.slane %v2291_v51, 2  ;;  %v4911_v39 = vld [vmem:[#allocation16 + $0x2f0] sm:$0xff]  ;;  %v4897_v46 = vld [vmem:[#allocation16 + $0x280] sm:$0xff]  ;;  %v4910_v47 = vld [vmem:[#allocation16 + $0x2e8] sm:$0xff] }
 0x2db   : > { %2092 = vmatmul.bf16.vlgmr.msrb.gmra.mxu0 %v2025_v41  ;;  %v2030_v55 = vshll.u32 %v2013_v52, 16  ;;  %v2196_v56 = vrot.slane %v2013_v52, 1  ;;  %v2307_v57 = vrot.slane %v2305_v53, 1  ;;  %v2310_v58 = vrot.slane %v2308_v54, 2  ;;  %v6010_v32 = vld [vmem:[%s6215_s19 + $0x1] ss:$0 sm:$0xff]  ;;  %2666 = vmatpush.bf16.msra.mxu1 %v4911_v39 }
 0x2dc   : > { %v2303_v50 = vsel %vm1133_vm5, %v2299_v37, %v2302_v44  ;;  %v2411_v12 = vsel %vm1249_vm6, %v2408_v9, %v2410_v11  ;;  %2944 = vmatpush.bf16.msrb.mxu0 %v4928_v31  ;;  %2740 = vmatpush.bf16.msra.mxu2 %v4898_v35  ;;  %v4918_v37 = vld [vmem:[#allocation16 + $0x328] sm:$0xff]  ;;  %v4909_v54 = vld [vmem:[#allocation16 + $0x2e0] sm:$0xff] }
 0x2dd   : > { %2371 = vmatmul.bf16.vlgmr.msrb.gmra.mxu3 %v2303_v50  ;;  %v2032_v60 = vrot.slane %v2030_v55, 1  ;;  %v2197_v61 = vsel %vm1033_vm3, %v2194_v38, %v2196_v56  ;;  %v2311_v63 = vor.u32 %v2310_v58, %v2307_v57  ;;  %v4916_v57 = vld [vmem:[#allocation16 + $0x318] sm:$0xff]  ;;  %v4925_v58 = vld [vmem:[#allocation16 + $0x360] sm:$0xff] }
 0x2de   : > { %2831 = vmatpush.bf16.msra.mxu3 %v4918_v37  ;;  %v4921_v31 = vld [vmem:[#allocation16 + $0x340] sm:$0xff] }
 0x2df   : > { %v2033_v1 = vsel %vm853_vm4, %v2028_v59, %v2032_v60  ;;  %v2312_v3 = vsel %vm1133_vm5, %v2302_v44, %v2311_v63  ;;  %2667 = vmatpush.bf16.msra.mxu1 %v4910_v47  ;;  %v4917_v44 = vld [vmem:[#allocation16 + $0x320] sm:$0xff] }
 0x2e0   : > { %2945 = vmatpush.bf16.msrb.mxu0 %v4927_v42  ;;  %2741 = vmatpush.bf16.msra.mxu2 %v4897_v46 }
 0x2e2   : > { %2832 = vmatpush.bf16.msra.mxu3 %v4917_v44 }
 0x2e3   : > { %2668 = vmatpush.bf16.msra.mxu1 %v4909_v54 }
 0x2e4   : > { %2946 = vmatpush.bf16.msrb.mxu0 %v4926_v49 }
 0x2e6   : > { %2833 = vmatpush.bf16.msra.mxu3 %v4916_v57 }
 0x2e8   : > { %2947 = vmatpush.bf16.msrb.mxu0 %v4925_v58 }
 0x2e9   : > { %2261 = vmatmul.bf16.gmra.mxu2 %v2197_v61  ;;  %v4908_v61 = vld [vmem:[#allocation16 + $0x2d8] sm:$0xff] }
 0x2ea   : > { %2669 = vmatpush.bf16.msra.mxu1 %v4908_v61 }
 0x2eb   : > { %2097 = vmatmul.bf16.gmra.mxu0 %v2033_v1 }
 0x2ec   : > { %2948 = vmatpush.bf16.msrb.mxu0 %v4924_v4 }
 0x2ed   : > { %2376 = vmatmul.bf16.gmra.mxu3 %v2312_v3  ;;  %v4915_v3 = vld [vmem:[#allocation16 + $0x310] sm:$0xff] }
 0x2ee   : > { %2834 = vmatpush.bf16.msra.mxu3 %v4915_v3  ;;  %2670 = vmatpush.bf16.msra.mxu1 %v4907_v8  ;;  %v4929_v8 = vld [vmem:[#allocation16 + $0x380] sm:$0xff] }
 0x2f2   : > { %2671 = vmatpush.bf16.msra.mxu1 %v4906_v17 }
 0x2f6   : > { %2672 = vmatpush.bf16.msra.mxu1 %v4905_v26 }
 0x2fb   : > { %2470 = vmatmul.bf16.vlgmr.msra.gmra.mxu0 %v2409_v10 }
 0x30b   : > { %2475 = vmatmul.bf16.gmra.mxu0 %v2411_v12  ;;  %v4914_v12 = vld [vmem:[#allocation16 + $0x308] sm:$0xff] }
 0x30c   : > { %2835 = vmatpush.bf16.msra.mxu3 %v4914_v12 }
 0x342   : > { %v2162_v0 = vpop.f32.mrf.mxu1 }
 0x34a   : > { %v2164_v27 = vpop.f32.mrf.mxu1 }
 0x353   : > { %v2167_v50 = vpop.f32.mrf.mxu1 }
 0x358   : > { %v2093_v5 = vpop.f32.mrf.mxu0 }
 0x359   : > { %v2163_v24 = vadd.f32 %v2162_v0, %v2093_v5  ;;  %v4923_v5 = vld [vmem:[#allocation16 + $0x350] sm:$0xff] }
 0x35a   : > { %2949 = vmatpush.bf16.msrb.mxu0 %v4923_v5 }
 0x35c   : > { %v2257_v19 = vpop.f32.mrf.mxu2 }
 0x35d   : > { %v2267_v28 = vadd.f32 %v2257_v19, %v2163_v24  ;;  %v4913_v24 = vld [vmem:[#allocation16 + $0x300] sm:$0xff] }
 0x35e   : > { %2836 = vmatpush.bf16.msra.mxu3 %v4913_v24  ;;  %2950 = vmatpush.bf16.msrb.mxu0 %v4922_v25 }
 0x360   : > { %v2095_v14 = vpop.f32.mrf.mxu0  ;;  %v2372_v20 = vpop.f32.mrf.mxu3 }
 0x361   : > { %v2382_v33 = vadd.f32 %v2372_v20, %v2267_v28  ;;  %v2165_v43 = vadd.f32 %v2164_v27, %v2095_v14  ;;  %v2169_v14 = vpop.f32.mrf.mxu1 }
 0x362   : > { %2951 = vmatpush.bf16.msrb.mxu0 %v4921_v31 }
 0x364   : > { %v2259_v29 = vpop.f32.mrf.mxu2 }
 0x365   : > { %v2268_v48 = vadd.f32 %v2259_v29, %v2165_v43 }
 0x368   : > { %v2098_v18 = vpop.f32.mrf.mxu0  ;;  %v2374_v36 = vpop.f32.mrf.mxu3 }
 0x369   : > { %v2383_v51 = vadd.f32 %v2374_v36, %v2268_v48  ;;  %v2168_v59 = vadd.f32 %v2167_v50, %v2098_v18  ;;  %v4936_v36 = vld [vmem:[#allocation16 + $0x3b8] sm:$0xff]  ;;  %v4933_v48 = vld [vmem:[#allocation16 + $0x3a0] sm:$0xff] }
 0x36a   : > { %3043 = vmatpush.bf16.msrb.mxu1 %v4936_v36 }
 0x36c   : > { %v2262_v52 = vpop.f32.mrf.mxu2 }
 0x36d   : > { %v2269_v1 = vadd.f32 %v2262_v52, %v2168_v59 }
 0x370   : > { %v6000_v22 = vpop.f32.mrf.mxu0  ;;  %v2377_v56 = vpop.f32.mrf.mxu3 }
 0x371   : > { %v2384_v9 = vadd.f32 %v2377_v56, %v2269_v1  ;;  %v2170_v18 = vadd.f32 %v2169_v14, %v6000_v22  ;;  %v4931_v56 = vld [vmem:[#allocation16 + $0x390] sm:$0xff] }
 0x374   : > { %v2264_v16 = vpop.f32.mrf.mxu2 }
 0x375   : > { %v2270_v20 = vadd.f32 %v2264_v16, %v2170_v18 }
 0x378   : > { %v2471_v38 = vpop.f32.mrf.mxu0  ;;  %v2379_v15 = vpop.f32.mrf.mxu3 }
 0x379   : > { %v2481_v40 = vadd.f32 %v2471_v38, %v2382_v33  ;;  %v2385_v27 = vadd.f32 %v2379_v15, %v2270_v20 }
 0x37b   : > { %v2490_v45 = vmul.f32 %v6005_v34, %v2481_v40  ;;  %v4935_v40 = vld [vmem:[#allocation16 + $0x3b0] sm:$0xff] }
 0x37c   : > { %3044 = vmatpush.bf16.msrb.mxu1 %v4935_v40 }
 0x37d   : > { %v2499_v41 = vadd.f32 %v6010_v32, %v2490_v45  ;;  %v4934_v45 = vld [vmem:[#allocation16 + $0x3a8] sm:$0xff] }
 0x37f   : > { %5181 = vtanh.f32 %v2499_v41 }
 0x380   : > { %v2473_v53 = vpop.f32.mrf.mxu0  ;;  %3045 = vmatpush.bf16.msrb.mxu1 %v4934_v45 }
 0x381   : > { %v2482_v55 = vadd.f32 %v2473_v53, %v2383_v51 }
 0x383   : > { %v2491_v60 = vmul.f32 %v6005_v34, %v2482_v55  ;;  %v4932_v55 = vld [vmem:[#allocation16 + $0x398] sm:$0xff] }
 0x384   : > { %3046 = vmatpush.bf16.msrb.mxu1 %v4933_v48  ;;  %v4945_v48 = vld [vmem:[#allocation18 + $0x38] sm:$0xff] }
 0x385   : > { %v5182_v63 = vpop.eup %5181  ;;  %v2500_v2 = vadd.f32 %v6010_v32, %v2491_v60  ;;  %v4930_v60 = vld [vmem:[#allocation16 + $0x388] sm:$0xff]  ;;  %3311 = vmatpush.bf16.msrb.mxu3 %v4945_v48 }
 0x386   : > { %v2507_v6 = vpack.c.bf16 %v5182_v63, %v5182_v63  ;;  %v4955_v48 = vld [vmem:[#allocation18 + $0x88] sm:$0xff] }
 0x387   : > { %5183 = vtanh.f32 %v2500_v2 }
 0x388   : > { %v2515_v10 = vrot.slane %v2507_v6, 6  ;;  %v2476_v11 = vpop.f32.mrf.mxu0  ;;  %3047 = vmatpush.bf16.msrb.mxu1 %v4932_v55 }
 0x389   : > { %v2483_v13 = vadd.f32 %v2476_v11, %v2384_v9 }
 0x38a   : > { %2531 = vst [vmem:[#allocation3] sm:$0xc] %v2515_v10  ;;  %v2516_v28 = vrot.slane %v2515_v10, 4 }
 0x38b   : > { %2539 = vst [vmem:[#allocation3] sm:$0xc] %v5612_v7  ;;  %v2492_v0 = vmul.f32 %v6005_v34, %v2483_v13 }
 0x38c   : > { %3048 = vmatpush.bf16.msrb.mxu1 %v4931_v56 }
 0x38d   : > { %v5184_v19 = vpop.eup %5183  ;;  %v2501_v21 = vadd.f32 %v6010_v32, %v2492_v0 }
 0x38e   : > { %v2508_v23 = vpack.c.bf16 %v5184_v19, %v5184_v19 }
 0x38f   : > { %5185 = vtanh.f32 %v2501_v21 }
 0x390   : > { %v2517_v22 = vrot.slane %v2508_v23, 6  ;;  %v2478_v29 = vpop.f32.mrf.mxu0  ;;  %3049 = vmatpush.bf16.msrb.mxu1 %v4930_v60  ;;  %v4940_v60 = vld [vmem:[#allocation18 + $0x10] sm:$0xff] }
 0x391   : > { %v2484_v30 = vadd.f32 %v2478_v29, %v2385_v27 }
 0x392   : > { %v2518_v33 = vsel %vm5879_vm2, %v2516_v28, %v2517_v22  ;;  %v2519_v42 = vrot.slane %v2517_v22, 4  ;;  %v2753_v47 = vld [vmem:[#allocation3] sm:$0xe] }
 0x393   : > { %2532 = vst [vmem:[#allocation3 + $0x4] sm:$0xf] %v2518_v33  ;;  %v2493_v35 = vmul.f32 %v6005_v34, %v2484_v30  ;;  %v2772_v49 = vunpack.c.l.b16 %v2753_v47 }
 0x394   : > { %2540 = vst [vmem:[#allocation3 + $0x4] sm:$0xf] %v5612_v7  ;;  %3050 = vmatpush.bf16.msrb.mxu1 %v4929_v8 }
 0x395   : > { %v5186_v38 = vpop.eup %5185  ;;  %v2502_v39 = vadd.f32 %v6010_v32, %v2493_v35 }
 0x396   : > { %v2509_v37 = vpack.c.bf16 %v5186_v38, %v5186_v38  ;;  %v2967_v38 = vld [vmem:[#allocation3] sm:$0xc] }
 0x397   : > { %5187 = vtanh.f32 %v2502_v39  ;;  %v2986_v40 = vunpack.c.l.b16 %v2967_v38 }
 0x398   : > { %v2520_v43 = vrot.slane %v2509_v37, 6 }
 0x39a   : > { %v2521_v46 = vsel %vm5879_vm2, %v2519_v42, %v2520_v43  ;;  %v2522_v50 = vrot.slane %v2520_v43, 4 }
 0x39b   : > { %2533 = vst [vmem:[#allocation3 + $0x8] sm:$0xf] %v2521_v46  ;;  %v6027_v34 = vld [vmem:[#allocation3] sm:$0xff]  }
 0x39c   : > { %2541 = vst [vmem:[#allocation3 + $0x8] sm:$0xf] %v5612_v7  ;;  %2742 = vmatmul.bf16.vlgmr.msra.gmra.mxu2 %v6027_v34  ;;  %v4993_v44 = vunpack.c.h.b16 %v6027_v34  ;;  %v2598_v57 = vshll.u32 %v6027_v34, 16  ;;  %v2596_v61 = vshrl.u32 %v6027_v34, 16 }
 0x39d   : > { %v5188_v32 = vpop.eup %5187 }
 0x39e   : > { %v2510_v41 = vpack.c.bf16 %v5188_v32, %v5188_v32  ;;  %v2773_v54 = vpack.c.b16 %v4993_v44, %v2772_v49  ;;  %v2600_v63 = vrot.slane %v2598_v57, 1  ;;  %v2987_v37 = vpack.c.b16 %v4993_v44, %v2986_v40  ;;  %v4944_v49 = vld [vmem:[#allocation18 + $0x30] sm:$0xff]  ;;  %v4942_v44 = vld [vmem:[#allocation18 + $0x20] sm:$0xff]  ;;  %v4961_v57 = vld [vmem:[#allocation18 + $0xb8] sm:$0xff] }
 0x39f   : > { %3312 = vmatpush.bf16.msrb.mxu3 %v4944_v49  ;;  %3403 = vmatpush.bf16.msra.mxu0 %v4961_v57  ;;  %v4965_v40 = vld [vmem:[#allocation18 + $0xd8] sm:$0xff] }
 0x3a0   : > { %v2523_v51 = vrot.slane %v2510_v41, 6  ;;  %v2874_v58 = vshrl.u32 %v2773_v54, 16  ;;  %v2877_v59 = vshll.u32 %v2773_v54, 16  ;;  %v2774_v4 = vrot.slane %v2773_v54, 1 }
 0x3a1   : > { %v2601_v10 = vor.u32 %v2600_v63, %v2596_v61  ;;  %v2988_v42 = vrot.slane %v2987_v37, 2  ;;  %v4953_v63 = vld [vmem:[#allocation18 + $0x78] sm:$0xff] }
 0x3a2   : > { %v2524_v52 = vsel %vm5879_vm2, %v2522_v50, %v2523_v51  ;;  %v2525_v53 = vrot.slane %v2523_v51, 4  ;;  %v2876_v1 = vrot.slane %v2874_v58, 1  ;;  %v2879_v2 = vrot.slane %v2877_v59, 2  ;;  %v4943_v50 = vld [vmem:[#allocation18 + $0x28] sm:$0xff]  ;;  %3245 = vmatpush.bf16.msrb.mxu2 %v4953_v63 }
 0x3a3   : > { %2534 = vst [vmem:[#allocation3 + $0xc] sm:$0xf] %v2524_v52  ;;  %3313 = vmatpush.bf16.msrb.mxu3 %v4943_v50 }
 0x3a4   : > { %2535 = vst [vmem:[#allocation3 + $0x10] sm:$0x3] %v2525_v53  ;;  %v2880_v5 = vor.u32 %v2879_v2, %v2876_v1  ;;  %v4941_v53 = vld [vmem:[#allocation18 + $0x18] sm:$0xff]  ;;  %v4960_v1 = vld [vmem:[#allocation18 + $0xb0] sm:$0xff] }
 0x3a5   : > { %2542 = vst [vmem:[#allocation3 + $0xc] sm:$0x3] %v5612_v7  ;;  %v4969_v2 = vld [vmem:[#allocation18 + $0xf8] sm:$0xff]  ;;  %3404 = vmatpush.bf16.msra.mxu0 %v4960_v1 }
 0x3a7   : > { %3314 = vmatpush.bf16.msrb.mxu3 %v4942_v44 }
 0x3ab   : > { %v2852_v6 = vld [vmem:[#allocation3 + $0x10] sm:$0x3]  ;;  %3315 = vmatpush.bf16.msrb.mxu3 %v4941_v53 }
 0x3ac   : > { %v4896_v3 = vld [vmem:[#allocation3 + $0x8] sm:$0xff]  ;;  %v2564_v13 = vld [vmem:[#allocation3 + $0x10] sm:$0x1]  ;;  %v2871_v14 = vunpack.c.l.b16 %v2852_v6 }
 0x3ad   : > { %2747 = vmatmul.bf16.gmra.mxu2 %v4896_v3  ;;  %v2775_v9 = vrot.slane %v4896_v3, 1  ;;  %v2603_v11 = vshll.u32 %v4896_v3, 16  ;;  %v2607_v12 = vshrl.u32 %v4896_v3, 16  ;;  %v2591_v20 = vunpack.c.l.b16 %v2564_v13  ;;  %v4939_v6 = vld [vmem:[#allocation18 + $0x8] sm:$0xff] }
 0x3ae   : > { %v2872_v23 = vpack.c.b16 %v2871_v14, %v2871_v14  ;;  %v2989_v43 = vrot.slane %v4896_v3, 2  ;;  %v4959_v13 = vld [vmem:[#allocation18 + $0xa8] sm:$0xff]  ;;  %v4968_v14 = vld [vmem:[#allocation18 + $0xf0] sm:$0xff] }
 0x3af   : > { %v2776_v16 = vsel %vm1033_vm3, %v2774_v4, %v2775_v9  ;;  %v2605_v17 = vrot.slane %v2603_v11, 1  ;;  %v2881_v18 = vrot.slane %v2607_v12, 1  ;;  %v2882_v0 = vrot.slane %v2603_v11, 2  ;;  %3316 = vmatpush.bf16.msrb.mxu3 %v4940_v60  ;;  %v6054_v4 = vld [vmem:[%s6169_s8 + $0x2] ss:$0 sm:$0xff]  ;;  %3405 = vmatpush.bf16.msra.mxu0 %v4959_v13 }
 0x3b0   : > { %2837 = vmatmul.bf16.vlgmr.msra.gmra.mxu3 %v2776_v16  ;;  %v2594_v24 = vpack.c.b16 %v2591_v20, %v2591_v20  ;;  %v2886_v25 = vshrl.u32 %v2872_v23, 16  ;;  %v2889_v26 = vshll.u32 %v2872_v23, 16  ;;  %v2990_v45 = vsel %vm1249_vm6, %v2988_v42, %v2989_v43  ;;  %v4948_v42 = vld [vmem:[#allocation18 + $0x50] sm:$0xff] }
 0x3b1   : > { %v2606_v15 = vsel %vm853_vm4, %v2601_v10, %v2605_v17  ;;  %v2883_v19 = vor.u32 %v2882_v0, %v2881_v18  ;;  %v2609_v30 = vor.u32 %v2607_v12, %v2605_v17  ;;  %v2991_v46 = vrot.slane %v2872_v23, 2  ;;  %v6059_v12 = vld [vmem:[%s6215_s19 + $0x2] ss:$0 sm:$0xff]  ;;  %v4938_v18 = vld [vmem:[#allocation18] sm:$0xff]  ;;  %v4951_v0 = vld [vmem:[#allocation18 + $0x68] sm:$0xff] }
 0x3b2   : > { %2673 = vmatmul.bf16.vlgmr.msra.gmra.mxu1 %v2606_v15  ;;  %v2611_v27 = vshll.u32 %v2594_v24, 16  ;;  %v2777_v28 = vrot.slane %v2594_v24, 1  ;;  %v2888_v22 = vrot.slane %v2886_v25, 1  ;;  %v2891_v29 = vrot.slane %v2889_v26, 2  ;;  %v4967_v23 = vld [vmem:[#allocation18 + $0xe8] sm:$0xff]  ;;  %v4950_v26 = vld [vmem:[#allocation18 + $0x60] sm:$0xff] }
 0x3b3   : > { %v2884_v21 = vsel %vm1133_vm5, %v2880_v5, %v2883_v19  ;;  %v2992_v47 = vsel %vm1249_vm6, %v2989_v43, %v2991_v46  ;;  %3512 = vmatpush.bf16.msra.mxu1 %v4969_v2  ;;  %3317 = vmatpush.bf16.msrb.mxu3 %v4939_v6  ;;  %v4977_v6 = vld [vmem:[#allocation18 + $0x138] sm:$0xff] }
 0x3b4   : > { %2952 = vmatmul.bf16.vlgmr.msrb.gmra.mxu0 %v2884_v21  ;;  %v2613_v31 = vrot.slane %v2611_v27, 1  ;;  %v2778_v33 = vsel %vm1033_vm3, %v2775_v9, %v2777_v28  ;;  %v2892_v35 = vor.u32 %v2891_v29, %v2888_v22  ;;  %v4952_v9 = vld [vmem:[#allocation18 + $0x70] sm:$0xff]  ;;  %v4958_v21 = vld [vmem:[#allocation18 + $0xa0] sm:$0xff]  ;;  %v4957_v22 = vld [vmem:[#allocation18 + $0x98] sm:$0xff] }
 0x3b5   : > { %3246 = vmatpush.bf16.msrb.mxu2 %v4952_v9  ;;  %3406 = vmatpush.bf16.msra.mxu0 %v4958_v21  ;;  %v4966_v29 = vld [vmem:[#allocation18 + $0xe0] sm:$0xff]  ;;  %v4976_v9 = vld [vmem:[#allocation18 + $0x130] sm:$0xff] }
 0x3b6   : > { %v2614_v36 = vsel %vm853_vm4, %v2609_v30, %v2613_v31  ;;  %v2893_v39 = vsel %vm1133_vm5, %v2883_v19, %v2892_v35  ;;  %v4949_v35 = vld [vmem:[#allocation18 + $0x58] sm:$0xff] }
 0x3b7   : > { %3513 = vmatpush.bf16.msra.mxu1 %v4968_v14  ;;  %3318 = vmatpush.bf16.msrb.mxu3 %v4938_v18 }
 0x3b9   : > { %3247 = vmatpush.bf16.msrb.mxu2 %v4951_v0  ;;  %3407 = vmatpush.bf16.msra.mxu0 %v4957_v22  ;;  %v4974_v0 = vld [vmem:[#allocation18 + $0x120] sm:$0xff] }
 0x3bb   : > { %4998 = vmatpush.bf16.msra.mxu3 %v4961_v57  ;;  %3514 = vmatpush.bf16.msra.mxu1 %v4967_v23 }
 0x3bd   : > { %3248 = vmatpush.bf16.msrb.mxu2 %v4950_v26 }
 0x3bf   : > { %4999 = vmatpush.bf16.msra.mxu3 %v4960_v1  ;;  %3515 = vmatpush.bf16.msra.mxu1 %v4966_v29  ;;  %v4962_v1 = vld [vmem:[#allocation18 + $0xc0] sm:$0xff] }
 0x3c0   : > { %2842 = vmatmul.bf16.gmra.mxu3 %v2778_v33 }
 0x3c1   : > { %3249 = vmatpush.bf16.msrb.mxu2 %v4949_v35 }
 0x3c2   : > { %2678 = vmatmul.bf16.gmra.mxu1 %v2614_v36 }
 0x3c3   : > { %5000 = vmatpush.bf16.msra.mxu3 %v4959_v13  ;;  %3516 = vmatpush.bf16.msra.mxu1 %v4965_v40 }
 0x3c4   : > { %2957 = vmatmul.bf16.gmra.mxu0 %v2893_v39  ;;  %v4956_v39 = vld [vmem:[#allocation18 + $0x90] sm:$0xff] }
 0x3c5   : > { %3408 = vmatpush.bf16.msra.mxu0 %v4956_v39  ;;  %3250 = vmatpush.bf16.msrb.mxu2 %v4948_v42 }
 0x3c7   : > { %5001 = vmatpush.bf16.msra.mxu3 %v4958_v21 }
 0x3c9   : > { %3409 = vmatpush.bf16.msra.mxu0 %v4955_v48 }
 0x3cb   : > { %5002 = vmatpush.bf16.msra.mxu3 %v4957_v22 }
 0x3cf   : > { %5003 = vmatpush.bf16.msra.mxu3 %v4956_v39 }
 0x3d2   : > { %3051 = vmatmul.bf16.vlgmr.msrb.gmra.mxu1 %v2990_v45 }
 0x3d3   : > { %5004 = vmatpush.bf16.msra.mxu3 %v4955_v48 }
 0x3e2   : > { %3056 = vmatmul.bf16.gmra.mxu1 %v2992_v47 }
 0x41f   : > { %v2743_v52 = vpop.f32.mrf.mxu2 }
 0x427   : > { %v2745_v58 = vpop.f32.mrf.mxu2 }
 0x42f   : > { %v2674_v32 = vpop.f32.mrf.mxu1 }
 0x430   : > { %v2744_v56 = vadd.f32 %v2743_v52, %v2674_v32  ;;  %v2748_v15 = vpop.f32.mrf.mxu2 }
 0x431   : > { %v2953_v54 = vpop.f32.mrf.mxu0 }
 0x433   : > { %v2838_v34 = vpop.f32.mrf.mxu3 }
 0x434   : > { %v2848_v59 = vadd.f32 %v2838_v34, %v2744_v56  ;;  %v4963_v56 = vld [vmem:[#allocation18 + $0xc8] sm:$0xff] }
 0x436   : > { %v2963_v3 = vadd.f32 %v2953_v54, %v2848_v59  ;;  %v4954_v54 = vld [vmem:[#allocation18 + $0x80] sm:$0xff] }
 0x437   : > { %v2676_v41 = vpop.f32.mrf.mxu1  ;;  %3410 = vmatpush.bf16.msra.mxu0 %v4954_v54  ;;  %5005 = vmatpush.bf16.msra.mxu3 %v4954_v54 }
 0x438   : > { %v2746_v10 = vadd.f32 %v2745_v58, %v2676_v41  ;;  %v2750_v43 = vpop.f32.mrf.mxu2  ;;  %v4964_v41 = vld [vmem:[#allocation18 + $0xd0] sm:$0xff] }
 0x439   : > { %v2955_v5 = vpop.f32.mrf.mxu0  ;;  %3517 = vmatpush.bf16.msra.mxu1 %v4964_v41 }
 0x43b   : > { %v2840_v61 = vpop.f32.mrf.mxu3 }
 0x43c   : > { %v2849_v16 = vadd.f32 %v2840_v61, %v2746_v10 }
 0x43d   : > { %3518 = vmatpush.bf16.msra.mxu1 %v4963_v56 }
 0x43e   : > { %v2964_v24 = vadd.f32 %v2955_v5, %v2849_v16  ;;  %v4975_v16 = vld [vmem:[#allocation18 + $0x128] sm:$0xff] }
 0x43f   : > { %v2679_v51 = vpop.f32.mrf.mxu1 }
 0x440   : > { %v2749_v27 = vadd.f32 %v2748_v15, %v2679_v51  ;;  %v4947_v51 = vld [vmem:[#allocation18 + $0x48] sm:$0xff] }
 0x441   : > { %v2958_v33 = vpop.f32.mrf.mxu0  ;;  %3251 = vmatpush.bf16.msrb.mxu2 %v4947_v51  ;;  %3519 = vmatpush.bf16.msra.mxu1 %v4962_v1 }
 0x443   : > { %v2843_v20 = vpop.f32.mrf.mxu3 }
 0x444   : > { %v2850_v30 = vadd.f32 %v2843_v20, %v2749_v27  ;;  %v4973_v27 = vld [vmem:[#allocation18 + $0x118] sm:$0xff] }
 0x446   : > { %v2965_v45 = vadd.f32 %v2958_v33, %v2850_v30 }
 0x447   : > { %v6049_v55 = vpop.f32.mrf.mxu1 }
 0x448   : > { %v2751_v49 = vadd.f32 %v2750_v43, %v6049_v55  ;;  %v4946_v55 = vld [vmem:[#allocation18 + $0x40] sm:$0xff] }
 0x449   : > { %v2960_v57 = vpop.f32.mrf.mxu0  ;;  %3252 = vmatpush.bf16.msrb.mxu2 %v4946_v55 }
 0x44b   : > { %v2845_v46 = vpop.f32.mrf.mxu3 }
 0x44c   : > { %v2851_v52 = vadd.f32 %v2845_v46, %v2751_v49 }
 0x44d   : > { %3605 = vmatpush.bf16.msra.mxu2 %v4977_v6 }
 0x44e   : > { %v2966_v59 = vadd.f32 %v2960_v57, %v2851_v52 }
 0x44f   : > { %v3052_v8 = vpop.f32.mrf.mxu1 }
 0x450   : > { %v3062_v11 = vadd.f32 %v3052_v8, %v2963_v3 }
 0x451   : > { %3606 = vmatpush.bf16.msra.mxu2 %v4976_v9 }
 0x452   : > { %v3071_v17 = vmul.f32 %v6054_v4, %v3062_v11 }
 0x454   : > { %v3080_v19 = vadd.f32 %v6059_v12, %v3071_v17 }
 0x455   : > { %3607 = vmatpush.bf16.msra.mxu2 %v4975_v16 }
 0x456   : > { %5189 = vtanh.f32 %v3080_v19 }
 0x457   : > { %v3054_v25 = vpop.f32.mrf.mxu1 }
 0x458   : > { %v3063_v28 = vadd.f32 %v3054_v25, %v2964_v24 }
 0x459   : > { %3608 = vmatpush.bf16.msra.mxu2 %v4974_v0 }
 0x45a   : > { %v3072_v31 = vmul.f32 %v6054_v4, %v3063_v28  ;;  %v4972_v28 = vld [vmem:[#allocation18 + $0x110] sm:$0xff] }
 0x45c   : > { %v5190_v36 = vpop.eup %5189  ;;  %v3081_v38 = vadd.f32 %v6059_v12, %v3072_v31  ;;  %v4971_v31 = vld [vmem:[#allocation18 + $0x108] sm:$0xff] }
 0x45d   : > { %v3088_v37 = vpack.c.bf16 %v5190_v36, %v5190_v36  ;;  %3609 = vmatpush.bf16.msra.mxu2 %v4973_v27 }
 0x45e   : > { %5191 = vtanh.f32 %v3081_v38 }
 0x45f   : > { %v3096_v47 = vrot.slane %v3088_v37, 6  ;;  %v3057_v32 = vpop.f32.mrf.mxu1  ;;  %v4970_v37 = vld [vmem:[#allocation18 + $0x100] sm:$0xff] }
 0x460   : > { %v3064_v50 = vadd.f32 %v3057_v32, %v2965_v45 }
 0x461   : > { %3112 = vst [vmem:[#allocation3] sm:$0xc] %v3096_v47  ;;  %v3097_v60 = vrot.slane %v3096_v47, 4  ;;  %3610 = vmatpush.bf16.msra.mxu2 %v4972_v28 }
 0x462   : > { %3120 = vst [vmem:[#allocation3] sm:$0xc] %v5612_v7  ;;  %v3073_v34 = vmul.f32 %v6054_v4, %v3064_v50 }
 0x464   : > { %v5192_v44 = vpop.eup %5191  ;;  %v3082_v53 = vadd.f32 %v6059_v12, %v3073_v34 }
 0x465   : > { %v3089_v58 = vpack.c.bf16 %v5192_v44, %v5192_v44  ;;  %3611 = vmatpush.bf16.msra.mxu2 %v4971_v31 }
 0x466   : > { %5193 = vtanh.f32 %v3082_v53 }
 0x467   : > { %v3098_v61 = vrot.slane %v3089_v58, 6  ;;  %v3059_v63 = vpop.f32.mrf.mxu1 }
 0x468   : > { %v3065_v2 = vadd.f32 %v3059_v63, %v2966_v59 }
 0x469   : > { %v3099_v3 = vsel %vm5879_vm2, %v3097_v60, %v3098_v61  ;;  %v3100_v13 = vrot.slane %v3098_v61, 4  ;;  %v3327_v18 = vld [vmem:[#allocation3] sm:$0xe]  ;;  %3612 = vmatpush.bf16.msra.mxu2 %v4970_v37 }
 0x46a   : > { %3113 = vst [vmem:[#allocation3 + $0x4] sm:$0xf] %v3099_v3  ;;  %v3074_v8 = vmul.f32 %v6054_v4, %v3065_v2  ;;  %v3346_v20 = vunpack.c.l.b16 %v3327_v18  ;;  %v3529_v6 = vld [vmem:[#allocation3] sm:$0xc] }
 0x46b   : > { %3121 = vst [vmem:[#allocation3 + $0x4] sm:$0xf] %v5612_v7  ;;  %v3548_v9 = vunpack.c.l.b16 %v3529_v6 }
 0x46c   : > { %v5194_v10 = vpop.eup %5193  ;;  %v3083_v11 = vadd.f32 %v6059_v12, %v3074_v8 }
 0x46d   : > { %v3090_v5 = vpack.c.bf16 %v5194_v10, %v5194_v10 }
 0x46e   : > { %5195 = vtanh.f32 %v3083_v11 }
 0x46f   : > { %v3101_v14 = vrot.slane %v3090_v5, 6 }
 0x471   : > { %v3102_v17 = vsel %vm5879_vm2, %v3100_v13, %v3101_v14  ;;  %v3103_v21 = vrot.slane %v3101_v14, 4 }
 0x472   : > { %3114 = vst [vmem:[#allocation3 + $0x8] sm:$0xf] %v3102_v17  ;;  %v6076_v4 = vld [vmem:[#allocation3] sm:$0xff]  }
 0x473   : > { %3122 = vst [vmem:[#allocation3 + $0x8] sm:$0xf] %v5612_v7  ;;  %3319 = vmatmul.bf16.vlgmr.msrb.gmra.mxu3 %v6076_v4  ;;  %v4997_v19 = vunpack.c.h.b16 %v6076_v4  ;;  %v3178_v22 = vshll.u32 %v6076_v4, 16  ;;  %v3176_v62 = vshrl.u32 %v6076_v4, 16 }
 0x474   : > { %v5196_v12 = vpop.eup %5195 }
 0x475   : > { %v3091_v15 = vpack.c.bf16 %v5196_v12, %v5196_v12  ;;  %v3347_v26 = vpack.c.b16 %v4997_v19, %v3346_v20  ;;  %v3180_v33 = vrot.slane %v3178_v22, 1  ;;  %v3549_v10 = vpack.c.b16 %v4997_v19, %v3548_v9 }
 0x477   : > { %v3104_v23 = vrot.slane %v3091_v15, 6  ;;  %v3442_v29 = vshrl.u32 %v3347_v26, 16  ;;  %v3445_v30 = vshll.u32 %v3347_v26, 16  ;;  %v3348_v39 = vrot.slane %v3347_v26, 1 }
 0x478   : > { %v3181_v42 = vor.u32 %v3180_v33, %v3176_v62  ;;  %v3550_v11 = vrot.slane %v3549_v10, 2 }
 0x479   : > { %v3105_v24 = vsel %vm5879_vm2, %v3103_v21, %v3104_v23  ;;  %v3106_v25 = vrot.slane %v3104_v23, 4  ;;  %v3444_v35 = vrot.slane %v3442_v29, 1  ;;  %v3447_v36 = vrot.slane %v3445_v30, 2 }
 0x47a   : > { %3115 = vst [vmem:[#allocation3 + $0xc] sm:$0xf] %v3105_v24 }
 0x47b   : > { %3123 = vst [vmem:[#allocation3 + $0xc] sm:$0x3] %v5612_v7  ;;  %v3448_v47 = vor.u32 %v3447_v36, %v3444_v35 }
 0x47c   : > { %3116 = vst [vmem:[#allocation3 + $0x10] sm:$0x3] %v3106_v25 }
 0x482   : > { %v4937_v38 = vld [vmem:[#allocation3 + $0x8] sm:$0xff] }
 0x483   : > { %v3420_v40 = vld [vmem:[#allocation3 + $0x10] sm:$0x3]  ;;  %3322 = vmatmul.bf16.gmra.mxu3 %v4937_v38  ;;  %v3349_v7 = vrot.slane %v4937_v38, 1  ;;  %v3183_v43 = vshll.u32 %v4937_v38, 16  ;;  %v3187_v45 = vshrl.u32 %v4937_v38, 16  ;;  %v3551_v5 = vrot.slane %v4937_v38, 2 }
 0x484   : > { %v3144_v46 = vld [vmem:[#allocation3 + $0x10] sm:$0x1]  ;;  %v3439_v32 = vunpack.c.l.b16 %v3420_v40 }
 0x485   : > { %v3350_v48 = vsel %vm1033_vm3, %v3348_v39, %v3349_v7  ;;  %v3185_v41 = vrot.slane %v3183_v43, 1  ;;  %v3450_v49 = vrot.slane %v3183_v43, 2  ;;  %v3449_v50 = vrot.slane %v3187_v45, 1 }
 0x486   : > { %3411 = vmatmul.bf16.vlgmr.msra.gmra.mxu0 %v3350_v48  ;;  %v3171_v51 = vunpack.c.l.b16 %v3144_v46  ;;  %v3440_v53 = vpack.c.b16 %v3439_v32, %v3439_v32  ;;  %v3552_v13 = vsel %vm1249_vm6, %v3550_v11, %v3551_v5 }
 0x487   : > { %v3186_v52 = vsel %vm853_vm4, %v3181_v42, %v3185_v41  ;;  %v3451_v34 = vor.u32 %v3450_v49, %v3449_v50  ;;  %v3189_v63 = vor.u32 %v3187_v45, %v3185_v41 }
 0x488   : > { %3253 = vmatmul.bf16.vlgmr.msrb.gmra.mxu2 %v3186_v52  ;;  %v3174_v54 = vpack.c.b16 %v3171_v51, %v3171_v51  ;;  %v3454_v56 = vshrl.u32 %v3440_v53, 16  ;;  %v3457_v57 = vshll.u32 %v3440_v53, 16  ;;  %v3553_v14 = vrot.slane %v3440_v53, 2 }
 0x489   : > { %v3452_v44 = vsel %vm1133_vm5, %v3448_v47, %v3451_v34 }
 0x48a   : > { %3520 = vmatmul.bf16.vlgmr.msra.gmra.mxu1 %v3452_v44  ;;  %v3351_v58 = vrot.slane %v3174_v54, 1  ;;  %v3191_v55 = vshll.u32 %v3174_v54, 16  ;;  %v3456_v59 = vrot.slane %v3454_v56, 1  ;;  %v3459_v60 = vrot.slane %v3457_v57, 2 }
 0x48b   : > { %v3554_v16 = vsel %vm1249_vm6, %v3551_v5, %v3553_v14 }
 0x48c   : > { %v3352_v61 = vsel %vm1033_vm3, %v3349_v7, %v3351_v58  ;;  %v3193_v1 = vrot.slane %v3191_v55, 1  ;;  %v3460_v2 = vor.u32 %v3459_v60, %v3456_v59 }
 0x48e   : > { %v3194_v3 = vsel %vm853_vm4, %v3189_v63, %v3193_v1  ;;  %v3461_v8 = vsel %vm1133_vm5, %v3451_v34, %v3460_v2 }
 0x493   : > { %3414 = vmatmul.bf16.vlgmr.msra.gmra.mxu3 %v3352_v61 }
 0x498   : > { %3256 = vmatmul.bf16.gmra.mxu2 %v3194_v3 }
 0x49a   : > { %3523 = vmatmul.bf16.gmra.mxu1 %v3461_v8 }
 0x4a8   : > { %3613 = vmatmul.bf16.vlgmr.msra.gmra.mxu2 %v3552_v13 }
 0x4b8   : > { %3616 = vmatmul.bf16.gmra.mxu2 %v3554_v16 }
 0x4b9   : > { %5494 = shalt.err (!%p5491_p13)
}
 0x4ba   : > { %5041 = dma.vmem_to_hbm [thread:$0]  (%p5802_p4), %s3650_s21, 128, %s3652_s24, %s3631_s3   ;;  %v3627_v37 = vld [vmem:[%s5875_s2] sm:$0xff] }
 0x4bb   : > { %s6218_s15 = sld [smem:[#allocation42_spill]]  ;;  %s3664_s24 = sshll.u32 %s5875_s2, 4  ;;  %s3665_s24 = int_to_ptr.vmem [resolvable:$true] %s3664_s24 }
 0x4bc   : > { %s6219_s14 = sld [smem:[#allocation44_spill]]  ;;  %s3636_s23 = scalar_lea.sflag [#allocation21], %s5832_s6 }
 0x4c1   : > { %v5164_v36 = vld [vmem:[%s6218_s15] ss:$0 sm:$0xff] }
 0x4c2   : > { %s3662_s21 = scalar_lea.hbm %s6219_s14, %s4760_s4  ;;  %s5515_s20 = scalar_lea.hbm %s6219_s14, 16 }
 0x4c3   : > { %s3666_s3 = sshll.u32 %s3662_s21, 4  ;;  %s3667_s3 = int_to_ptr.hbm [resolvable:$true] %s3666_s3 }
 0x4c4   : > { %s5509_s9 = sshra.s32 %s3667_s3, 4  ;;  %s5510_s9 = int_to_ptr.hbm [resolvable:$true] %s5509_s9 }
 0x4c5   : > { %s5511_s28 = scalar_lea.hbm %s5510_s9, 8  ;;  %p5516_p8 = scmp.lt.s32.totalorder %s5510_s9, %s6219_s14 }
 0x4c6   : > { %p5512_p0 = scmp.ne.s32.totalorder %s5510_s9, %s5511_s28  ;;  %p5517_p1 = scmp.lt.s32.totalorder %s5515_s20, %s5511_s28 }
 0x4c8   : > { %p5513_p2 = pnand %p5512_p0, %p5802_p4  ;;  %p5518_p3 = por %p5517_p1, %p5516_p8 }
 0x4ca   : > { %p5514_p5 = pneg %p5513_p2 }
 0x4cc   : > { %p5519_p9 = pnand %p5518_p3, %p5514_p5 }
 0x4f6   : > { %v3320_v17 = vpop.f32.mrf.mxu3 }
 0x4fe   : > { %v3321_v4 = vpop.f32.mrf.mxu3 }
 0x503   : > { %v3412_v18 = vpop.f32.mrf.mxu0 }
 0x506   : > { %v3323_v12 = vpop.f32.mrf.mxu3 }
 0x507   : > { %v3521_v0 = vpop.f32.mrf.mxu1 }
 0x50b   : > { %v3254_v15 = vpop.f32.mrf.mxu2  ;;  %v3413_v19 = vpop.f32.mrf.mxu0 }
 0x50e   : > { %v3324_v20 = vpop.f32.mrf.mxu3 }
 0x50f   : > { %v3522_v21 = vpop.f32.mrf.mxu1 }
 0x513   : > { %v3255_v23 = vpop.f32.mrf.mxu2 }
 0x516   : > { %v3415_v24 = vpop.f32.mrf.mxu3 }
 0x517   : > { %v3524_v25 = vpop.f32.mrf.mxu1 }
 0x51b   : > { %v3257_v26 = vpop.f32.mrf.mxu2 }
 0x51e   : > { %v3416_v31 = vpop.f32.mrf.mxu3 }
 0x51f   : > { %v3525_v33 = vpop.f32.mrf.mxu1 }
 0x523   : > { %v3258_v27 = vpop.f32.mrf.mxu2 }
 0x524   : > { %v3325_v29 = vadd.f32 %v3324_v20, %v3258_v27 }
 0x526   : > { %v3419_v62 = vadd.f32 %v3416_v31, %v3325_v29 }
 0x528   : > { %v3528_v35 = vadd.f32 %v3525_v33, %v3419_v62 }
 0x52b   : > { %v3614_v28 = vpop.f32.mrf.mxu2 }
 0x533   : > { %v3615_v22 = vpop.f32.mrf.mxu2 }
 0x53b   : > { %v3617_v30 = vpop.f32.mrf.mxu2 }
 0x543   : > { %v3618_v38 = vpop.f32.mrf.mxu2 }
 0x544   : > { %v3621_v39 = vadd.f32 %v3618_v38, %v3528_v35 }
 0x546   : > { %v3626_v40 = vadd.f32 %v5164_v36, %v3621_v39 }
 0x548   : > { %v3628_v7 = vadd.f32 %v3627_v37, %v3626_v40 }
 0x54a   : > { %3629 = vst [vmem:[%s5875_s2] sm:$0xff] %v3628_v7 }
 0x54b   : > { %5522 = shalt.err (!%p5519_p9)
}
 0x54c   : > { %5042 = dma.vmem_to_hbm [thread:$0]  (%p5802_p4), %s3665_s24, 128, %s3667_s3, %s3636_s23  }
 0x54d PF: > { %s3678_s6 = sand.u32 1, %s5581_s25   ;;  %p5075_p10 = pnand %p3883_p6, %p5810_p7 }
 0x54e   : > { %s3679_s2 = scalar_lea.sflag [#allocation6], %s3678_s6 }
 0x54f   : > { %p5076_p11 = pneg %p5075_p10 }
 0x551   : > { %5572 = dma.done.wait (%p5076_p11), %s3679_s2, 128  }
 0x552   : > { %5574 = vsyncadd (%p5076_p11), %s3679_s2, 4294967168  ;;  %s3689_s13 = scalar_lea.sflag [#allocation21], %s3678_s6 }
 0x553   : > { %5576 = dma.done.wait (%p5076_p11), %s3689_s13, 128  }
 0x554   : > { %5578 = vsyncadd (%p5076_p11), %s3689_s13, 4294967168  ;;  %s39_s30 = sadd.s32 1, %s5601_s30   ;;  %s6220_s12 = sld [smem:[#allocation30_spill]] }
 0x555   : > { %p36_p12 = scmp.ge.s32.totalorder %s39_s30, 4   ;;  %s6221_s27 = sld [smem:[#allocation33_spill]] }
 0x556   : > { %s6222_s16 = sld [smem:[#allocation32_spill]]  ;;  %s6223_s25 = smov %s5585_s26 }
 0x557   : > { %s6225_s28 = smov %s5597_s29 }
 0x558   :  { %38 = sbr.rel (!%p36_p12) target bundleno = 25 (0x19), region = 217 }
 0x55a   : > { %s6224_s26 = smov %s6220_s12 }
 0x55c   : > { %s6226_s29 = smov %s6222_s16 }
 0x55d   :  { %3695 = vsyncpa [#allocation5], 1 }
 0x55e   :  { %3697 = vsyncpa [#allocation5 + $0x1], 1 }
 0x55f   :  { %3698 = vsyncpa [#allocation8], 1 }
 0x560   :  { %3700 = vsyncpa [#allocation8 + $0x1], 1 }
 0x561   :  { %3701 = vsyncpa [#allocation11], 1 }
 0x562   :  { %3702 = vsyncpa [#allocation14], 1 }
 0x563   :  { %3703 = vsyncpa [#allocation17], 1 }
 0x564   :  { %3704 = vsyncpa [#allocation6], 1 }
 0x565   :  { %3706 = vsyncpa [#allocation6 + $0x1], 1 }
 0x566   :  { %3707 = vsyncpa [#allocation21], 1 }
 0x567   :  { %3709 = vsyncpa [#allocation21 + $0x1], 1 }

// kernel: tpu_custom_call.1
= control target key start
LH: loop header
LB: loop body
LE: loop exit
PB: predicated region body
PF: predicated region fallthrough
CT: control target
= control target key end

     0   :  { %s6161_s0 = inlined_call_operand.hbm [shape: bf16[2,8,128], index: 0, kind: input, shape index: {}]   ;;  %s6162_s1 = inlined_call_operand.hbm [shape: bf16[2,1,24,128], index: 1, kind: input, shape index: {}]   ;;  %s6163_s2 = inlined_call_operand.hbm [shape: bf16[128,128], index: 2, kind: input, shape index: {}]   ;;  %s6164_s3 = inlined_call_operand.hbm [shape: f32[1,128], index: 3, kind: input, shape index: {}]   ;;  %s6165_s4 = inlined_call_operand.hbm [shape: bf16[5,128,128], index: 4, kind: input, shape index: {}]   ;;  %s6166_s5 = inlined_call_operand.hbm [shape: f32[1,128], index: 5, kind: input, shape index: {}]   ;;  %s6167_s6 = inlined_call_operand.hbm [shape: f32[1,128], index: 6, kind: input, shape index: {}]   ;;  %s6168_s7 = inlined_call_operand.hbm [shape: bf16[3,5,128,128], index: 7, kind: input, shape index: {}]   ;;  %s6169_s8 = inlined_call_operand.vmem [shape: f32[3,1,128], index: 8, kind: input, shape index: {}]   ;;  %s6170_s9 = inlined_call_operand.vmem [shape: f32[3,1,128], index: 9, kind: input, shape index: {}]   ;;  %s6171_s10 = inlined_call_operand.hbm [shape: bf16[5,128,128], index: 10, kind: input, shape index: {}]   ;;  %s6172_s11 = inlined_call_operand.vmem [shape: f32[1,128], index: 11, kind: input, shape index: {}]   ;;  %s6173_s12 = inlined_call_operand.hbm [shape: f32[2,8,128], index: 12, kind: output, shape index: {0}]   ;;  %s6174_s13 = inlined_call_operand.hbm [shape: f32[2,8,128], index: 13, kind: output, shape index: {1}]  }
   0x1   :  { %6183 = sst [smem:[#allocation34_spill]] %s6163_s2 }
   0x2   :  { %6184 = sst [smem:[#allocation35_spill]] %s6164_s3 }
   0x3   :  { %6185 = sst [smem:[#allocation36_spill]] %s6165_s4 }
   0x4   :  { %6186 = sst [smem:[#allocation37_spill]] %s6166_s5 }
   0x5   :  { %6187 = sst [smem:[#allocation38_spill]] %s6167_s6 }
   0x6   :  { %6188 = sst [smem:[#allocation39_spill]] %s6168_s7 }
   0x7   :  { %6189 = sst [smem:[#allocation40_spill]] %s6170_s9 }
   0x8   :  { %6190 = sst [smem:[#allocation41_spill]] %s6171_s10 }
   0x9   :  { %6191 = sst [smem:[#allocation42_spill]] %s6172_s11 }
   0xa   :  { %6192 = sst [smem:[#allocation43_spill]] %s6173_s12 }
   0xb   :  { %6193 = sst [smem:[#allocation44_spill]] %s6174_s13 }
   0xc   :  { %19 = vsyncpa [#allocation5], 0 }
   0xd   :  { %21 = vsyncpa [#allocation5 + $0x1], 0 }
   0xe   :  { %22 = vsyncpa [#allocation8], 0 }
   0xf   :  { %24 = vsyncpa [#allocation8 + $0x1], 0 }
  0x10   :  { %25 = vsyncpa [#allocation11], 0 }
  0x11   :  { %26 = vsyncpa [#allocation14], 0 }
  0x12   :  { %27 = vsyncpa [#allocation17], 0 }
  0x13   :  { %28 = vsyncpa [#allocation6], 0 }
  0x14   :  { %30 = vsyncpa [#allocation6 + $0x1], 0 }
  0x15   :  { %31 = vsyncpa [#allocation21], 0 }
  0x16   :  { %33 = vsyncpa [#allocation21 + $0x1], 0  ;;  %s5683_s25 = smov 0   ;;  %s5685_s26 = smov 0  }
  0x17   :  { %s5687_s27 = smov 0   ;;  %s5689_s28 = smov 0  }
  0x18   :  { %s5691_s29 = smov 0   ;;  %s5693_s30 = smov 0  }
  0x19 LB: > { %6194 = sst [smem:[#allocation30_spill]] %s5589_s27  ;;  %s5714_s14 = sadd.s32 4294967295, %s5601_s30   ;;  %s5601_s30 = sphi %s5693_s30, %s39_s30   ;;  %s5597_s29 = sphi %s5691_s29, %s6226_s29   ;;  %s5593_s28 = sphi %s5689_s28, %s6225_s28   ;;  %s5589_s27 = sphi %s5687_s27, %s6221_s27   ;;  %s5585_s26 = sphi %s5685_s26, %s6224_s26   ;;  %s5581_s25 = sphi %s5683_s25, %s6223_s25  }
  0x1a   : > { %6195 = sst [smem:[#allocation31_spill]] %s5593_s28  ;;  %p3875_p0 = scmp.ge.s32.totalorder %s5601_s30, 1 }
  0x1b   : > { %p74_p1 = scmp.eq.s32.totalorder %s5714_s14, 0  ;;  %p378_p2 = scmp.lt.s32.totalorder %s5601_s30, 3 }
  0x1c   : > { %s6196_s2 = sld [smem:[#allocation34_spill]]  ;;  %s5603_s19 = smov [#allocation9]  }
  0x1d   : > { %p5722_p3 = pnand %p3875_p0, %p378_p2  ;;  %s391_s20 = sshll.u32 %s5603_s19, 4  ;;  %s392_s20 = int_to_ptr.vmem [resolvable:$true] %s391_s20 }
  0x1e   : > { %p3883_p6 = scmp.ge.s32.totalorder %s5601_s30, 2  ;;  %s6199_s3 = sld [smem:[#allocation35_spill]] }
  0x1f   : > { %p5045_p4 = pneg %p5722_p3  ;;  %s6179_s15 = smov 64  }
  0x20   : > { %s6180_s16 = smov 4   ;;  %s5606_s19 = smov [#allocation10]  }
  0x21   : > { %p5730_p5 = pnand %p5045_p4, %p74_p1  ;;  %s6200_s5 = sld [smem:[#allocation37_spill]] }
  0x22   : > { %s389_s17 = sshll.u32 %s6196_s2, 4  ;;  %s406_s2 = sshll.u32 %s5606_s19, 4  ;;  %s390_s17 = int_to_ptr.hbm [resolvable:$true] %s389_s17  ;;  %s407_s2 = int_to_ptr.vmem [resolvable:$true] %s406_s2 }
  0x23   : > { %5048 = dma.hbm_to_vmem [thread:$0]  (!%p5730_p5), %s390_s17, 1024, %s392_s20, [#allocation8], %s6179_s15, %s6179_s15, %s6180_s16  }
  0x24   : > { %s404_s24 = sshll.u32 %s6199_s3, 4  ;;  %s6201_s7 = sld [smem:[#allocation39_spill]]  ;;  %s405_s24 = int_to_ptr.hbm [resolvable:$true] %s404_s24 }
  0x25   : > { %5051 = dma.hbm_to_vmem [thread:$0]  (!%p5730_p5), %s405_s24, 16, %s407_s2, [#allocation11]  }
  0x26   : > { %s5607_s28 = smov [#allocation13]   ;;  %s5608_s17 = smov [#allocation16]  }
  0x27   : > { %s430_s12 = sshll.u32 %s6200_s5, 4  ;;  %s432_s9 = sshll.u32 %s5607_s28, 4  ;;  %s431_s12 = int_to_ptr.hbm [resolvable:$true] %s430_s12  ;;  %s433_s9 = int_to_ptr.vmem [resolvable:$true] %s432_s9 }
  0x28   : > { %5057 = dma.hbm_to_vmem [thread:$0]  (!%p5730_p5), %s431_s12, 16, %s433_s9, [#allocation14]  }
  0x29   : > { %s455_s20 = sshll.u32 %s5608_s17, 4  ;;  %s6202_s4 = sld [smem:[#allocation36_spill]]  ;;  %s456_s20 = int_to_ptr.vmem [resolvable:$true] %s455_s20 }
  0x2a   : > { %s453_s3 = sshll.u32 %s6201_s7, 4  ;;  %s6203_s6 = sld [smem:[#allocation38_spill]]  ;;  %s454_s3 = int_to_ptr.hbm [resolvable:$true] %s453_s3 }
  0x2b   : > { %5063 = dma.hbm_to_vmem [thread:$0]  (!%p5730_p5), %s454_s3, 15360, %s456_s20, [#allocation17], %s6179_s15, %s6179_s15, %s6180_s16  }
  0x2c   : > { %s5609_s9 = smov [#allocation12]   ;;  %s5610_s3 = smov [#allocation15]  }
  0x2d   : > { %s417_s12 = sshll.u32 %s5609_s9, 4  ;;  %s444_s22 = sshll.u32 %s5610_s3, 4  ;;  %s418_s12 = int_to_ptr.vmem [resolvable:$true] %s417_s12  ;;  %s445_s22 = int_to_ptr.vmem [resolvable:$true] %s444_s22 }
  0x2e   : > { %s6204_s10 = sld [smem:[#allocation41_spill]]  ;;  %s5611_s11 = smov [#allocation18]  }
  0x2f   : > { %s415_s19 = sshll.u32 %s6202_s4, 4  ;;  %s475_s13 = sshll.u32 %s5611_s11, 4  ;;  %s416_s19 = int_to_ptr.hbm [resolvable:$true] %s415_s19  ;;  %s476_s13 = int_to_ptr.vmem [resolvable:$true] %s475_s13 }
  0x30   : > { %s442_s24 = sshll.u32 %s6203_s6, 4  ;;  %s51_s2 = sadd.s32 1, %s5597_s29  ;;  %s443_s24 = int_to_ptr.hbm [resolvable:$true] %s442_s24 }
  0x31   : > { %5054 = dma.hbm_to_vmem [thread:$0]  (!%p5730_p5), %s416_s19, 5120, %s418_s12, [#allocation11], %s6179_s15, %s6179_s15, %s6180_s16  }
  0x32   : > { %5060 = dma.hbm_to_vmem [thread:$0]  (!%p5730_p5), %s443_s24, 16, %s445_s22, [#allocation14]  }
  0x33   : > { %s3874_s19 = sadd.s32 4294967294, %s5601_s30   ;;  %s60_s28 = sadd.s32 1, %s5589_s27 }
  0x34   : > { %s473_s20 = sshll.u32 %s6204_s10, 4  ;;  %p53_p7 = scmp.ge.s32.totalorder %s51_s2, 2  ;;  %s474_s20 = int_to_ptr.hbm [resolvable:$true] %s473_s20 }
  0x35   : > { %5066 = dma.hbm_to_vmem [thread:$0]  (!%p5730_p5), %s474_s20, 5120, %s476_s13, [#allocation17], %s6179_s15, %s6179_s15, %s6180_s16  }
  0x36   : > { %p67_p8 = scmp.ne.s32.totalorder %s5589_s27, %s5585_s26  ;;  %p68_p9 = scmp.eq.s32.totalorder %s5601_s30, 0 }
  0x37   : > { %p73_p10 = scmp.ne.s32.totalorder %s5585_s26, %s5581_s25  ;;  %s6228_s2 = smov (%p53_p7, %s51_s2), 0 }
  0x38   : > { %6205 = sst [smem:[#allocation32_spill]] %s6228_s2  ;;  %p5789_p11 = por %p68_p9, %p67_p8 }
  0x39   : > { %p5795_p12 = por %p74_p1, %p73_p10  ;;  %s55_s9 = ssub.s32 %s5597_s29, %s6228_s2 }
  0x3a   : > { %p337_p13 = scmp.eq.s32.totalorder %s5714_s14, 1  ;;  %p58_p0 = scmp.eq.s32.totalorder %s55_s9, 0 }
  0x3b   : > { %p343_p2 = scmp.eq.s32.totalorder %s3874_s19, 1  ;;  %p5088_p5 = scmp.lt.s32.totalorder %s5601_s30, 2 }
  0x3c   : > { %p5802_p4 = por %p337_p13, %p67_p8  ;;  %s492_s23 = sand.u32 1, %s5589_s27  }
  0x3d   : > { %s5808_s3 = scalar_select %p58_p0, %s5589_s27, %s60_s28  }
  0x3e   : > { %p5810_p7 = por %p343_p2, %p73_p10  ;;  %s3884_s17 = sshll.u32 %s492_s23, 2 }
  0x3f   : > { %6209 = sst [smem:[#allocation33_spill]] %s5808_s3  ;;  %s3885_s20 = sshll.u32 %s5597_s29, 2 }
  0x40   : > { %s501_s19 = scalar_lea.hbm %s6161_s0, %s3885_s20  ;;  %s496_s9 = scalar_lea.vmem [#allocation4], %s3884_s17 }
  0x41   : > { %s505_s15 = sshll.u32 %s496_s9, 4  ;;  %s503_s16 = sshll.u32 %s501_s19, 4  ;;  %s506_s15 = int_to_ptr.vmem [resolvable:$true] %s505_s15  ;;  %s504_s16 = int_to_ptr.hbm [resolvable:$true] %s503_s16 }
  0x42   : > { %p5068_p8 = pnand %p5088_p5, %p5789_p11  ;;  %s5006_s28 = smul.u32 12, %s492_s23 }
  0x43   : > { %s512_s4 = sand.u32 1, %s5601_s30   ;;  %s5007_s5 = smul.u32 12, %s5597_s29 }
  0x44   : > { %s493_s6 = scalar_lea.sflag [#allocation5], %s492_s23  ;;  %s516_s7 = scalar_lea.vmem [#allocation7], %s5006_s28 }
  0x45   : > { %5070 = dma.hbm_to_vmem [thread:$0]  (!%p5068_p8), %s504_s16, 64, %s506_s15, %s493_s6  }
  0x46   : > { %s526_s10 = sshll.u32 %s516_s7, 4  ;;  %s523_s27 = scalar_lea.hbm %s6162_s1, %s5007_s5  ;;  %s527_s10 = int_to_ptr.vmem [resolvable:$true] %s526_s10 }
  0x47   : > { %s524_s20 = sshll.u32 %s523_s27, 4  ;;  %s513_s17 = scalar_lea.sflag [#allocation8], %s512_s4  ;;  %s525_s20 = int_to_ptr.hbm [resolvable:$true] %s524_s20 }
  0x48   : > { %s6211_s11 = smov 4   ;;  %s6212_s13 = smov 64  }
  0x49   : > { %5073 = dma.hbm_to_vmem [thread:$0]  (!%p5068_p8), %s525_s20, 192, %s527_s10, %s513_s17, %s6212_s13, %s6212_s13, %s6211_s11  }
  0x4a   : > { %538 = sbr.rel (%p5722_p3) target bundleno = 1357 (0x54d), region = 68  ;;  %s5832_s6 = sand.u32 (!%p5722_p3), 1, %s5585_s26  }
  0x4b   : > { %s3888_s7 = sshll.u32 (!%p5722_p3), %s5832_s6, 2  ;;  %s541_s15 = scalar_lea.sflag (!%p5722_p3), [#allocation5], %s5832_s6 }
  0x4c   : > { %s5836_s5 = scalar_lea.vmem (!%p5722_p3), [#allocation4], %s3888_s7 }
  0x4f   : > { %5548 = dma.done.wait (%p5795_p12), %s541_s15, 64  }
  0x50   : > { %5550 = vsyncadd (%p5795_p12), %s541_s15, 4294967232  ;;  %s550_s4 = sand.u32 1, %s5714_s14   ;;  %s5008_s10 = smul.u32 12, %s5832_s6 }
  0x51   : > { %s551_s27 = scalar_lea.sflag [#allocation8], %s550_s4 }
  0x52   : > { %s5844_s18 = scalar_lea.vmem [#allocation7], %s5008_s10 }
  0x53   : > { %5552 = dma.done.wait (%p5795_p12), %s551_s27, 192  }
  0x54   : > { %5554 = vsyncadd (%p5795_p12), %s551_s27, 4294967104 }
  0x55   : > { %5556 = dma.done.wait (%p74_p1), [#allocation8], 1024  }
  0x56   : > { %5558 = vsyncadd (%p74_p1), [#allocation8], 4294966272 }
  0x57   : > { %5560 = dma.done.wait (%p74_p1), [#allocation11], 5136  }
  0x58   : > { %5562 = vsyncadd (%p74_p1), [#allocation11], 4294962160 }
  0x59   : > { %5564 = dma.done.wait (%p74_p1), [#allocation14], 32  }
  0x5a   : > { %5566 = vsyncadd (%p74_p1), [#allocation14], 4294967264 }
  0x5b   : > { %5568 = dma.done.wait (%p74_p1), [#allocation17], 20480  }
  0x5c   : > { %5570 = vsyncadd (%p74_p1), [#allocation17], 4294946816  ;;  %v4771_v0 = vld [vmem:[#allocation9 + $0x38] sm:$0xff]  ;;  %v4770_v1 = vld [vmem:[#allocation9 + $0x30] sm:$0xff]  ;;  %v5612_v7 = vmov 0   ;;  %s3896_s14 = sshll.u32 %s5832_s6, 3 }
  0x5d   : > { %742 = vmatpush.bf16.msra.mxu1 %v4771_v0  ;;  %716 = vmatpush.bf16.msra.mxu0 %v4771_v0  ;;  %v4769_v2 = vld [vmem:[#allocation9 + $0x28] sm:$0xff]  ;;  %v4768_v3 = vld [vmem:[#allocation9 + $0x20] sm:$0xff]  ;;  %v4767_v4 = vld [vmem:[#allocation9 + $0x18] sm:$0xff]  ;;  %645 = vst [vmem:[#allocation2] sm:$0x3] %v5612_v7  ;;  %s5872_s16 = scalar_lea.vmem [#allocation19], %s3896_s14 }
  0x5e   : > { %v4781_v5 = vld [vmem:[#allocation12 + $0x38] sm:$0xff]  ;;  %v4766_v6 = vld [vmem:[#allocation9 + $0x10] sm:$0xff]  ;;  %646 = vst [vmem:[#allocation3] sm:$0x3] %v5612_v7  ;;  %v4765_v9 = vld [vmem:[#allocation9 + $0x8] sm:$0xff]  ;;  %s5875_s2 = scalar_lea.vmem [#allocation20], %s3896_s14 }
  0x5f   : > { %993 = vmatpush.bf16.msra.mxu3 %v4781_v5  ;;  %v4780_v8 = vld [vmem:[#allocation12 + $0x30] sm:$0xff]  ;;  %v4764_v10 = vld [vmem:[#allocation9] sm:$0xff]  ;;  %v4779_v16 = vld [vmem:[#allocation12 + $0x28] sm:$0xff]  ;;  %vm768_vm0 = vcmask 1041408   ;;  %vm769_vm1 = vcmask 1045508   ;;  %vm1033_vm3 = vcmask 1046528  }
  0x60   : > { %v4772_v11 = vld [vmem:[%s5844_s18] sm:$0xff]  ;;  %v647_v12 = vld [vmem:[%s5836_s5] sm:$0xf]  ;;  %v731_v13 = vld [vmem:[%s5844_s18 + $0x8] sm:$0xf]  ;;  %vm1249_vm6 = vcmask 1045504  }
  0x61   : > { %743 = vmatpush.bf16.msra.mxu1 %v4770_v1  ;;  %717 = vmatpush.bf16.msra.mxu0 %v4770_v1  ;;  %v737_v14 = vunpack.c.l.b16 %v731_v13  ;;  %v4778_v17 = vld [vmem:[#allocation12 + $0x20] sm:$0xff]  ;;  %v4797_v18 = vld [vmem:[#allocation12 + $0xb8] sm:$0xff]  ;;  %v4796_v21 = vld [vmem:[#allocation12 + $0xb0] sm:$0xff]  ;;  %vm853_vm4 = vsmask.f32 7424  ;;  %s6215_s19 = sld [smem:[#allocation40_spill]] }
  0x62   : > { %v4789_v19 = vld [vmem:[#allocation12 + $0x78] sm:$0xff]  ;;  %v4788_v23 = vld [vmem:[#allocation12 + $0x70] sm:$0xff]  ;;  %v4795_v25 = vld [vmem:[#allocation12 + $0xa8] sm:$0xff]  ;;  %vm1133_vm5 = vsmask.f32 6400  ;;  %s6216_s5 = sld [smem:[#allocation31_spill]] }
  0x63   : > { %994 = vmatpush.bf16.msra.mxu3 %v4780_v8  ;;  %v739_v15 = vpack.c.b16 %v737_v14, %v737_v14  ;;  %v4777_v20 = vld [vmem:[#allocation12 + $0x18] sm:$0xff]  ;;  %924 = vmatpush.bf16.msra.mxu2 %v4789_v19  ;;  %v4776_v24 = vld [vmem:[#allocation12 + $0x10] sm:$0xff]  ;;  %v4787_v27 = vld [vmem:[#allocation12 + $0x68] sm:$0xff]  ;;  %s6217_s18 = sld [smem:[#allocation43_spill]]  ;;  %s3649_s21 = sshll.u32 %s5872_s16, 4  ;;  %s3650_s21 = int_to_ptr.vmem [resolvable:$true] %s3649_s21 }
  0x64   : > { %v4805_v22 = vld [vmem:[#allocation12 + $0xf8] sm:$0xff]  ;;  %v4804_v26 = vld [vmem:[#allocation12 + $0xf0] sm:$0xff]  ;;  %v4775_v28 = vld [vmem:[#allocation12 + $0x8] sm:$0xff]  ;;  %s3631_s3 = scalar_lea.sflag [#allocation6], %s5832_s6 }
  0x65   : > { %744 = vmatpush.bf16.msra.mxu1 %v4769_v2  ;;  %718 = vmatpush.bf16.msra.mxu0 %v4769_v2  ;;  %v4794_v29 = vld [vmem:[#allocation12 + $0xa0] sm:$0xff]  ;;  %v4803_v30 = vld [vmem:[#allocation12 + $0xe8] sm:$0xff]  ;;  %v4793_v33 = vld [vmem:[#allocation12 + $0x98] sm:$0xff] }
  0x66   : > { %v4786_v31 = vld [vmem:[#allocation12 + $0x60] sm:$0xff]  ;;  %v4785_v35 = vld [vmem:[#allocation12 + $0x58] sm:$0xff]  ;;  %v4792_v36 = vld [vmem:[#allocation12 + $0x90] sm:$0xff] }
  0x67   : > { %995 = vmatpush.bf16.msra.mxu3 %v4779_v16  ;;  %925 = vmatpush.bf16.msra.mxu2 %v4788_v23  ;;  %v4774_v32 = vld [vmem:[#allocation12] sm:$0xff]  ;;  %v4801_v37 = vld [vmem:[#allocation12 + $0xd8] sm:$0xff]  ;;  %v4784_v38 = vld [vmem:[#allocation12 + $0x50] sm:$0xff] }
  0x68   : > { %v4802_v34 = vld [vmem:[#allocation12 + $0xe0] sm:$0xff]  ;;  %v4791_v39 = vld [vmem:[#allocation12 + $0x88] sm:$0xff]  ;;  %v4800_v40 = vld [vmem:[#allocation12 + $0xd0] sm:$0xff]  ;;  %s4760_s4 = sshll.u32 %s6216_s5, 3 }
  0x69   : > { %745 = vmatpush.bf16.msra.mxu1 %v4768_v3  ;;  %719 = vmatpush.bf16.msra.mxu0 %v4768_v3  ;;  %v5155_v41 = vld [vmem:[#allocation10] ss:$0 sm:$0xff]  ;;  %v4783_v42 = vld [vmem:[#allocation12 + $0x48] sm:$0xff]  ;;  %v4790_v45 = vld [vmem:[#allocation12 + $0x80] sm:$0xff]  ;;  %s3647_s14 = scalar_lea.hbm %s6217_s18, %s4760_s4  ;;  %s5487_s17 = scalar_lea.hbm %s6217_s18, 16 }
  0x6a   : > { %v4799_v46 = vld [vmem:[#allocation12 + $0xc8] sm:$0xff]  ;;  %v4782_v49 = vld [vmem:[#allocation12 + $0x40] sm:$0xff]  ;;  %v4813_v58 = vld [vmem:[#allocation12 + $0x138] sm:$0xff]  ;;  %s3651_s24 = sshll.u32 %s3647_s14, 4  ;;  %s3652_s24 = int_to_ptr.hbm [resolvable:$true] %s3651_s24 }
  0x6b   : > { %996 = vmatpush.bf16.msra.mxu3 %v4778_v17  ;;  %926 = vmatpush.bf16.msra.mxu2 %v4787_v27  ;;  %v4798_v54 = vld [vmem:[#allocation12 + $0xc0] sm:$0xff]  ;;  %v4812_v61 = vld [vmem:[#allocation12 + $0x130] sm:$0xff]  ;;  %vm5879_vm2 = vmor %vm768_vm0, %vm769_vm1  ;;  %s5481_s23 = sshra.s32 %s3652_s24, 4  ;;  %s5482_s23 = int_to_ptr.hbm [resolvable:$true] %s5481_s23 }
  0x6c   : > { %v4811_v1 = vld [vmem:[#allocation12 + $0x128] sm:$0xff]  ;;  %v4810_v5 = vld [vmem:[#allocation12 + $0x120] sm:$0xff]  ;;  %v4809_v17 = vld [vmem:[#allocation12 + $0x118] sm:$0xff]  ;;  %s5483_s9 = scalar_lea.hbm %s5482_s23, 8  ;;  %p5488_p10 = scmp.lt.s32.totalorder %s5482_s23, %s6217_s18 }
  0x6d   : > { %746 = vmatpush.bf16.msra.mxu1 %v4767_v4  ;;  %720 = vmatpush.bf16.msra.mxu0 %v4767_v4  ;;  %v4808_v19 = vld [vmem:[#allocation12 + $0x110] sm:$0xff]  ;;  %v4807_v23 = vld [vmem:[#allocation12 + $0x108] sm:$0xff]  ;;  %p5484_p1 = scmp.ne.s32.totalorder %s5482_s23, %s5483_s9  ;;  %p5489_p11 = scmp.lt.s32.totalorder %s5487_s17, %s5483_s9 }
  0x6f   : > { %997 = vmatpush.bf16.msra.mxu3 %v4777_v20  ;;  %927 = vmatpush.bf16.msra.mxu2 %v4786_v31  ;;  %v4806_v31 = vld [vmem:[#allocation12 + $0x100] sm:$0xff]  ;;  %p5485_p3 = pnand %p5484_p1, %p5802_p4  ;;  %p5490_p12 = por %p5489_p11, %p5488_p10 }
  0x71   : > { %747 = vmatpush.bf16.msra.mxu1 %v4766_v6  ;;  %721 = vmatpush.bf16.msra.mxu0 %v4766_v6  ;;  %p5486_p9 = pneg %p5485_p3 }
  0x73   : > { %998 = vmatpush.bf16.msra.mxu3 %v4776_v24  ;;  %928 = vmatpush.bf16.msra.mxu2 %v4785_v35  ;;  %p5491_p13 = pnand %p5490_p12, %p5486_p9 }
  0x75   : > { %748 = vmatpush.bf16.msra.mxu1 %v4765_v9  ;;  %722 = vmatpush.bf16.msra.mxu0 %v4765_v9 }
  0x77   : > { %999 = vmatpush.bf16.msra.mxu3 %v4775_v28  ;;  %929 = vmatpush.bf16.msra.mxu2 %v4784_v38 }
  0x79   : > { %749 = vmatpush.bf16.msra.mxu1 %v4764_v10  ;;  %723 = vmatpush.bf16.msra.mxu0 %v4764_v10 }
  0x7b   : > { %1000 = vmatpush.bf16.msra.mxu3 %v4774_v32  ;;  %930 = vmatpush.bf16.msra.mxu2 %v4783_v42 }
  0x7c   : > { %750 = vmatmul.bf16.vlgmr.msra.gmra.mxu1 %v4772_v11  ;;  %724 = vmatmul.bf16.vlgmr.msra.gmra.mxu0 %v647_v12 }
  0x7d   : > { %1089 = vmatpush.bf16.msrb.mxu0 %v4797_v18  ;;  %1205 = vmatpush.bf16.msrb.mxu1 %v4805_v22 }
  0x7f   : > { %931 = vmatpush.bf16.msra.mxu2 %v4782_v49 }
  0x81   : > { %1090 = vmatpush.bf16.msrb.mxu0 %v4796_v21  ;;  %1206 = vmatpush.bf16.msrb.mxu1 %v4804_v26 }
  0x83   : > { %1305 = vmatpush.bf16.msrb.mxu2 %v4813_v58 }
  0x85   : > { %1091 = vmatpush.bf16.msrb.mxu0 %v4795_v25  ;;  %1207 = vmatpush.bf16.msrb.mxu1 %v4803_v30 }
  0x87   : > { %1306 = vmatpush.bf16.msrb.mxu2 %v4812_v61 }
  0x89   : > { %1092 = vmatpush.bf16.msrb.mxu0 %v4794_v29  ;;  %1208 = vmatpush.bf16.msrb.mxu1 %v4802_v34 }
  0x8b   : > { %1307 = vmatpush.bf16.msrb.mxu2 %v4811_v1 }
  0x8c   : > { %755 = vmatmul.bf16.gmra.mxu1 %v739_v15 }
  0x8d   : > { %1093 = vmatpush.bf16.msrb.mxu0 %v4793_v33  ;;  %1209 = vmatpush.bf16.msrb.mxu1 %v4801_v37 }
  0x8f   : > { %1308 = vmatpush.bf16.msrb.mxu2 %v4810_v5 }
  0x91   : > { %1094 = vmatpush.bf16.msrb.mxu0 %v4792_v36  ;;  %1210 = vmatpush.bf16.msrb.mxu1 %v4800_v40 }
  0x93   : > { %1309 = vmatpush.bf16.msrb.mxu2 %v4809_v17 }
  0x95   : > { %1095 = vmatpush.bf16.msrb.mxu0 %v4791_v39  ;;  %1211 = vmatpush.bf16.msrb.mxu1 %v4799_v46 }
  0x97   : > { %1310 = vmatpush.bf16.msrb.mxu2 %v4808_v19 }
  0x99   : > { %1096 = vmatpush.bf16.msrb.mxu0 %v4790_v45  ;;  %1212 = vmatpush.bf16.msrb.mxu1 %v4798_v54 }
  0x9b   : > { %1311 = vmatpush.bf16.msrb.mxu2 %v4807_v23  ;;  %v4830_v23 = vld [vmem:[#allocation16 + $0x78] sm:$0xff] }
  0x9c   : > { %1505 = vmatpush.bf16.msrb.mxu3 %v4830_v23 }
  0x9f   : > { %1312 = vmatpush.bf16.msrb.mxu2 %v4806_v31 }
  0xf9   : > { %v751_v43 = vpop.f32.mrf.mxu1  ;;  %v725_v44 = vpop.f32.mrf.mxu0 }
  0xfa   : > { %v752_v47 = vadd.f32 %v5155_v41, %v751_v43  ;;  %v726_v48 = vadd.f32 %v5155_v41, %v725_v44 }
  0xfc   : > { %v762_v50 = vpack.c.bf16 %v752_v47, %v752_v47  ;;  %760 = vst [vmem:[%s5872_s16] sm:$0xff] %v726_v48  ;;  %v787_v51 = vpack.c.bf16 %v726_v48, %v726_v48 }
  0xfd   : > { %761 = vst [vmem:[%s5875_s2] sm:$0xff] %v726_v48 }
  0xfe   : > { %v771_v52 = vrot.slane %v762_v50, 6  ;;  %v789_v53 = vrot.slane %v787_v51, 6 }
 0x100   : > { %783 = vst [vmem:[#allocation2] sm:$0xc] %v771_v52  ;;  %v790_v55 = vrot.slane %v789_v53, 4  ;;  %v772_v63 = vrot.slane %v771_v52, 4 }
 0x101   : > { %798 = vst [vmem:[#allocation2] sm:$0xc] %v5612_v7  ;;  %v753_v56 = vpop.f32.mrf.mxu1  ;;  %v727_v57 = vpop.f32.mrf.mxu0 }
 0x102   : > { %v754_v59 = vadd.f32 %v5155_v41, %v753_v56  ;;  %793 = vst [vmem:[#allocation2 + $0xc] sm:$0xc] %v789_v53 }
 0x103   : > { %794 = vst [vmem:[#allocation2 + $0x10] sm:$0x3] %v790_v55 }
 0x104   : > { %v763_v60 = vpack.c.bf16 %v754_v59, %v754_v59 }
 0x106   : > { %v773_v0 = vrot.slane %v763_v60, 6 }
 0x108   : > { %v774_v2 = vsel %vm5879_vm2, %v772_v63, %v773_v0  ;;  %v1012_v8 = vld [vmem:[#allocation2] sm:$0xe]  ;;  %v775_v9 = vrot.slane %v773_v0, 4 }
 0x109   : > { %784 = vst [vmem:[#allocation2 + $0x4] sm:$0xf] %v774_v2  ;;  %v756_v3 = vpop.f32.mrf.mxu1  ;;  %v1031_v13 = vunpack.c.l.b16 %v1012_v8  ;;  %v1228_v60 = vld [vmem:[#allocation2] sm:$0xc]  ;;  %v4822_v8 = vld [vmem:[#allocation16 + $0x38] sm:$0xff] }
 0x10a   : > { %799 = vst [vmem:[#allocation2 + $0x4] sm:$0xf] %v5612_v7  ;;  %v757_v4 = vadd.f32 %v5155_v41, %v756_v3  ;;  %v1112_v30 = vld [vmem:[#allocation2 + $0x10] sm:$0x3]  ;;  %v1247_v63 = vunpack.c.l.b16 %v1228_v60  ;;  %1574 = vmatpush.bf16.msra.mxu0 %v4822_v8  ;;  %v4842_v60 = vld [vmem:[#allocation16 + $0xd8] sm:$0xff] }
 0x10b   : > { %v1131_v37 = vunpack.c.l.b16 %v1112_v30  ;;  %v822_v42 = vld [vmem:[#allocation2 + $0x10] sm:$0x1] }
 0x10c   : > { %v764_v6 = vpack.c.bf16 %v757_v4, %v757_v4  ;;  %v849_v46 = vunpack.c.l.b16 %v822_v42 }
 0x10d   : > { %v1132_v47 = vpack.c.b16 %v1131_v37, %v1131_v37  ;;  %v5912_v37 = vld [vmem:[#allocation15] ss:$0 sm:$0xff] }
 0x10e   : > { %v776_v10 = vrot.slane %v764_v6, 6  ;;  %v852_v48 = vpack.c.b16 %v849_v46, %v849_v46 }
 0x10f   : > { %v1147_v49 = vshrl.u32 %v1132_v47, 16  ;;  %v1150_v50 = vshll.u32 %v1132_v47, 16  ;;  %v1253_v4 = vrot.slane %v1132_v47, 2  ;;  %v4827_v47 = vld [vmem:[#allocation16 + $0x60] sm:$0xff] }
 0x110   : > { %v777_v11 = vsel %vm5879_vm2, %v775_v9, %v776_v10  ;;  %v778_v12 = vrot.slane %v776_v10, 4  ;;  %v870_v51 = vshll.u32 %v852_v48, 16  ;;  %v1037_v52 = vrot.slane %v852_v48, 1  ;;  %v4821_v10 = vld [vmem:[#allocation16 + $0x30] sm:$0xff] }
 0x111   : > { %785 = vst [vmem:[#allocation2 + $0x8] sm:$0xf] %v777_v11  ;;  %v758_v14 = vpop.f32.mrf.mxu1  ;;  %v5888_v15 = vld [vmem:[#allocation2] sm:$0xff]   ;;  %v1149_v53 = vrot.slane %v1147_v49, 1  ;;  %v1152_v54 = vrot.slane %v1150_v50, 2  ;;  %1575 = vmatpush.bf16.msra.mxu0 %v4821_v10  ;;  %v4820_v11 = vld [vmem:[#allocation16 + $0x28] sm:$0xff] }
 0x112   : > { %786 = vst [vmem:[#allocation2 + $0xc] sm:$0x3] %v778_v12  ;;  %v4981_v16 = vunpack.c.h.b16 %v5888_v15  ;;  %1001 = vmatmul.bf16.vlgmr.msra.gmra.mxu3 %v5888_v15  ;;  %v857_v20 = vshll.u32 %v5888_v15, 16  ;;  %v855_v24 = vshrl.u32 %v5888_v15, 16  ;;  %v872_v56 = vrot.slane %v870_v51, 1  ;;  %v4819_v14 = vld [vmem:[#allocation16 + $0x20] sm:$0xff] }
 0x113   : > { %800 = vst [vmem:[#allocation2 + $0x8] sm:$0xf] %v5612_v7  ;;  %v1153_v58 = vor.u32 %v1152_v54, %v1149_v53  ;;  %v4843_v53 = vld [vmem:[#allocation16 + $0xe0] sm:$0xff]  ;;  %v4824_v10 = vld [vmem:[#allocation16 + $0x48] sm:$0xff] }
 0x114   : > { %801 = vst [vmem:[#allocation2 + $0xc] sm:$0x3] %v5612_v7  ;;  %v1032_v18 = vpack.c.b16 %v4981_v16, %v1031_v13  ;;  %v859_v25 = vrot.slane %v857_v20, 1  ;;  %v1248_v0 = vpack.c.b16 %v4981_v16, %v1247_v63  ;;  %v4818_v16 = vld [vmem:[#allocation16 + $0x18] sm:$0xff] }
 0x115   : > { %1576 = vmatpush.bf16.msra.mxu0 %v4820_v11  ;;  %v4838_v20 = vld [vmem:[#allocation16 + $0xb8] sm:$0xff] }
 0x116   : > { %v1135_v21 = vshrl.u32 %v1032_v18, 16  ;;  %v1138_v22 = vshll.u32 %v1032_v18, 16  ;;  %v1034_v29 = vrot.slane %v1032_v18, 1  ;;  %v860_v33 = vor.u32 %v859_v25, %v855_v24  ;;  %1669 = vmatpush.bf16.msra.mxu1 %v4838_v20  ;;  %v4837_v25 = vld [vmem:[#allocation16 + $0xb0] sm:$0xff] }
 0x117   : > { %v1250_v1 = vrot.slane %v1248_v0, 2  ;;  %v4825_v0 = vld [vmem:[#allocation16 + $0x50] sm:$0xff] }
 0x118   : > { %v1137_v26 = vrot.slane %v1135_v21, 1  ;;  %v1140_v27 = vrot.slane %v1138_v22, 2  ;;  %v4817_v21 = vld [vmem:[#allocation16 + $0x10] sm:$0xff] }
 0x119   : > { %1577 = vmatpush.bf16.msra.mxu0 %v4819_v14 }
 0x11a   : > { %v1141_v36 = vor.u32 %v1140_v27, %v1137_v26  ;;  %v4846_v26 = vld [vmem:[#allocation16 + $0xf8] sm:$0xff]  ;;  %v4816_v27 = vld [vmem:[#allocation16 + $0x8] sm:$0xff]  ;;  %1670 = vmatpush.bf16.msra.mxu1 %v4837_v25 }
 0x11b   : > { %v4773_v28 = vld [vmem:[#allocation2 + $0x8] sm:$0xff] }
 0x11c   : > { %v1035_v32 = vrot.slane %v4773_v28, 1  ;;  %v862_v34 = vshll.u32 %v4773_v28, 16  ;;  %v866_v35 = vshrl.u32 %v4773_v28, 16  ;;  %v1251_v2 = vrot.slane %v4773_v28, 2 }
 0x11d   : > { %1578 = vmatpush.bf16.msra.mxu0 %v4818_v16  ;;  %v4840_v16 = vld [vmem:[#allocation16 + $0xc8] sm:$0xff] }
 0x11e   : > { %v1036_v38 = vsel %vm1033_vm3, %v1034_v29, %v1035_v32  ;;  %v864_v39 = vrot.slane %v862_v34, 1  ;;  %v1142_v40 = vrot.slane %v866_v35, 1  ;;  %v1143_v41 = vrot.slane %v862_v34, 2  ;;  %v4829_v29 = vld [vmem:[#allocation16 + $0x70] sm:$0xff]  ;;  %v4836_v34 = vld [vmem:[#allocation16 + $0xa8] sm:$0xff] }
 0x11f   : > { %1097 = vmatmul.bf16.vlgmr.msrb.gmra.mxu0 %v1036_v38  ;;  %v1038_v57 = vsel %vm1033_vm3, %v1035_v32, %v1037_v52  ;;  %v1252_v3 = vsel %vm1249_vm6, %v1250_v1, %v1251_v2  ;;  %v1254_v5 = vsel %vm1249_vm6, %v1251_v2, %v1253_v4  ;;  %v5910_v32 = vld [vmem:[#allocation13] ss:$0 sm:$0xff]  ;;  %1506 = vmatpush.bf16.msrb.mxu3 %v4829_v29  ;;  %v4815_v38 = vld [vmem:[#allocation16] sm:$0xff]  ;;  %v4841_v4 = vld [vmem:[#allocation16 + $0xd0] sm:$0xff] }
 0x120   : > { %v865_v43 = vsel %vm853_vm4, %v860_v33, %v864_v39  ;;  %v1144_v44 = vor.u32 %v1143_v41, %v1142_v40  ;;  %v868_v55 = vor.u32 %v866_v35, %v864_v39  ;;  %v4845_v35 = vld [vmem:[#allocation16 + $0xf0] sm:$0xff]  ;;  %1671 = vmatpush.bf16.msra.mxu1 %v4836_v34  ;;  %v4828_v40 = vld [vmem:[#allocation16 + $0x68] sm:$0xff]  ;;  %v4834_v52 = vld [vmem:[#allocation16 + $0x98] sm:$0xff] }
 0x121   : > { %932 = vmatmul.bf16.vlgmr.msra.gmra.mxu2 %v865_v43  ;;  %1579 = vmatpush.bf16.msra.mxu0 %v4817_v21  ;;  %v4823_v21 = vld [vmem:[#allocation16 + $0x40] sm:$0xff]  ;;  %v4854_v29 = vld [vmem:[#allocation16 + $0x138] sm:$0xff]  ;;  %v4853_v34 = vld [vmem:[#allocation16 + $0x130] sm:$0xff] }
 0x122   : > { %1006 = vmatmul.bf16.gmra.mxu3 %v4773_v28  ;;  %v1145_v45 = vsel %vm1133_vm5, %v1141_v36, %v1144_v44  ;;  %v873_v59 = vsel %vm853_vm4, %v868_v55, %v872_v56  ;;  %v1154_v61 = vsel %vm1133_vm5, %v1144_v44, %v1153_v58  ;;  %1784 = vmatpush.bf16.msra.mxu2 %v4846_v26  ;;  %v4835_v44 = vld [vmem:[#allocation16 + $0xa0] sm:$0xff]  ;;  %v4826_v55 = vld [vmem:[#allocation16 + $0x58] sm:$0xff] }
 0x123   : > { %1213 = vmatmul.bf16.vlgmr.msrb.gmra.mxu1 %v1145_v45  ;;  %1507 = vmatpush.bf16.msrb.mxu3 %v4828_v40  ;;  %v4844_v45 = vld [vmem:[#allocation16 + $0xe8] sm:$0xff]  ;;  %v4839_v26 = vld [vmem:[#allocation16 + $0xc0] sm:$0xff] }
 0x124   : > { %1672 = vmatpush.bf16.msra.mxu1 %v4835_v44 }
 0x125   : > { %1580 = vmatpush.bf16.msra.mxu0 %v4816_v27 }
 0x126   : > { %1785 = vmatpush.bf16.msra.mxu2 %v4845_v35 }
 0x127   : > { %1508 = vmatpush.bf16.msrb.mxu3 %v4827_v47 }
 0x128   : > { %1673 = vmatpush.bf16.msra.mxu1 %v4834_v52  ;;  %v4849_v52 = vld [vmem:[#allocation16 + $0x110] sm:$0xff] }
 0x129   : > { %1581 = vmatpush.bf16.msra.mxu0 %v4815_v38 }
 0x12a   : > { %1786 = vmatpush.bf16.msra.mxu2 %v4844_v45 }
 0x12b   : > { %1509 = vmatpush.bf16.msrb.mxu3 %v4826_v55 }
 0x12e   : > { %1787 = vmatpush.bf16.msra.mxu2 %v4843_v53 }
 0x12f   : > { %1102 = vmatmul.bf16.gmra.mxu0 %v1038_v57  ;;  %1510 = vmatpush.bf16.msrb.mxu3 %v4825_v0 }
 0x131   : > { %937 = vmatmul.bf16.gmra.mxu2 %v873_v59  ;;  %v4833_v59 = vld [vmem:[#allocation16 + $0x90] sm:$0xff] }
 0x132   : > { %1674 = vmatpush.bf16.msra.mxu1 %v4833_v59  ;;  %1788 = vmatpush.bf16.msra.mxu2 %v4842_v60 }
 0x133   : > { %1218 = vmatmul.bf16.gmra.mxu1 %v1154_v61  ;;  %1511 = vmatpush.bf16.msrb.mxu3 %v4824_v10 }
 0x136   : > { %1789 = vmatpush.bf16.msra.mxu2 %v4841_v4 }
 0x137   : > { %1512 = vmatpush.bf16.msrb.mxu3 %v4823_v21 }
 0x13a   : > { %1790 = vmatpush.bf16.msra.mxu2 %v4840_v16 }
 0x13b   : > { %1883 = vmatpush.bf16.msra.mxu3 %v4854_v29 }
 0x13e   : > { %1791 = vmatpush.bf16.msra.mxu2 %v4839_v26 }
 0x13f   : > { %1884 = vmatpush.bf16.msra.mxu3 %v4853_v34 }
 0x141   : > { %1313 = vmatmul.bf16.vlgmr.msrb.gmra.mxu2 %v1252_v3  ;;  %v4832_v3 = vld [vmem:[#allocation16 + $0x88] sm:$0xff] }
 0x142   : > { %1675 = vmatpush.bf16.msra.mxu1 %v4832_v3 }
 0x151   : > { %1318 = vmatmul.bf16.gmra.mxu2 %v1254_v5 }
 0x195   : > { %v1002_v12 = vpop.f32.mrf.mxu3 }
 0x19c   : > { %v1098_v15 = vpop.f32.mrf.mxu0 }
 0x19d   : > { %v1004_v22 = vpop.f32.mrf.mxu3 }
 0x1a0   : > { %v1214_v18 = vpop.f32.mrf.mxu1 }
 0x1a4   : > { %v933_v6 = vpop.f32.mrf.mxu2  ;;  %v1100_v28 = vpop.f32.mrf.mxu0 }
 0x1a5   : > { %v1003_v17 = vadd.f32 %v1002_v12, %v933_v6  ;;  %v1007_v43 = vpop.f32.mrf.mxu3 }
 0x1a7   : > { %v1108_v24 = vadd.f32 %v1098_v15, %v1003_v17  ;;  %v4831_v15 = vld [vmem:[#allocation16 + $0x80] sm:$0xff] }
 0x1a8   : > { %v1216_v39 = vpop.f32.mrf.mxu1  ;;  %1676 = vmatpush.bf16.msra.mxu1 %v4831_v15 }
 0x1a9   : > { %v1224_v31 = vadd.f32 %v1214_v18, %v1108_v24 }
 0x1ac   : > { %v935_v9 = vpop.f32.mrf.mxu2  ;;  %v1103_v50 = vpop.f32.mrf.mxu0 }
 0x1ad   : > { %v1005_v30 = vadd.f32 %v1004_v22, %v935_v9  ;;  %v1009_v1 = vpop.f32.mrf.mxu3 }
 0x1af   : > { %v1109_v41 = vadd.f32 %v1100_v28, %v1005_v30 }
 0x1b0   : > { %v1219_v58 = vpop.f32.mrf.mxu1 }
 0x1b1   : > { %v1225_v49 = vadd.f32 %v1216_v39, %v1109_v41  ;;  %v4852_v39 = vld [vmem:[#allocation16 + $0x128] sm:$0xff] }
 0x1b2   : > { %1885 = vmatpush.bf16.msra.mxu3 %v4852_v39 }
 0x1b4   : > { %v938_v13 = vpop.f32.mrf.mxu2  ;;  %v1105_v12 = vpop.f32.mrf.mxu0 }
 0x1b5   : > { %v1008_v48 = vadd.f32 %v1007_v43, %v938_v13 }
 0x1b7   : > { %v1110_v56 = vadd.f32 %v1103_v50, %v1008_v48  ;;  %v4850_v50 = vld [vmem:[#allocation16 + $0x118] sm:$0xff] }
 0x1b9   : > { %v1226_v6 = vadd.f32 %v1219_v58, %v1110_v56  ;;  %v4848_v56 = vld [vmem:[#allocation16 + $0x108] sm:$0xff] }
 0x1bc   : > { %v5908_v19 = vpop.f32.mrf.mxu2 }
 0x1bd   : > { %v1010_v5 = vadd.f32 %v1009_v1, %v5908_v19  ;;  %v1221_v19 = vpop.f32.mrf.mxu1  ;;  %v4847_v1 = vld [vmem:[#allocation16 + $0x100] sm:$0xff] }
 0x1bf   : > { %v1111_v13 = vadd.f32 %v1105_v12, %v1010_v5 }
 0x1c1   : > { %v1227_v22 = vadd.f32 %v1221_v19, %v1111_v13 }
 0x1c4   : > { %v1314_v33 = vpop.f32.mrf.mxu2 }
 0x1c5   : > { %v1324_v36 = vadd.f32 %v1314_v33, %v1224_v31 }
 0x1c7   : > { %v1332_v42 = vmul.f32 %v5910_v32, %v1324_v36 }
 0x1c9   : > { %v1340_v46 = vadd.f32 %v5912_v37, %v1332_v42 }
 0x1cb   : > { %5165 = vtanh.f32 %v1340_v46 }
 0x1cc   : > { %v1316_v51 = vpop.f32.mrf.mxu2 }
 0x1cd   : > { %v1325_v54 = vadd.f32 %v1316_v51, %v1225_v49 }
 0x1cf   : > { %v1333_v57 = vmul.f32 %v5910_v32, %v1325_v54 }
 0x1d1   : > { %v5166_v61 = vpop.eup %5165  ;;  %v1341_v63 = vadd.f32 %v5912_v37, %v1333_v57 }
 0x1d2   : > { %v1348_v2 = vpack.c.bf16 %v5166_v61, %v5166_v61 }
 0x1d3   : > { %5167 = vtanh.f32 %v1341_v63 }
 0x1d4   : > { %v1356_v8 = vrot.slane %v1348_v2, 6  ;;  %v1319_v9 = vpop.f32.mrf.mxu2 }
 0x1d5   : > { %v1326_v11 = vadd.f32 %v1319_v9, %v1226_v6 }
 0x1d6   : > { %1372 = vst [vmem:[#allocation3] sm:$0xc] %v1356_v8  ;;  %v1357_v23 = vrot.slane %v1356_v8, 4 }
 0x1d7   : > { %1380 = vst [vmem:[#allocation3] sm:$0xc] %v5612_v7  ;;  %v1334_v14 = vmul.f32 %v5910_v32, %v1326_v11 }
 0x1d9   : > { %v5168_v17 = vpop.eup %5167  ;;  %v1342_v18 = vadd.f32 %v5912_v37, %v1334_v14 }
 0x1da   : > { %v1349_v20 = vpack.c.bf16 %v5168_v17, %v5168_v17 }
 0x1db   : > { %5169 = vtanh.f32 %v1342_v18 }
 0x1dc   : > { %v1358_v24 = vrot.slane %v1349_v20, 6  ;;  %v1321_v25 = vpop.f32.mrf.mxu2 }
 0x1dd   : > { %v1327_v27 = vadd.f32 %v1321_v25, %v1227_v22 }
 0x1de   : > { %v1359_v28 = vsel %vm5879_vm2, %v1357_v23, %v1358_v24  ;;  %v1360_v36 = vrot.slane %v1358_v24, 4 }
 0x1df   : > { %1373 = vst [vmem:[#allocation3 + $0x4] sm:$0xf] %v1359_v28  ;;  %v1335_v30 = vmul.f32 %v5910_v32, %v1327_v27  ;;  %v1593_v32 = vld [vmem:[#allocation3] sm:$0xe] }
 0x1e0   : > { %1381 = vst [vmem:[#allocation3 + $0x4] sm:$0xf] %v5612_v7  ;;  %v1612_v45 = vunpack.c.l.b16 %v1593_v32 }
 0x1e1   : > { %v5170_v31 = vpop.eup %5169  ;;  %v1343_v33 = vadd.f32 %v5912_v37, %v1335_v30  ;;  %v4851_v37 = vld [vmem:[#allocation16 + $0x120] sm:$0xff] }
 0x1e2   : > { %v1350_v35 = vpack.c.bf16 %v5170_v31, %v5170_v31  ;;  %1886 = vmatpush.bf16.msra.mxu3 %v4851_v37  ;;  %v1807_v31 = vld [vmem:[#allocation3] sm:$0xc] }
 0x1e3   : > { %5171 = vtanh.f32 %v1343_v33  ;;  %v1826_v34 = vunpack.c.l.b16 %v1807_v31 }
 0x1e4   : > { %v1361_v38 = vrot.slane %v1350_v35, 6 }
 0x1e6   : > { %v1362_v40 = vsel %vm5879_vm2, %v1360_v36, %v1361_v38  ;;  %v1363_v46 = vrot.slane %v1361_v38, 4  ;;  %1887 = vmatpush.bf16.msra.mxu3 %v4850_v50  ;;  %v4859_v50 = vld [vmem:[#allocation16 + $0x158] sm:$0xff] }
 0x1e7   : > { %v5929_v41 = vld [vmem:[#allocation3] sm:$0xff]   ;;  %1374 = vst [vmem:[#allocation3 + $0x8] sm:$0xf] %v1362_v40 }
 0x1e8   : > { %1382 = vst [vmem:[#allocation3 + $0x8] sm:$0xf] %v5612_v7  ;;  %1582 = vmatmul.bf16.vlgmr.msra.gmra.mxu0 %v5929_v41  ;;  %v4985_v44 = vunpack.c.h.b16 %v5929_v41  ;;  %v1438_v53 = vshll.u32 %v5929_v41, 16  ;;  %v1436_v57 = vshrl.u32 %v5929_v41, 16  ;;  %v4860_v41 = vld [vmem:[#allocation16 + $0x160] sm:$0xff] }
 0x1e9   : > { %v5172_v42 = vpop.eup %5171 }
 0x1ea   : > { %v1351_v43 = vpack.c.bf16 %v5172_v42, %v5172_v42  ;;  %v1613_v51 = vpack.c.b16 %v4985_v44, %v1612_v45  ;;  %1888 = vmatpush.bf16.msra.mxu3 %v4849_v52  ;;  %v1440_v58 = vrot.slane %v1438_v53, 1  ;;  %v1827_v35 = vpack.c.b16 %v4985_v44, %v1826_v34  ;;  %v4863_v42 = vld [vmem:[#allocation16 + $0x178] sm:$0xff]  ;;  %v4862_v45 = vld [vmem:[#allocation16 + $0x170] sm:$0xff] }
 0x1eb   : > { %2153 = vmatpush.bf16.msrb.mxu1 %v4863_v42  ;;  %v4883_v34 = vld [vmem:[#allocation16 + $0x218] sm:$0xff]  ;;  %v4873_v42 = vld [vmem:[#allocation16 + $0x1c8] sm:$0xff] }
 0x1ec   : > { %v1364_v47 = vrot.slane %v1351_v43, 6  ;;  %v1714_v54 = vshrl.u32 %v1613_v51, 16  ;;  %v1717_v55 = vshll.u32 %v1613_v51, 16  ;;  %v1614_v63 = vrot.slane %v1613_v51, 1 }
 0x1ed   : > { %v1441_v3 = vor.u32 %v1440_v58, %v1436_v57  ;;  %v1828_v36 = vrot.slane %v1827_v35, 2  ;;  %v4871_v57 = vld [vmem:[#allocation16 + $0x1b8] sm:$0xff] }
 0x1ee   : > { %v1365_v48 = vsel %vm5879_vm2, %v1363_v46, %v1364_v47  ;;  %v1366_v49 = vrot.slane %v1364_v47, 4  ;;  %v1716_v59 = vrot.slane %v1714_v54, 1  ;;  %v1719_v60 = vrot.slane %v1717_v55, 2  ;;  %1889 = vmatpush.bf16.msra.mxu3 %v4848_v56  ;;  %v4861_v46 = vld [vmem:[#allocation16 + $0x168] sm:$0xff]  ;;  %v4879_v54 = vld [vmem:[#allocation16 + $0x1f8] sm:$0xff]  ;;  %v4858_v56 = vld [vmem:[#allocation16 + $0x150] sm:$0xff]  ;;  %2084 = vmatpush.bf16.msrb.mxu0 %v4871_v57 }
 0x1ef   : > { %1375 = vst [vmem:[#allocation3 + $0xc] sm:$0xf] %v1365_v48  ;;  %2154 = vmatpush.bf16.msrb.mxu1 %v4862_v45  ;;  %2248 = vmatpush.bf16.msrb.mxu2 %v4879_v54  ;;  %v4864_v54 = vld [vmem:[#allocation16 + $0x180] sm:$0xff] }
 0x1f0   : > { %1376 = vst [vmem:[#allocation3 + $0x10] sm:$0x3] %v1366_v49  ;;  %v1720_v6 = vor.u32 %v1719_v60, %v1716_v59  ;;  %v4878_v59 = vld [vmem:[#allocation16 + $0x1f0] sm:$0xff]  ;;  %v4887_v60 = vld [vmem:[#allocation16 + $0x238] sm:$0xff] }
 0x1f1   : > { %1383 = vst [vmem:[#allocation3 + $0xc] sm:$0x3] %v5612_v7 }
 0x1f2   : > { %1890 = vmatpush.bf16.msra.mxu3 %v4847_v1  ;;  %v4857_v1 = vld [vmem:[#allocation16 + $0x148] sm:$0xff] }
 0x1f3   : > { %2155 = vmatpush.bf16.msrb.mxu1 %v4861_v46  ;;  %2249 = vmatpush.bf16.msrb.mxu2 %v4878_v59 }
 0x1f7   : > { %v1692_v0 = vld [vmem:[#allocation3 + $0x10] sm:$0x3]  ;;  %2156 = vmatpush.bf16.msrb.mxu1 %v4860_v41 }
 0x1f8   : > { %v4814_v61 = vld [vmem:[#allocation3 + $0x8] sm:$0xff]  ;;  %v1404_v8 = vld [vmem:[#allocation3 + $0x10] sm:$0x1]  ;;  %v1711_v9 = vunpack.c.l.b16 %v1692_v0 }
 0x1f9   : > { %1587 = vmatmul.bf16.gmra.mxu0 %v4814_v61  ;;  %v1615_v2 = vrot.slane %v4814_v61, 1  ;;  %v1443_v4 = vshll.u32 %v4814_v61, 16  ;;  %v1447_v5 = vshrl.u32 %v4814_v61, 16  ;;  %v1431_v16 = vunpack.c.l.b16 %v1404_v8  ;;  %v5956_v0 = vld [vmem:[%s6169_s8] ss:$0 sm:$0xff]  ;;  %v4877_v8 = vld [vmem:[#allocation16 + $0x1e8] sm:$0xff] }
 0x1fa   : > { %v1712_v18 = vpack.c.b16 %v1711_v9, %v1711_v9  ;;  %v1829_v38 = vrot.slane %v4814_v61, 2  ;;  %v4886_v9 = vld [vmem:[#allocation16 + $0x230] sm:$0xff]  ;;  %2250 = vmatpush.bf16.msrb.mxu2 %v4877_v8 }
 0x1fb   : > { %v1616_v10 = vsel %vm1033_vm3, %v1614_v63, %v1615_v2  ;;  %v1445_v11 = vrot.slane %v1443_v4, 1  ;;  %v1721_v12 = vrot.slane %v1447_v5, 1  ;;  %v1722_v13 = vrot.slane %v1443_v4, 2  ;;  %2157 = vmatpush.bf16.msrb.mxu1 %v4859_v50 }
 0x1fc   : > { %1677 = vmatmul.bf16.vlgmr.msra.gmra.mxu1 %v1616_v10  ;;  %v1434_v19 = vpack.c.b16 %v1431_v16, %v1431_v16  ;;  %v1726_v20 = vshrl.u32 %v1712_v18, 16  ;;  %v1729_v21 = vshll.u32 %v1712_v18, 16  ;;  %v1830_v39 = vsel %vm1249_vm6, %v1828_v36, %v1829_v38  ;;  %v4876_v16 = vld [vmem:[#allocation16 + $0x1e0] sm:$0xff] }
 0x1fd   : > { %v1446_v14 = vsel %vm853_vm4, %v1441_v3, %v1445_v11  ;;  %v1723_v15 = vor.u32 %v1722_v13, %v1721_v12  ;;  %v1449_v26 = vor.u32 %v1447_v5, %v1445_v11  ;;  %v1831_v40 = vrot.slane %v1712_v18, 2  ;;  %v4870_v3 = vld [vmem:[#allocation16 + $0x1b0] sm:$0xff]  ;;  %v4856_v12 = vld [vmem:[#allocation16 + $0x140] sm:$0xff] }
 0x1fe   : > { %1513 = vmatmul.bf16.vlgmr.msrb.gmra.mxu3 %v1446_v14  ;;  %v1451_v22 = vshll.u32 %v1434_v19, 16  ;;  %v1617_v23 = vrot.slane %v1434_v19, 1  ;;  %v1728_v24 = vrot.slane %v1726_v20, 1  ;;  %v1731_v25 = vrot.slane %v1729_v21, 2  ;;  %v5961_v5 = vld [vmem:[%s6215_s19] ss:$0 sm:$0xff]  ;;  %2085 = vmatpush.bf16.msrb.mxu0 %v4870_v3 }
 0x1ff   : > { %v1724_v17 = vsel %vm1133_vm5, %v1720_v6, %v1723_v15  ;;  %v1832_v32 = vsel %vm1249_vm6, %v1829_v38, %v1831_v40  ;;  %2158 = vmatpush.bf16.msrb.mxu1 %v4858_v56  ;;  %2363 = vmatpush.bf16.msrb.mxu3 %v4887_v60  ;;  %v4869_v14 = vld [vmem:[#allocation16 + $0x1a8] sm:$0xff]  ;;  %v4866_v38 = vld [vmem:[#allocation16 + $0x190] sm:$0xff]  ;;  %v4880_v60 = vld [vmem:[#allocation16 + $0x200] sm:$0xff] }
 0x200   : > { %1792 = vmatmul.bf16.vlgmr.msra.gmra.mxu2 %v1724_v17  ;;  %v1453_v27 = vrot.slane %v1451_v22, 1  ;;  %v1618_v28 = vsel %vm1033_vm3, %v1615_v2, %v1617_v23  ;;  %v1732_v29 = vor.u32 %v1731_v25, %v1728_v24  ;;  %v4885_v17 = vld [vmem:[#allocation16 + $0x228] sm:$0xff]  ;;  %v4868_v22 = vld [vmem:[#allocation16 + $0x1a0] sm:$0xff]  ;;  %v4875_v24 = vld [vmem:[#allocation16 + $0x1d8] sm:$0xff] }
 0x201   : > { %2251 = vmatpush.bf16.msrb.mxu2 %v4876_v16  ;;  %v4884_v25 = vld [vmem:[#allocation16 + $0x220] sm:$0xff] }
 0x202   : > { %v1454_v30 = vsel %vm853_vm4, %v1449_v26, %v1453_v27  ;;  %v1733_v33 = vsel %vm1133_vm5, %v1723_v15, %v1732_v29  ;;  %2086 = vmatpush.bf16.msrb.mxu0 %v4869_v14  ;;  %v4867_v29 = vld [vmem:[#allocation16 + $0x198] sm:$0xff] }
 0x203   : > { %2159 = vmatpush.bf16.msrb.mxu1 %v4857_v1  ;;  %2364 = vmatpush.bf16.msrb.mxu3 %v4886_v9  ;;  %v4895_v1 = vld [vmem:[#allocation16 + $0x278] sm:$0xff] }
 0x205   : > { %2252 = vmatpush.bf16.msrb.mxu2 %v4875_v24 }
 0x206   : > { %2087 = vmatpush.bf16.msrb.mxu0 %v4868_v22  ;;  %v4891_v22 = vld [vmem:[#allocation16 + $0x258] sm:$0xff] }
 0x207   : > { %2160 = vmatpush.bf16.msrb.mxu1 %v4856_v12  ;;  %2365 = vmatpush.bf16.msrb.mxu3 %v4885_v17 }
 0x20a   : > { %2088 = vmatpush.bf16.msrb.mxu0 %v4867_v29 }
 0x20b   : > { %2366 = vmatpush.bf16.msrb.mxu3 %v4884_v25 }
 0x20c   : > { %1682 = vmatmul.bf16.gmra.mxu1 %v1618_v28 }
 0x20e   : > { %1518 = vmatmul.bf16.gmra.mxu3 %v1454_v30  ;;  %2089 = vmatpush.bf16.msrb.mxu0 %v4866_v38 }
 0x20f   : > { %2367 = vmatpush.bf16.msrb.mxu3 %v4883_v34 }
 0x210   : > { %1797 = vmatmul.bf16.gmra.mxu2 %v1733_v33  ;;  %v4874_v33 = vld [vmem:[#allocation16 + $0x1d0] sm:$0xff] }
 0x211   : > { %2253 = vmatpush.bf16.msrb.mxu2 %v4874_v33 }
 0x215   : > { %2254 = vmatpush.bf16.msrb.mxu2 %v4873_v42 }
 0x21e   : > { %1891 = vmatmul.bf16.vlgmr.msra.gmra.mxu3 %v1830_v39 }
 0x22e   : > { %1896 = vmatmul.bf16.gmra.mxu3 %v1832_v32 }
 0x265   : > { %v1583_v47 = vpop.f32.mrf.mxu0 }
 0x26d   : > { %v1585_v53 = vpop.f32.mrf.mxu0 }
 0x276   : > { %v1588_v13 = vpop.f32.mrf.mxu0 }
 0x279   : > { %v1678_v44 = vpop.f32.mrf.mxu1 }
 0x27e   : > { %v1590_v35 = vpop.f32.mrf.mxu0 }
 0x281   : > { %v1514_v37 = vpop.f32.mrf.mxu3  ;;  %v1680_v58 = vpop.f32.mrf.mxu1 }
 0x282   : > { %v1584_v49 = vadd.f32 %v1583_v47, %v1514_v37  ;;  %v4865_v47 = vld [vmem:[#allocation16 + $0x188] sm:$0xff] }
 0x283   : > { %v1793_v51 = vpop.f32.mrf.mxu2  ;;  %2090 = vmatpush.bf16.msrb.mxu0 %v4865_v47 }
 0x284   : > { %v1688_v55 = vadd.f32 %v1678_v44, %v1584_v49 }
 0x286   : > { %v1803_v61 = vadd.f32 %v1793_v51, %v1688_v55 }
 0x287   : > { %2091 = vmatpush.bf16.msrb.mxu0 %v4864_v54 }
 0x289   : > { %v1516_v43 = vpop.f32.mrf.mxu3  ;;  %v1683_v20 = vpop.f32.mrf.mxu1 }
 0x28a   : > { %v1586_v63 = vadd.f32 %v1585_v53, %v1516_v43  ;;  %v4882_v43 = vld [vmem:[#allocation16 + $0x210] sm:$0xff]  ;;  %v4881_v53 = vld [vmem:[#allocation16 + $0x208] sm:$0xff] }
 0x28b   : > { %v1795_v6 = vpop.f32.mrf.mxu2  ;;  %2368 = vmatpush.bf16.msrb.mxu3 %v4882_v43  ;;  %2462 = vmatpush.bf16.msra.mxu0 %v4895_v1 }
 0x28c   : > { %v1689_v10 = vadd.f32 %v1680_v58, %v1586_v63 }
 0x28e   : > { %v1804_v18 = vadd.f32 %v1795_v6, %v1689_v10  ;;  %v4893_v10 = vld [vmem:[#allocation16 + $0x268] sm:$0xff] }
 0x28f   : > { %2369 = vmatpush.bf16.msrb.mxu3 %v4881_v53 }
 0x291   : > { %v1519_v48 = vpop.f32.mrf.mxu3  ;;  %v1685_v46 = vpop.f32.mrf.mxu1 }
 0x292   : > { %v1589_v19 = vadd.f32 %v1588_v13, %v1519_v48  ;;  %v4892_v13 = vld [vmem:[#allocation16 + $0x260] sm:$0xff] }
 0x293   : > { %v1798_v28 = vpop.f32.mrf.mxu2  ;;  %2370 = vmatpush.bf16.msrb.mxu3 %v4880_v60 }
 0x294   : > { %v1690_v26 = vadd.f32 %v1683_v20, %v1589_v19 }
 0x296   : > { %v1805_v39 = vadd.f32 %v1798_v28, %v1690_v26 }
 0x299   : > { %v5951_v52 = vpop.f32.mrf.mxu3 }
 0x29a   : > { %v1591_v40 = vadd.f32 %v1590_v35, %v5951_v52  ;;  %v4872_v52 = vld [vmem:[#allocation16 + $0x1c0] sm:$0xff] }
 0x29b   : > { %v1800_v50 = vpop.f32.mrf.mxu2  ;;  %2255 = vmatpush.bf16.msrb.mxu2 %v4872_v52 }
 0x29c   : > { %v1691_v48 = vadd.f32 %v1685_v46, %v1591_v40 }
 0x29e   : > { %v1806_v55 = vadd.f32 %v1800_v50, %v1691_v48 }
 0x2a1   : > { %v1892_v2 = vpop.f32.mrf.mxu3 }
 0x2a2   : > { %v1902_v4 = vadd.f32 %v1892_v2, %v1803_v61 }
 0x2a4   : > { %v1910_v11 = vmul.f32 %v5956_v0, %v1902_v4  ;;  %v4894_v4 = vld [vmem:[#allocation16 + $0x270] sm:$0xff] }
 0x2a5   : > { %2463 = vmatpush.bf16.msra.mxu0 %v4894_v4 }
 0x2a6   : > { %v1918_v15 = vadd.f32 %v5961_v5, %v1910_v11 }
 0x2a8   : > { %5173 = vtanh.f32 %v1918_v15 }
 0x2a9   : > { %v1894_v21 = vpop.f32.mrf.mxu3  ;;  %2464 = vmatpush.bf16.msra.mxu0 %v4893_v10 }
 0x2aa   : > { %v1903_v23 = vadd.f32 %v1894_v21, %v1804_v18 }
 0x2ac   : > { %v1911_v27 = vmul.f32 %v5956_v0, %v1903_v23  ;;  %v4890_v23 = vld [vmem:[#allocation16 + $0x250] sm:$0xff] }
 0x2ad   : > { %2465 = vmatpush.bf16.msra.mxu0 %v4892_v13  ;;  %v4904_v13 = vld [vmem:[#allocation16 + $0x2b8] sm:$0xff] }
 0x2ae   : > { %v5174_v30 = vpop.eup %5173  ;;  %v1919_v31 = vadd.f32 %v5961_v5, %v1911_v27  ;;  %v4889_v27 = vld [vmem:[#allocation16 + $0x248] sm:$0xff]  ;;  %2734 = vmatpush.bf16.msra.mxu2 %v4904_v13 }
 0x2af   : > { %v1926_v36 = vpack.c.bf16 %v5174_v30, %v5174_v30 }
 0x2b0   : > { %5175 = vtanh.f32 %v1919_v31 }
 0x2b1   : > { %v1934_v32 = vrot.slane %v1926_v36, 6  ;;  %v1897_v37 = vpop.f32.mrf.mxu3  ;;  %2466 = vmatpush.bf16.msra.mxu0 %v4891_v22  ;;  %v4888_v36 = vld [vmem:[#allocation16 + $0x240] sm:$0xff] }
 0x2b2   : > { %v1904_v45 = vadd.f32 %v1897_v37, %v1805_v39 }
 0x2b3   : > { %1950 = vst [vmem:[#allocation3] sm:$0xc] %v1934_v32  ;;  %v1935_v56 = vrot.slane %v1934_v32, 4 }
 0x2b4   : > { %1958 = vst [vmem:[#allocation3] sm:$0xc] %v5612_v7  ;;  %v1912_v41 = vmul.f32 %v5956_v0, %v1904_v45 }
 0x2b5   : > { %2467 = vmatpush.bf16.msra.mxu0 %v4890_v23  ;;  %v4920_v23 = vld [vmem:[#allocation16 + $0x338] sm:$0xff] }
 0x2b6   : > { %v5176_v44 = vpop.eup %5175  ;;  %v1920_v49 = vadd.f32 %v5961_v5, %v1912_v41  ;;  %2829 = vmatpush.bf16.msra.mxu3 %v4920_v23 }
 0x2b7   : > { %v1927_v51 = vpack.c.bf16 %v5176_v44, %v5176_v44 }
 0x2b8   : > { %5177 = vtanh.f32 %v1920_v49 }
 0x2b9   : > { %v1936_v57 = vrot.slane %v1927_v51, 6  ;;  %v1899_v58 = vpop.f32.mrf.mxu3  ;;  %2468 = vmatpush.bf16.msra.mxu0 %v4889_v27 }
 0x2ba   : > { %v1905_v59 = vadd.f32 %v1899_v58, %v1806_v55 }
 0x2bb   : > { %v1937_v61 = vsel %vm5879_vm2, %v1935_v56, %v1936_v57  ;;  %v1938_v8 = vrot.slane %v1936_v57, 4  ;;  %v2172_v12 = vld [vmem:[#allocation3] sm:$0xe] }
 0x2bc   : > { %1951 = vst [vmem:[#allocation3 + $0x4] sm:$0xf] %v1937_v61  ;;  %v1913_v63 = vmul.f32 %v5956_v0, %v1905_v59  ;;  %v2191_v16 = vunpack.c.l.b16 %v2172_v12 }
 0x2bd   : > { %1959 = vst [vmem:[#allocation3 + $0x4] sm:$0xf] %v5612_v7  ;;  %2469 = vmatpush.bf16.msra.mxu0 %v4888_v36 }
 0x2be   : > { %v5178_v2 = vpop.eup %5177  ;;  %v1921_v3 = vadd.f32 %v5961_v5, %v1913_v63 }
 0x2bf   : > { %v1928_v6 = vpack.c.bf16 %v5178_v2, %v5178_v2  ;;  %v2386_v2 = vld [vmem:[#allocation3] sm:$0xc] }
 0x2c0   : > { %5179 = vtanh.f32 %v1921_v3  ;;  %v2405_v4 = vunpack.c.l.b16 %v2386_v2 }
 0x2c1   : > { %v1939_v9 = vrot.slane %v1928_v6, 6 }
 0x2c3   : > { %v1940_v11 = vsel %vm5879_vm2, %v1938_v8, %v1939_v9  ;;  %v1941_v17 = vrot.slane %v1939_v9, 4 }
 0x2c4   : > { %1952 = vst [vmem:[#allocation3 + $0x8] sm:$0xf] %v1940_v11  ;;  %v5978_v0 = vld [vmem:[#allocation3] sm:$0xff]  }
 0x2c5   : > { %1960 = vst [vmem:[#allocation3 + $0x8] sm:$0xf] %v5612_v7  ;;  %2161 = vmatmul.bf16.vlgmr.msrb.gmra.mxu1 %v5978_v0  ;;  %v4989_v15 = vunpack.c.h.b16 %v5978_v0  ;;  %v2017_v24 = vshll.u32 %v5978_v0, 16  ;;  %v2015_v28 = vshrl.u32 %v5978_v0, 16 }
 0x2c6   : > { %v5180_v5 = vpop.eup %5179 }
 0x2c7   : > { %v1929_v14 = vpack.c.bf16 %v5180_v5, %v5180_v5  ;;  %v2192_v21 = vpack.c.b16 %v4989_v15, %v2191_v16  ;;  %v2019_v29 = vrot.slane %v2017_v24, 1  ;;  %v2406_v6 = vpack.c.b16 %v4989_v15, %v2405_v4  ;;  %v4903_v16 = vld [vmem:[#allocation16 + $0x2b0] sm:$0xff]  ;;  %v4901_v15 = vld [vmem:[#allocation16 + $0x2a0] sm:$0xff]  ;;  %v4924_v4 = vld [vmem:[#allocation16 + $0x358] sm:$0xff] }
 0x2c8   : > { %2735 = vmatpush.bf16.msra.mxu2 %v4903_v16 }
 0x2c9   : > { %v1942_v18 = vrot.slane %v1929_v14, 6  ;;  %v2293_v25 = vshrl.u32 %v2192_v21, 16  ;;  %v2296_v26 = vshll.u32 %v2192_v21, 16  ;;  %v2193_v34 = vrot.slane %v2192_v21, 1  ;;  %v4900_v21 = vld [vmem:[#allocation16 + $0x298] sm:$0xff] }
 0x2ca   : > { %v2020_v39 = vor.u32 %v2019_v29, %v2015_v28  ;;  %v2407_v8 = vrot.slane %v2406_v6, 2 }
 0x2cb   : > { %v1943_v19 = vsel %vm5879_vm2, %v1941_v17, %v1942_v18  ;;  %v1944_v20 = vrot.slane %v1942_v18, 4  ;;  %v2295_v30 = vrot.slane %v2293_v25, 1  ;;  %v2298_v31 = vrot.slane %v2296_v26, 2  ;;  %v4902_v17 = vld [vmem:[#allocation16 + $0x2a8] sm:$0xff]  ;;  %v4899_v25 = vld [vmem:[#allocation16 + $0x290] sm:$0xff]  ;;  %v4912_v26 = vld [vmem:[#allocation16 + $0x2f8] sm:$0xff] }
 0x2cc   : > { %1953 = vst [vmem:[#allocation3 + $0xc] sm:$0xf] %v1943_v19  ;;  %2736 = vmatpush.bf16.msra.mxu2 %v4902_v17  ;;  %2665 = vmatpush.bf16.msra.mxu1 %v4912_v26  ;;  %v4906_v17 = vld [vmem:[#allocation16 + $0x2c8] sm:$0xff]  ;;  %v4905_v26 = vld [vmem:[#allocation16 + $0x2c0] sm:$0xff] }
 0x2cd   : > { %1954 = vst [vmem:[#allocation3 + $0x10] sm:$0x3] %v1944_v20  ;;  %v2299_v37 = vor.u32 %v2298_v31, %v2295_v30  ;;  %v4919_v30 = vld [vmem:[#allocation16 + $0x330] sm:$0xff]  ;;  %v4928_v31 = vld [vmem:[#allocation16 + $0x378] sm:$0xff] }
 0x2ce   : > { %1961 = vst [vmem:[#allocation3 + $0xc] sm:$0x3] %v5612_v7  ;;  %2830 = vmatpush.bf16.msra.mxu3 %v4919_v30 }
 0x2d0   : > { %2737 = vmatpush.bf16.msra.mxu2 %v4901_v15 }
 0x2d4   : > { %v2271_v35 = vld [vmem:[#allocation3 + $0x10] sm:$0x3]  ;;  %2738 = vmatpush.bf16.msra.mxu2 %v4900_v21 }
 0x2d5   : > { %v4855_v33 = vld [vmem:[#allocation3 + $0x8] sm:$0xff]  ;;  %v1983_v42 = vld [vmem:[#allocation3 + $0x10] sm:$0x1]  ;;  %v2290_v43 = vunpack.c.l.b16 %v2271_v35 }
 0x2d6   : > { %2166 = vmatmul.bf16.gmra.mxu1 %v4855_v33  ;;  %v2194_v38 = vrot.slane %v4855_v33, 1  ;;  %v2022_v40 = vshll.u32 %v4855_v33, 16  ;;  %v2026_v32 = vshrl.u32 %v4855_v33, 16  ;;  %v2010_v49 = vunpack.c.l.b16 %v1983_v42  ;;  %v4898_v35 = vld [vmem:[#allocation16 + $0x288] sm:$0xff]  ;;  %v4927_v42 = vld [vmem:[#allocation16 + $0x370] sm:$0xff] }
 0x2d7   : > { %v2291_v51 = vpack.c.b16 %v2290_v43, %v2290_v43  ;;  %v2408_v9 = vrot.slane %v4855_v33, 2 }
 0x2d8   : > { %v2195_v45 = vsel %vm1033_vm3, %v2193_v34, %v2194_v38  ;;  %v2024_v46 = vrot.slane %v2022_v40, 1  ;;  %v2300_v47 = vrot.slane %v2026_v32, 1  ;;  %v2301_v48 = vrot.slane %v2022_v40, 2  ;;  %2739 = vmatpush.bf16.msra.mxu2 %v4899_v25  ;;  %v6005_v34 = vld [vmem:[%s6169_s8 + $0x1] ss:$0 sm:$0xff]  ;;  %v4922_v25 = vld [vmem:[#allocation16 + $0x348] sm:$0xff] }
 0x2d9   : > { %2256 = vmatmul.bf16.vlgmr.msrb.gmra.mxu2 %v2195_v45  ;;  %v2013_v52 = vpack.c.b16 %v2010_v49, %v2010_v49  ;;  %v2305_v53 = vshrl.u32 %v2291_v51, 16  ;;  %v2308_v54 = vshll.u32 %v2291_v51, 16  ;;  %v2409_v10 = vsel %vm1249_vm6, %v2407_v8, %v2408_v9  ;;  %v4926_v49 = vld [vmem:[#allocation16 + $0x368] sm:$0xff]  ;;  %v4907_v8 = vld [vmem:[#allocation16 + $0x2d0] sm:$0xff] }
 0x2da   : > { %v2025_v41 = vsel %vm853_vm4, %v2020_v39, %v2024_v46  ;;  %v2302_v44 = vor.u32 %v2301_v48, %v2300_v47  ;;  %v2028_v59 = vor.u32 %v2026_v32, %v2024_v46  ;;  %v2410_v11 = vrot.slane %v2291_v51, 2  ;;  %v4911_v39 = vld [vmem:[#allocation16 + $0x2f0] sm:$0xff]  ;;  %v4897_v46 = vld [vmem:[#allocation16 + $0x280] sm:$0xff]  ;;  %v4910_v47 = vld [vmem:[#allocation16 + $0x2e8] sm:$0xff] }
 0x2db   : > { %2092 = vmatmul.bf16.vlgmr.msrb.gmra.mxu0 %v2025_v41  ;;  %v2030_v55 = vshll.u32 %v2013_v52, 16  ;;  %v2196_v56 = vrot.slane %v2013_v52, 1  ;;  %v2307_v57 = vrot.slane %v2305_v53, 1  ;;  %v2310_v58 = vrot.slane %v2308_v54, 2  ;;  %v6010_v32 = vld [vmem:[%s6215_s19 + $0x1] ss:$0 sm:$0xff]  ;;  %2666 = vmatpush.bf16.msra.mxu1 %v4911_v39 }
 0x2dc   : > { %v2303_v50 = vsel %vm1133_vm5, %v2299_v37, %v2302_v44  ;;  %v2411_v12 = vsel %vm1249_vm6, %v2408_v9, %v2410_v11  ;;  %2944 = vmatpush.bf16.msrb.mxu0 %v4928_v31  ;;  %2740 = vmatpush.bf16.msra.mxu2 %v4898_v35  ;;  %v4918_v37 = vld [vmem:[#allocation16 + $0x328] sm:$0xff]  ;;  %v4909_v54 = vld [vmem:[#allocation16 + $0x2e0] sm:$0xff] }
 0x2dd   : > { %2371 = vmatmul.bf16.vlgmr.msrb.gmra.mxu3 %v2303_v50  ;;  %v2032_v60 = vrot.slane %v2030_v55, 1  ;;  %v2197_v61 = vsel %vm1033_vm3, %v2194_v38, %v2196_v56  ;;  %v2311_v63 = vor.u32 %v2310_v58, %v2307_v57  ;;  %v4916_v57 = vld [vmem:[#allocation16 + $0x318] sm:$0xff]  ;;  %v4925_v58 = vld [vmem:[#allocation16 + $0x360] sm:$0xff] }
 0x2de   : > { %2831 = vmatpush.bf16.msra.mxu3 %v4918_v37  ;;  %v4921_v31 = vld [vmem:[#allocation16 + $0x340] sm:$0xff] }
 0x2df   : > { %v2033_v1 = vsel %vm853_vm4, %v2028_v59, %v2032_v60  ;;  %v2312_v3 = vsel %vm1133_vm5, %v2302_v44, %v2311_v63  ;;  %2667 = vmatpush.bf16.msra.mxu1 %v4910_v47  ;;  %v4917_v44 = vld [vmem:[#allocation16 + $0x320] sm:$0xff] }
 0x2e0   : > { %2945 = vmatpush.bf16.msrb.mxu0 %v4927_v42  ;;  %2741 = vmatpush.bf16.msra.mxu2 %v4897_v46 }
 0x2e2   : > { %2832 = vmatpush.bf16.msra.mxu3 %v4917_v44 }
 0x2e3   : > { %2668 = vmatpush.bf16.msra.mxu1 %v4909_v54 }
 0x2e4   : > { %2946 = vmatpush.bf16.msrb.mxu0 %v4926_v49 }
 0x2e6   : > { %2833 = vmatpush.bf16.msra.mxu3 %v4916_v57 }
 0x2e8   : > { %2947 = vmatpush.bf16.msrb.mxu0 %v4925_v58 }
 0x2e9   : > { %2261 = vmatmul.bf16.gmra.mxu2 %v2197_v61  ;;  %v4908_v61 = vld [vmem:[#allocation16 + $0x2d8] sm:$0xff] }
 0x2ea   : > { %2669 = vmatpush.bf16.msra.mxu1 %v4908_v61 }
 0x2eb   : > { %2097 = vmatmul.bf16.gmra.mxu0 %v2033_v1 }
 0x2ec   : > { %2948 = vmatpush.bf16.msrb.mxu0 %v4924_v4 }
 0x2ed   : > { %2376 = vmatmul.bf16.gmra.mxu3 %v2312_v3  ;;  %v4915_v3 = vld [vmem:[#allocation16 + $0x310] sm:$0xff] }
 0x2ee   : > { %2834 = vmatpush.bf16.msra.mxu3 %v4915_v3  ;;  %2670 = vmatpush.bf16.msra.mxu1 %v4907_v8  ;;  %v4929_v8 = vld [vmem:[#allocation16 + $0x380] sm:$0xff] }
 0x2f2   : > { %2671 = vmatpush.bf16.msra.mxu1 %v4906_v17 }
 0x2f6   : > { %2672 = vmatpush.bf16.msra.mxu1 %v4905_v26 }
 0x2fb   : > { %2470 = vmatmul.bf16.vlgmr.msra.gmra.mxu0 %v2409_v10 }
 0x30b   : > { %2475 = vmatmul.bf16.gmra.mxu0 %v2411_v12  ;;  %v4914_v12 = vld [vmem:[#allocation16 + $0x308] sm:$0xff] }
 0x30c   : > { %2835 = vmatpush.bf16.msra.mxu3 %v4914_v12 }
 0x342   : > { %v2162_v0 = vpop.f32.mrf.mxu1 }
 0x34a   : > { %v2164_v27 = vpop.f32.mrf.mxu1 }
 0x353   : > { %v2167_v50 = vpop.f32.mrf.mxu1 }
 0x358   : > { %v2093_v5 = vpop.f32.mrf.mxu0 }
 0x359   : > { %v2163_v24 = vadd.f32 %v2162_v0, %v2093_v5  ;;  %v4923_v5 = vld [vmem:[#allocation16 + $0x350] sm:$0xff] }
 0x35a   : > { %2949 = vmatpush.bf16.msrb.mxu0 %v4923_v5 }
 0x35c   : > { %v2257_v19 = vpop.f32.mrf.mxu2 }
 0x35d   : > { %v2267_v28 = vadd.f32 %v2257_v19, %v2163_v24  ;;  %v4913_v24 = vld [vmem:[#allocation16 + $0x300] sm:$0xff] }
 0x35e   : > { %2836 = vmatpush.bf16.msra.mxu3 %v4913_v24  ;;  %2950 = vmatpush.bf16.msrb.mxu0 %v4922_v25 }
 0x360   : > { %v2095_v14 = vpop.f32.mrf.mxu0  ;;  %v2372_v20 = vpop.f32.mrf.mxu3 }
 0x361   : > { %v2382_v33 = vadd.f32 %v2372_v20, %v2267_v28  ;;  %v2165_v43 = vadd.f32 %v2164_v27, %v2095_v14  ;;  %v2169_v14 = vpop.f32.mrf.mxu1 }
 0x362   : > { %2951 = vmatpush.bf16.msrb.mxu0 %v4921_v31 }
 0x364   : > { %v2259_v29 = vpop.f32.mrf.mxu2 }
 0x365   : > { %v2268_v48 = vadd.f32 %v2259_v29, %v2165_v43 }
 0x368   : > { %v2098_v18 = vpop.f32.mrf.mxu0  ;;  %v2374_v36 = vpop.f32.mrf.mxu3 }
 0x369   : > { %v2383_v51 = vadd.f32 %v2374_v36, %v2268_v48  ;;  %v2168_v59 = vadd.f32 %v2167_v50, %v2098_v18  ;;  %v4936_v36 = vld [vmem:[#allocation16 + $0x3b8] sm:$0xff]  ;;  %v4933_v48 = vld [vmem:[#allocation16 + $0x3a0] sm:$0xff] }
 0x36a   : > { %3043 = vmatpush.bf16.msrb.mxu1 %v4936_v36 }
 0x36c   : > { %v2262_v52 = vpop.f32.mrf.mxu2 }
 0x36d   : > { %v2269_v1 = vadd.f32 %v2262_v52, %v2168_v59 }
 0x370   : > { %v6000_v22 = vpop.f32.mrf.mxu0  ;;  %v2377_v56 = vpop.f32.mrf.mxu3 }
 0x371   : > { %v2384_v9 = vadd.f32 %v2377_v56, %v2269_v1  ;;  %v2170_v18 = vadd.f32 %v2169_v14, %v6000_v22  ;;  %v4931_v56 = vld [vmem:[#allocation16 + $0x390] sm:$0xff] }
 0x374   : > { %v2264_v16 = vpop.f32.mrf.mxu2 }
 0x375   : > { %v2270_v20 = vadd.f32 %v2264_v16, %v2170_v18 }
 0x378   : > { %v2471_v38 = vpop.f32.mrf.mxu0  ;;  %v2379_v15 = vpop.f32.mrf.mxu3 }
 0x379   : > { %v2481_v40 = vadd.f32 %v2471_v38, %v2382_v33  ;;  %v2385_v27 = vadd.f32 %v2379_v15, %v2270_v20 }
 0x37b   : > { %v2490_v45 = vmul.f32 %v6005_v34, %v2481_v40  ;;  %v4935_v40 = vld [vmem:[#allocation16 + $0x3b0] sm:$0xff] }
 0x37c   : > { %3044 = vmatpush.bf16.msrb.mxu1 %v4935_v40 }
 0x37d   : > { %v2499_v41 = vadd.f32 %v6010_v32, %v2490_v45  ;;  %v4934_v45 = vld [vmem:[#allocation16 + $0x3a8] sm:$0xff] }
 0x37f   : > { %5181 = vtanh.f32 %v2499_v41 }
 0x380   : > { %v2473_v53 = vpop.f32.mrf.mxu0  ;;  %3045 = vmatpush.bf16.msrb.mxu1 %v4934_v45 }
 0x381   : > { %v2482_v55 = vadd.f32 %v2473_v53, %v2383_v51 }
 0x383   : > { %v2491_v60 = vmul.f32 %v6005_v34, %v2482_v55  ;;  %v4932_v55 = vld [vmem:[#allocation16 + $0x398] sm:$0xff] }
 0x384   : > { %3046 = vmatpush.bf16.msrb.mxu1 %v4933_v48  ;;  %v4945_v48 = vld [vmem:[#allocation18 + $0x38] sm:$0xff] }
 0x385   : > { %v5182_v63 = vpop.eup %5181  ;;  %v2500_v2 = vadd.f32 %v6010_v32, %v2491_v60  ;;  %v4930_v60 = vld [vmem:[#allocation16 + $0x388] sm:$0xff]  ;;  %3311 = vmatpush.bf16.msrb.mxu3 %v4945_v48 }
 0x386   : > { %v2507_v6 = vpack.c.bf16 %v5182_v63, %v5182_v63  ;;  %v4955_v48 = vld [vmem:[#allocation18 + $0x88] sm:$0xff] }
 0x387   : > { %5183 = vtanh.f32 %v2500_v2 }
 0x388   : > { %v2515_v10 = vrot.slane %v2507_v6, 6  ;;  %v2476_v11 = vpop.f32.mrf.mxu0  ;;  %3047 = vmatpush.bf16.msrb.mxu1 %v4932_v55 }
 0x389   : > { %v2483_v13 = vadd.f32 %v2476_v11, %v2384_v9 }
 0x38a   : > { %2531 = vst [vmem:[#allocation3] sm:$0xc] %v2515_v10  ;;  %v2516_v28 = vrot.slane %v2515_v10, 4 }
 0x38b   : > { %2539 = vst [vmem:[#allocation3] sm:$0xc] %v5612_v7  ;;  %v2492_v0 = vmul.f32 %v6005_v34, %v2483_v13 }
 0x38c   : > { %3048 = vmatpush.bf16.msrb.mxu1 %v4931_v56 }
 0x38d   : > { %v5184_v19 = vpop.eup %5183  ;;  %v2501_v21 = vadd.f32 %v6010_v32, %v2492_v0 }
 0x38e   : > { %v2508_v23 = vpack.c.bf16 %v5184_v19, %v5184_v19 }
 0x38f   : > { %5185 = vtanh.f32 %v2501_v21 }
 0x390   : > { %v2517_v22 = vrot.slane %v2508_v23, 6  ;;  %v2478_v29 = vpop.f32.mrf.mxu0  ;;  %3049 = vmatpush.bf16.msrb.mxu1 %v4930_v60  ;;  %v4940_v60 = vld [vmem:[#allocation18 + $0x10] sm:$0xff] }
 0x391   : > { %v2484_v30 = vadd.f32 %v2478_v29, %v2385_v27 }
 0x392   : > { %v2518_v33 = vsel %vm5879_vm2, %v2516_v28, %v2517_v22  ;;  %v2519_v42 = vrot.slane %v2517_v22, 4  ;;  %v2753_v47 = vld [vmem:[#allocation3] sm:$0xe] }
 0x393   : > { %2532 = vst [vmem:[#allocation3 + $0x4] sm:$0xf] %v2518_v33  ;;  %v2493_v35 = vmul.f32 %v6005_v34, %v2484_v30  ;;  %v2772_v49 = vunpack.c.l.b16 %v2753_v47 }
 0x394   : > { %2540 = vst [vmem:[#allocation3 + $0x4] sm:$0xf] %v5612_v7  ;;  %3050 = vmatpush.bf16.msrb.mxu1 %v4929_v8 }
 0x395   : > { %v5186_v38 = vpop.eup %5185  ;;  %v2502_v39 = vadd.f32 %v6010_v32, %v2493_v35 }
 0x396   : > { %v2509_v37 = vpack.c.bf16 %v5186_v38, %v5186_v38  ;;  %v2967_v38 = vld [vmem:[#allocation3] sm:$0xc] }
 0x397   : > { %5187 = vtanh.f32 %v2502_v39  ;;  %v2986_v40 = vunpack.c.l.b16 %v2967_v38 }
 0x398   : > { %v2520_v43 = vrot.slane %v2509_v37, 6 }
 0x39a   : > { %v2521_v46 = vsel %vm5879_vm2, %v2519_v42, %v2520_v43  ;;  %v2522_v50 = vrot.slane %v2520_v43, 4 }
 0x39b   : > { %2533 = vst [vmem:[#allocation3 + $0x8] sm:$0xf] %v2521_v46  ;;  %v6027_v34 = vld [vmem:[#allocation3] sm:$0xff]  }
 0x39c   : > { %2541 = vst [vmem:[#allocation3 + $0x8] sm:$0xf] %v5612_v7  ;;  %2742 = vmatmul.bf16.vlgmr.msra.gmra.mxu2 %v6027_v34  ;;  %v4993_v44 = vunpack.c.h.b16 %v6027_v34  ;;  %v2598_v57 = vshll.u32 %v6027_v34, 16  ;;  %v2596_v61 = vshrl.u32 %v6027_v34, 16 }
 0x39d   : > { %v5188_v32 = vpop.eup %5187 }
 0x39e   : > { %v2510_v41 = vpack.c.bf16 %v5188_v32, %v5188_v32  ;;  %v2773_v54 = vpack.c.b16 %v4993_v44, %v2772_v49  ;;  %v2600_v63 = vrot.slane %v2598_v57, 1  ;;  %v2987_v37 = vpack.c.b16 %v4993_v44, %v2986_v40  ;;  %v4944_v49 = vld [vmem:[#allocation18 + $0x30] sm:$0xff]  ;;  %v4942_v44 = vld [vmem:[#allocation18 + $0x20] sm:$0xff]  ;;  %v4961_v57 = vld [vmem:[#allocation18 + $0xb8] sm:$0xff] }
 0x39f   : > { %3312 = vmatpush.bf16.msrb.mxu3 %v4944_v49  ;;  %3403 = vmatpush.bf16.msra.mxu0 %v4961_v57  ;;  %v4965_v40 = vld [vmem:[#allocation18 + $0xd8] sm:$0xff] }
 0x3a0   : > { %v2523_v51 = vrot.slane %v2510_v41, 6  ;;  %v2874_v58 = vshrl.u32 %v2773_v54, 16  ;;  %v2877_v59 = vshll.u32 %v2773_v54, 16  ;;  %v2774_v4 = vrot.slane %v2773_v54, 1 }
 0x3a1   : > { %v2601_v10 = vor.u32 %v2600_v63, %v2596_v61  ;;  %v2988_v42 = vrot.slane %v2987_v37, 2  ;;  %v4953_v63 = vld [vmem:[#allocation18 + $0x78] sm:$0xff] }
 0x3a2   : > { %v2524_v52 = vsel %vm5879_vm2, %v2522_v50, %v2523_v51  ;;  %v2525_v53 = vrot.slane %v2523_v51, 4  ;;  %v2876_v1 = vrot.slane %v2874_v58, 1  ;;  %v2879_v2 = vrot.slane %v2877_v59, 2  ;;  %v4943_v50 = vld [vmem:[#allocation18 + $0x28] sm:$0xff]  ;;  %3245 = vmatpush.bf16.msrb.mxu2 %v4953_v63 }
 0x3a3   : > { %2534 = vst [vmem:[#allocation3 + $0xc] sm:$0xf] %v2524_v52  ;;  %3313 = vmatpush.bf16.msrb.mxu3 %v4943_v50 }
 0x3a4   : > { %2535 = vst [vmem:[#allocation3 + $0x10] sm:$0x3] %v2525_v53  ;;  %v2880_v5 = vor.u32 %v2879_v2, %v2876_v1  ;;  %v4941_v53 = vld [vmem:[#allocation18 + $0x18] sm:$0xff]  ;;  %v4960_v1 = vld [vmem:[#allocation18 + $0xb0] sm:$0xff] }
 0x3a5   : > { %2542 = vst [vmem:[#allocation3 + $0xc] sm:$0x3] %v5612_v7  ;;  %v4969_v2 = vld [vmem:[#allocation18 + $0xf8] sm:$0xff]  ;;  %3404 = vmatpush.bf16.msra.mxu0 %v4960_v1 }
 0x3a7   : > { %3314 = vmatpush.bf16.msrb.mxu3 %v4942_v44 }
 0x3ab   : > { %v2852_v6 = vld [vmem:[#allocation3 + $0x10] sm:$0x3]  ;;  %3315 = vmatpush.bf16.msrb.mxu3 %v4941_v53 }
 0x3ac   : > { %v4896_v3 = vld [vmem:[#allocation3 + $0x8] sm:$0xff]  ;;  %v2564_v13 = vld [vmem:[#allocation3 + $0x10] sm:$0x1]  ;;  %v2871_v14 = vunpack.c.l.b16 %v2852_v6 }
 0x3ad   : > { %2747 = vmatmul.bf16.gmra.mxu2 %v4896_v3  ;;  %v2775_v9 = vrot.slane %v4896_v3, 1  ;;  %v2603_v11 = vshll.u32 %v4896_v3, 16  ;;  %v2607_v12 = vshrl.u32 %v4896_v3, 16  ;;  %v2591_v20 = vunpack.c.l.b16 %v2564_v13  ;;  %v4939_v6 = vld [vmem:[#allocation18 + $0x8] sm:$0xff] }
 0x3ae   : > { %v2872_v23 = vpack.c.b16 %v2871_v14, %v2871_v14  ;;  %v2989_v43 = vrot.slane %v4896_v3, 2  ;;  %v4959_v13 = vld [vmem:[#allocation18 + $0xa8] sm:$0xff]  ;;  %v4968_v14 = vld [vmem:[#allocation18 + $0xf0] sm:$0xff] }
 0x3af   : > { %v2776_v16 = vsel %vm1033_vm3, %v2774_v4, %v2775_v9  ;;  %v2605_v17 = vrot.slane %v2603_v11, 1  ;;  %v2881_v18 = vrot.slane %v2607_v12, 1  ;;  %v2882_v0 = vrot.slane %v2603_v11, 2  ;;  %3316 = vmatpush.bf16.msrb.mxu3 %v4940_v60  ;;  %v6054_v4 = vld [vmem:[%s6169_s8 + $0x2] ss:$0 sm:$0xff]  ;;  %3405 = vmatpush.bf16.msra.mxu0 %v4959_v13 }
 0x3b0   : > { %2837 = vmatmul.bf16.vlgmr.msra.gmra.mxu3 %v2776_v16  ;;  %v2594_v24 = vpack.c.b16 %v2591_v20, %v2591_v20  ;;  %v2886_v25 = vshrl.u32 %v2872_v23, 16  ;;  %v2889_v26 = vshll.u32 %v2872_v23, 16  ;;  %v2990_v45 = vsel %vm1249_vm6, %v2988_v42, %v2989_v43  ;;  %v4948_v42 = vld [vmem:[#allocation18 + $0x50] sm:$0xff] }
 0x3b1   : > { %v2606_v15 = vsel %vm853_vm4, %v2601_v10, %v2605_v17  ;;  %v2883_v19 = vor.u32 %v2882_v0, %v2881_v18  ;;  %v2609_v30 = vor.u32 %v2607_v12, %v2605_v17  ;;  %v2991_v46 = vrot.slane %v2872_v23, 2  ;;  %v6059_v12 = vld [vmem:[%s6215_s19 + $0x2] ss:$0 sm:$0xff]  ;;  %v4938_v18 = vld [vmem:[#allocation18] sm:$0xff]  ;;  %v4951_v0 = vld [vmem:[#allocation18 + $0x68] sm:$0xff] }
 0x3b2   : > { %2673 = vmatmul.bf16.vlgmr.msra.gmra.mxu1 %v2606_v15  ;;  %v2611_v27 = vshll.u32 %v2594_v24, 16  ;;  %v2777_v28 = vrot.slane %v2594_v24, 1  ;;  %v2888_v22 = vrot.slane %v2886_v25, 1  ;;  %v2891_v29 = vrot.slane %v2889_v26, 2  ;;  %v4967_v23 = vld [vmem:[#allocation18 + $0xe8] sm:$0xff]  ;;  %v4950_v26 = vld [vmem:[#allocation18 + $0x60] sm:$0xff] }
 0x3b3   : > { %v2884_v21 = vsel %vm1133_vm5, %v2880_v5, %v2883_v19  ;;  %v2992_v47 = vsel %vm1249_vm6, %v2989_v43, %v2991_v46  ;;  %3512 = vmatpush.bf16.msra.mxu1 %v4969_v2  ;;  %3317 = vmatpush.bf16.msrb.mxu3 %v4939_v6  ;;  %v4977_v6 = vld [vmem:[#allocation18 + $0x138] sm:$0xff] }
 0x3b4   : > { %2952 = vmatmul.bf16.vlgmr.msrb.gmra.mxu0 %v2884_v21  ;;  %v2613_v31 = vrot.slane %v2611_v27, 1  ;;  %v2778_v33 = vsel %vm1033_vm3, %v2775_v9, %v2777_v28  ;;  %v2892_v35 = vor.u32 %v2891_v29, %v2888_v22  ;;  %v4952_v9 = vld [vmem:[#allocation18 + $0x70] sm:$0xff]  ;;  %v4958_v21 = vld [vmem:[#allocation18 + $0xa0] sm:$0xff]  ;;  %v4957_v22 = vld [vmem:[#allocation18 + $0x98] sm:$0xff] }
 0x3b5   : > { %3246 = vmatpush.bf16.msrb.mxu2 %v4952_v9  ;;  %3406 = vmatpush.bf16.msra.mxu0 %v4958_v21  ;;  %v4966_v29 = vld [vmem:[#allocation18 + $0xe0] sm:$0xff]  ;;  %v4976_v9 = vld [vmem:[#allocation18 + $0x130] sm:$0xff] }
 0x3b6   : > { %v2614_v36 = vsel %vm853_vm4, %v2609_v30, %v2613_v31  ;;  %v2893_v39 = vsel %vm1133_vm5, %v2883_v19, %v2892_v35  ;;  %v4949_v35 = vld [vmem:[#allocation18 + $0x58] sm:$0xff] }
 0x3b7   : > { %3513 = vmatpush.bf16.msra.mxu1 %v4968_v14  ;;  %3318 = vmatpush.bf16.msrb.mxu3 %v4938_v18 }
 0x3b9   : > { %3247 = vmatpush.bf16.msrb.mxu2 %v4951_v0  ;;  %3407 = vmatpush.bf16.msra.mxu0 %v4957_v22  ;;  %v4974_v0 = vld [vmem:[#allocation18 + $0x120] sm:$0xff] }
 0x3bb   : > { %4998 = vmatpush.bf16.msra.mxu3 %v4961_v57  ;;  %3514 = vmatpush.bf16.msra.mxu1 %v4967_v23 }
 0x3bd   : > { %3248 = vmatpush.bf16.msrb.mxu2 %v4950_v26 }
 0x3bf   : > { %4999 = vmatpush.bf16.msra.mxu3 %v4960_v1  ;;  %3515 = vmatpush.bf16.msra.mxu1 %v4966_v29  ;;  %v4962_v1 = vld [vmem:[#allocation18 + $0xc0] sm:$0xff] }
 0x3c0   : > { %2842 = vmatmul.bf16.gmra.mxu3 %v2778_v33 }
 0x3c1   : > { %3249 = vmatpush.bf16.msrb.mxu2 %v4949_v35 }
 0x3c2   : > { %2678 = vmatmul.bf16.gmra.mxu1 %v2614_v36 }
 0x3c3   : > { %5000 = vmatpush.bf16.msra.mxu3 %v4959_v13  ;;  %3516 = vmatpush.bf16.msra.mxu1 %v4965_v40 }
 0x3c4   : > { %2957 = vmatmul.bf16.gmra.mxu0 %v2893_v39  ;;  %v4956_v39 = vld [vmem:[#allocation18 + $0x90] sm:$0xff] }
 0x3c5   : > { %3408 = vmatpush.bf16.msra.mxu0 %v4956_v39  ;;  %3250 = vmatpush.bf16.msrb.mxu2 %v4948_v42 }
 0x3c7   : > { %5001 = vmatpush.bf16.msra.mxu3 %v4958_v21 }
 0x3c9   : > { %3409 = vmatpush.bf16.msra.mxu0 %v4955_v48 }
 0x3cb   : > { %5002 = vmatpush.bf16.msra.mxu3 %v4957_v22 }
 0x3cf   : > { %5003 = vmatpush.bf16.msra.mxu3 %v4956_v39 }
 0x3d2   : > { %3051 = vmatmul.bf16.vlgmr.msrb.gmra.mxu1 %v2990_v45 }
 0x3d3   : > { %5004 = vmatpush.bf16.msra.mxu3 %v4955_v48 }
 0x3e2   : > { %3056 = vmatmul.bf16.gmra.mxu1 %v2992_v47 }
 0x41f   : > { %v2743_v52 = vpop.f32.mrf.mxu2 }
 0x427   : > { %v2745_v58 = vpop.f32.mrf.mxu2 }
 0x42f   : > { %v2674_v32 = vpop.f32.mrf.mxu1 }
 0x430   : > { %v2744_v56 = vadd.f32 %v2743_v52, %v2674_v32  ;;  %v2748_v15 = vpop.f32.mrf.mxu2 }
 0x431   : > { %v2953_v54 = vpop.f32.mrf.mxu0 }
 0x433   : > { %v2838_v34 = vpop.f32.mrf.mxu3 }
 0x434   : > { %v2848_v59 = vadd.f32 %v2838_v34, %v2744_v56  ;;  %v4963_v56 = vld [vmem:[#allocation18 + $0xc8] sm:$0xff] }
 0x436   : > { %v2963_v3 = vadd.f32 %v2953_v54, %v2848_v59  ;;  %v4954_v54 = vld [vmem:[#allocation18 + $0x80] sm:$0xff] }
 0x437   : > { %v2676_v41 = vpop.f32.mrf.mxu1  ;;  %3410 = vmatpush.bf16.msra.mxu0 %v4954_v54  ;;  %5005 = vmatpush.bf16.msra.mxu3 %v4954_v54 }
 0x438   : > { %v2746_v10 = vadd.f32 %v2745_v58, %v2676_v41  ;;  %v2750_v43 = vpop.f32.mrf.mxu2  ;;  %v4964_v41 = vld [vmem:[#allocation18 + $0xd0] sm:$0xff] }
 0x439   : > { %v2955_v5 = vpop.f32.mrf.mxu0  ;;  %3517 = vmatpush.bf16.msra.mxu1 %v4964_v41 }
 0x43b   : > { %v2840_v61 = vpop.f32.mrf.mxu3 }
 0x43c   : > { %v2849_v16 = vadd.f32 %v2840_v61, %v2746_v10 }
 0x43d   : > { %3518 = vmatpush.bf16.msra.mxu1 %v4963_v56 }
 0x43e   : > { %v2964_v24 = vadd.f32 %v2955_v5, %v2849_v16  ;;  %v4975_v16 = vld [vmem:[#allocation18 + $0x128] sm:$0xff] }
 0x43f   : > { %v2679_v51 = vpop.f32.mrf.mxu1 }
 0x440   : > { %v2749_v27 = vadd.f32 %v2748_v15, %v2679_v51  ;;  %v4947_v51 = vld [vmem:[#allocation18 + $0x48] sm:$0xff] }
 0x441   : > { %v2958_v33 = vpop.f32.mrf.mxu0  ;;  %3251 = vmatpush.bf16.msrb.mxu2 %v4947_v51  ;;  %3519 = vmatpush.bf16.msra.mxu1 %v4962_v1 }
 0x443   : > { %v2843_v20 = vpop.f32.mrf.mxu3 }
 0x444   : > { %v2850_v30 = vadd.f32 %v2843_v20, %v2749_v27  ;;  %v4973_v27 = vld [vmem:[#allocation18 + $0x118] sm:$0xff] }
 0x446   : > { %v2965_v45 = vadd.f32 %v2958_v33, %v2850_v30 }
 0x447   : > { %v6049_v55 = vpop.f32.mrf.mxu1 }
 0x448   : > { %v2751_v49 = vadd.f32 %v2750_v43, %v6049_v55  ;;  %v4946_v55 = vld [vmem:[#allocation18 + $0x40] sm:$0xff] }
 0x449   : > { %v2960_v57 = vpop.f32.mrf.mxu0  ;;  %3252 = vmatpush.bf16.msrb.mxu2 %v4946_v55 }
 0x44b   : > { %v2845_v46 = vpop.f32.mrf.mxu3 }
 0x44c   : > { %v2851_v52 = vadd.f32 %v2845_v46, %v2751_v49 }
 0x44d   : > { %3605 = vmatpush.bf16.msra.mxu2 %v4977_v6 }
 0x44e   : > { %v2966_v59 = vadd.f32 %v2960_v57, %v2851_v52 }
 0x44f   : > { %v3052_v8 = vpop.f32.mrf.mxu1 }
 0x450   : > { %v3062_v11 = vadd.f32 %v3052_v8, %v2963_v3 }
 0x451   : > { %3606 = vmatpush.bf16.msra.mxu2 %v4976_v9 }
 0x452   : > { %v3071_v17 = vmul.f32 %v6054_v4, %v3062_v11 }
 0x454   : > { %v3080_v19 = vadd.f32 %v6059_v12, %v3071_v17 }
 0x455   : > { %3607 = vmatpush.bf16.msra.mxu2 %v4975_v16 }
 0x456   : > { %5189 = vtanh.f32 %v3080_v19 }
 0x457   : > { %v3054_v25 = vpop.f32.mrf.mxu1 }
 0x458   : > { %v3063_v28 = vadd.f32 %v3054_v25, %v2964_v24 }
 0x459   : > { %3608 = vmatpush.bf16.msra.mxu2 %v4974_v0 }
 0x45a   : > { %v3072_v31 = vmul.f32 %v6054_v4, %v3063_v28  ;;  %v4972_v28 = vld [vmem:[#allocation18 + $0x110] sm:$0xff] }
 0x45c   : > { %v5190_v36 = vpop.eup %5189  ;;  %v3081_v38 = vadd.f32 %v6059_v12, %v3072_v31  ;;  %v4971_v31 = vld [vmem:[#allocation18 + $0x108] sm:$0xff] }
 0x45d   : > { %v3088_v37 = vpack.c.bf16 %v5190_v36, %v5190_v36  ;;  %3609 = vmatpush.bf16.msra.mxu2 %v4973_v27 }
 0x45e   : > { %5191 = vtanh.f32 %v3081_v38 }
 0x45f   : > { %v3096_v47 = vrot.slane %v3088_v37, 6  ;;  %v3057_v32 = vpop.f32.mrf.mxu1  ;;  %v4970_v37 = vld [vmem:[#allocation18 + $0x100] sm:$0xff] }
 0x460   : > { %v3064_v50 = vadd.f32 %v3057_v32, %v2965_v45 }
 0x461   : > { %3112 = vst [vmem:[#allocation3] sm:$0xc] %v3096_v47  ;;  %v3097_v60 = vrot.slane %v3096_v47, 4  ;;  %3610 = vmatpush.bf16.msra.mxu2 %v4972_v28 }
 0x462   : > { %3120 = vst [vmem:[#allocation3] sm:$0xc] %v5612_v7  ;;  %v3073_v34 = vmul.f32 %v6054_v4, %v3064_v50 }
 0x464   : > { %v5192_v44 = vpop.eup %5191  ;;  %v3082_v53 = vadd.f32 %v6059_v12, %v3073_v34 }
 0x465   : > { %v3089_v58 = vpack.c.bf16 %v5192_v44, %v5192_v44  ;;  %3611 = vmatpush.bf16.msra.mxu2 %v4971_v31 }
 0x466   : > { %5193 = vtanh.f32 %v3082_v53 }
 0x467   : > { %v3098_v61 = vrot.slane %v3089_v58, 6  ;;  %v3059_v63 = vpop.f32.mrf.mxu1 }
 0x468   : > { %v3065_v2 = vadd.f32 %v3059_v63, %v2966_v59 }
 0x469   : > { %v3099_v3 = vsel %vm5879_vm2, %v3097_v60, %v3098_v61  ;;  %v3100_v13 = vrot.slane %v3098_v61, 4  ;;  %v3327_v18 = vld [vmem:[#allocation3] sm:$0xe]  ;;  %3612 = vmatpush.bf16.msra.mxu2 %v4970_v37 }
 0x46a   : > { %3113 = vst [vmem:[#allocation3 + $0x4] sm:$0xf] %v3099_v3  ;;  %v3074_v8 = vmul.f32 %v6054_v4, %v3065_v2  ;;  %v3346_v20 = vunpack.c.l.b16 %v3327_v18  ;;  %v3529_v6 = vld [vmem:[#allocation3] sm:$0xc] }
 0x46b   : > { %3121 = vst [vmem:[#allocation3 + $0x4] sm:$0xf] %v5612_v7  ;;  %v3548_v9 = vunpack.c.l.b16 %v3529_v6 }
 0x46c   : > { %v5194_v10 = vpop.eup %5193  ;;  %v3083_v11 = vadd.f32 %v6059_v12, %v3074_v8 }
 0x46d   : > { %v3090_v5 = vpack.c.bf16 %v5194_v10, %v5194_v10 }
 0x46e   : > { %5195 = vtanh.f32 %v3083_v11 }
 0x46f   : > { %v3101_v14 = vrot.slane %v3090_v5, 6 }
 0x471   : > { %v3102_v17 = vsel %vm5879_vm2, %v3100_v13, %v3101_v14  ;;  %v3103_v21 = vrot.slane %v3101_v14, 4 }
 0x472   : > { %3114 = vst [vmem:[#allocation3 + $0x8] sm:$0xf] %v3102_v17  ;;  %v6076_v4 = vld [vmem:[#allocation3] sm:$0xff]  }
 0x473   : > { %3122 = vst [vmem:[#allocation3 + $0x8] sm:$0xf] %v5612_v7  ;;  %3319 = vmatmul.bf16.vlgmr.msrb.gmra.mxu3 %v6076_v4  ;;  %v4997_v19 = vunpack.c.h.b16 %v6076_v4  ;;  %v3178_v22 = vshll.u32 %v6076_v4, 16  ;;  %v3176_v62 = vshrl.u32 %v6076_v4, 16 }
 0x474   : > { %v5196_v12 = vpop.eup %5195 }
 0x475   : > { %v3091_v15 = vpack.c.bf16 %v5196_v12, %v5196_v12  ;;  %v3347_v26 = vpack.c.b16 %v4997_v19, %v3346_v20  ;;  %v3180_v33 = vrot.slane %v3178_v22, 1  ;;  %v3549_v10 = vpack.c.b16 %v4997_v19, %v3548_v9 }
 0x477   : > { %v3104_v23 = vrot.slane %v3091_v15, 6  ;;  %v3442_v29 = vshrl.u32 %v3347_v26, 16  ;;  %v3445_v30 = vshll.u32 %v3347_v26, 16  ;;  %v3348_v39 = vrot.slane %v3347_v26, 1 }
 0x478   : > { %v3181_v42 = vor.u32 %v3180_v33, %v3176_v62  ;;  %v3550_v11 = vrot.slane %v3549_v10, 2 }
 0x479   : > { %v3105_v24 = vsel %vm5879_vm2, %v3103_v21, %v3104_v23  ;;  %v3106_v25 = vrot.slane %v3104_v23, 4  ;;  %v3444_v35 = vrot.slane %v3442_v29, 1  ;;  %v3447_v36 = vrot.slane %v3445_v30, 2 }
 0x47a   : > { %3115 = vst [vmem:[#allocation3 + $0xc] sm:$0xf] %v3105_v24 }
 0x47b   : > { %3123 = vst [vmem:[#allocation3 + $0xc] sm:$0x3] %v5612_v7  ;;  %v3448_v47 = vor.u32 %v3447_v36, %v3444_v35 }
 0x47c   : > { %3116 = vst [vmem:[#allocation3 + $0x10] sm:$0x3] %v3106_v25 }
 0x482   : > { %v4937_v38 = vld [vmem:[#allocation3 + $0x8] sm:$0xff] }
 0x483   : > { %v3420_v40 = vld [vmem:[#allocation3 + $0x10] sm:$0x3]  ;;  %3322 = vmatmul.bf16.gmra.mxu3 %v4937_v38  ;;  %v3349_v7 = vrot.slane %v4937_v38, 1  ;;  %v3183_v43 = vshll.u32 %v4937_v38, 16  ;;  %v3187_v45 = vshrl.u32 %v4937_v38, 16  ;;  %v3551_v5 = vrot.slane %v4937_v38, 2 }
 0x484   : > { %v3144_v46 = vld [vmem:[#allocation3 + $0x10] sm:$0x1]  ;;  %v3439_v32 = vunpack.c.l.b16 %v3420_v40 }
 0x485   : > { %v3350_v48 = vsel %vm1033_vm3, %v3348_v39, %v3349_v7  ;;  %v3185_v41 = vrot.slane %v3183_v43, 1  ;;  %v3450_v49 = vrot.slane %v3183_v43, 2  ;;  %v3449_v50 = vrot.slane %v3187_v45, 1 }
 0x486   : > { %3411 = vmatmul.bf16.vlgmr.msra.gmra.mxu0 %v3350_v48  ;;  %v3171_v51 = vunpack.c.l.b16 %v3144_v46  ;;  %v3440_v53 = vpack.c.b16 %v3439_v32, %v3439_v32  ;;  %v3552_v13 = vsel %vm1249_vm6, %v3550_v11, %v3551_v5 }
 0x487   : > { %v3186_v52 = vsel %vm853_vm4, %v3181_v42, %v3185_v41  ;;  %v3451_v34 = vor.u32 %v3450_v49, %v3449_v50  ;;  %v3189_v63 = vor.u32 %v3187_v45, %v3185_v41 }
 0x488   : > { %3253 = vmatmul.bf16.vlgmr.msrb.gmra.mxu2 %v3186_v52  ;;  %v3174_v54 = vpack.c.b16 %v3171_v51, %v3171_v51  ;;  %v3454_v56 = vshrl.u32 %v3440_v53, 16  ;;  %v3457_v57 = vshll.u32 %v3440_v53, 16  ;;  %v3553_v14 = vrot.slane %v3440_v53, 2 }
 0x489   : > { %v3452_v44 = vsel %vm1133_vm5, %v3448_v47, %v3451_v34 }
 0x48a   : > { %3520 = vmatmul.bf16.vlgmr.msra.gmra.mxu1 %v3452_v44  ;;  %v3351_v58 = vrot.slane %v3174_v54, 1  ;;  %v3191_v55 = vshll.u32 %v3174_v54, 16  ;;  %v3456_v59 = vrot.slane %v3454_v56, 1  ;;  %v3459_v60 = vrot.slane %v3457_v57, 2 }
 0x48b   : > { %v3554_v16 = vsel %vm1249_vm6, %v3551_v5, %v3553_v14 }
 0x48c   : > { %v3352_v61 = vsel %vm1033_vm3, %v3349_v7, %v3351_v58  ;;  %v3193_v1 = vrot.slane %v3191_v55, 1  ;;  %v3460_v2 = vor.u32 %v3459_v60, %v3456_v59 }
 0x48e   : > { %v3194_v3 = vsel %vm853_vm4, %v3189_v63, %v3193_v1  ;;  %v3461_v8 = vsel %vm1133_vm5, %v3451_v34, %v3460_v2 }
 0x493   : > { %3414 = vmatmul.bf16.vlgmr.msra.gmra.mxu3 %v3352_v61 }
 0x498   : > { %3256 = vmatmul.bf16.gmra.mxu2 %v3194_v3 }
 0x49a   : > { %3523 = vmatmul.bf16.gmra.mxu1 %v3461_v8 }
 0x4a8   : > { %3613 = vmatmul.bf16.vlgmr.msra.gmra.mxu2 %v3552_v13 }
 0x4b8   : > { %3616 = vmatmul.bf16.gmra.mxu2 %v3554_v16 }
 0x4b9   : > { %5494 = shalt.err (!%p5491_p13)
}
 0x4ba   : > { %5041 = dma.vmem_to_hbm [thread:$0]  (%p5802_p4), %s3650_s21, 128, %s3652_s24, %s3631_s3   ;;  %v3627_v37 = vld [vmem:[%s5875_s2] sm:$0xff] }
 0x4bb   : > { %s6218_s15 = sld [smem:[#allocation42_spill]]  ;;  %s3664_s24 = sshll.u32 %s5875_s2, 4  ;;  %s3665_s24 = int_to_ptr.vmem [resolvable:$true] %s3664_s24 }
 0x4bc   : > { %s6219_s14 = sld [smem:[#allocation44_spill]]  ;;  %s3636_s23 = scalar_lea.sflag [#allocation21], %s5832_s6 }
 0x4c1   : > { %v5164_v36 = vld [vmem:[%s6218_s15] ss:$0 sm:$0xff] }
 0x4c2   : > { %s3662_s21 = scalar_lea.hbm %s6219_s14, %s4760_s4  ;;  %s5515_s20 = scalar_lea.hbm %s6219_s14, 16 }
 0x4c3   : > { %s3666_s3 = sshll.u32 %s3662_s21, 4  ;;  %s3667_s3 = int_to_ptr.hbm [resolvable:$true] %s3666_s3 }
 0x4c4   : > { %s5509_s9 = sshra.s32 %s3667_s3, 4  ;;  %s5510_s9 = int_to_ptr.hbm [resolvable:$true] %s5509_s9 }
 0x4c5   : > { %s5511_s28 = scalar_lea.hbm %s5510_s9, 8  ;;  %p5516_p8 = scmp.lt.s32.totalorder %s5510_s9, %s6219_s14 }
 0x4c6   : > { %p5512_p0 = scmp.ne.s32.totalorder %s5510_s9, %s5511_s28  ;;  %p5517_p1 = scmp.lt.s32.totalorder %s5515_s20, %s5511_s28 }
 0x4c8   : > { %p5513_p2 = pnand %p5512_p0, %p5802_p4  ;;  %p5518_p3 = por %p5517_p1, %p5516_p8 }
 0x4ca   : > { %p5514_p5 = pneg %p5513_p2 }
 0x4cc   : > { %p5519_p9 = pnand %p5518_p3, %p5514_p5 }
 0x4f6   : > { %v3320_v17 = vpop.f32.mrf.mxu3 }
 0x4fe   : > { %v3321_v4 = vpop.f32.mrf.mxu3 }
 0x503   : > { %v3412_v18 = vpop.f32.mrf.mxu0 }
 0x506   : > { %v3323_v12 = vpop.f32.mrf.mxu3 }
 0x507   : > { %v3521_v0 = vpop.f32.mrf.mxu1 }
 0x50b   : > { %v3254_v15 = vpop.f32.mrf.mxu2  ;;  %v3413_v19 = vpop.f32.mrf.mxu0 }
 0x50e   : > { %v3324_v20 = vpop.f32.mrf.mxu3 }
 0x50f   : > { %v3522_v21 = vpop.f32.mrf.mxu1 }
 0x513   : > { %v3255_v23 = vpop.f32.mrf.mxu2 }
 0x516   : > { %v3415_v24 = vpop.f32.mrf.mxu3 }
 0x517   : > { %v3524_v25 = vpop.f32.mrf.mxu1 }
 0x51b   : > { %v3257_v26 = vpop.f32.mrf.mxu2 }
 0x51e   : > { %v3416_v31 = vpop.f32.mrf.mxu3 }
 0x51f   : > { %v3525_v33 = vpop.f32.mrf.mxu1 }
 0x523   : > { %v3258_v27 = vpop.f32.mrf.mxu2 }
 0x524   : > { %v3325_v29 = vadd.f32 %v3324_v20, %v3258_v27 }
 0x526   : > { %v3419_v62 = vadd.f32 %v3416_v31, %v3325_v29 }
 0x528   : > { %v3528_v35 = vadd.f32 %v3525_v33, %v3419_v62 }
 0x52b   : > { %v3614_v28 = vpop.f32.mrf.mxu2 }
 0x533   : > { %v3615_v22 = vpop.f32.mrf.mxu2 }
 0x53b   : > { %v3617_v30 = vpop.f32.mrf.mxu2 }
 0x543   : > { %v3618_v38 = vpop.f32.mrf.mxu2 }
 0x544   : > { %v3621_v39 = vadd.f32 %v3618_v38, %v3528_v35 }
 0x546   : > { %v3626_v40 = vadd.f32 %v5164_v36, %v3621_v39 }
 0x548   : > { %v3628_v7 = vadd.f32 %v3627_v37, %v3626_v40 }
 0x54a   : > { %3629 = vst [vmem:[%s5875_s2] sm:$0xff] %v3628_v7 }
 0x54b   : > { %5522 = shalt.err (!%p5519_p9)
}
 0x54c   : > { %5042 = dma.vmem_to_hbm [thread:$0]  (%p5802_p4), %s3665_s24, 128, %s3667_s3, %s3636_s23  }
 0x54d PF: > { %s3678_s6 = sand.u32 1, %s5581_s25   ;;  %p5075_p10 = pnand %p3883_p6, %p5810_p7 }
 0x54e   : > { %s3679_s2 = scalar_lea.sflag [#allocation6], %s3678_s6 }
 0x54f   : > { %p5076_p11 = pneg %p5075_p10 }
 0x551   : > { %5572 = dma.done.wait (%p5076_p11), %s3679_s2, 128  }
 0x552   : > { %5574 = vsyncadd (%p5076_p11), %s3679_s2, 4294967168  ;;  %s3689_s13 = scalar_lea.sflag [#allocation21], %s3678_s6 }
 0x553   : > { %5576 = dma.done.wait (%p5076_p11), %s3689_s13, 128  }
 0x554   : > { %5578 = vsyncadd (%p5076_p11), %s3689_s13, 4294967168  ;;  %s39_s30 = sadd.s32 1, %s5601_s30   ;;  %s6220_s12 = sld [smem:[#allocation30_spill]] }
 0x555   : > { %p36_p12 = scmp.ge.s32.totalorder %s39_s30, 4   ;;  %s6221_s27 = sld [smem:[#allocation33_spill]] }
 0x556   : > { %s6222_s16 = sld [smem:[#allocation32_spill]]  ;;  %s6223_s25 = smov %s5585_s26 }
 0x557   : > { %s6225_s28 = smov %s5597_s29 }
 0x558   :  { %38 = sbr.rel (!%p36_p12) target bundleno = 25 (0x19), region = 217 }
 0x55a   : > { %s6224_s26 = smov %s6220_s12 }
 0x55c   : > { %s6226_s29 = smov %s6222_s16 }
 0x55d   :  { %3695 = vsyncpa [#allocation5], 1 }
 0x55e   :  { %3697 = vsyncpa [#allocation5 + $0x1], 1 }
 0x55f   :  { %3698 = vsyncpa [#allocation8], 1 }
 0x560   :  { %3700 = vsyncpa [#allocation8 + $0x1], 1 }
 0x561   :  { %3701 = vsyncpa [#allocation11], 1 }
 0x562   :  { %3702 = vsyncpa [#allocation14], 1 }
 0x563   :  { %3703 = vsyncpa [#allocation17], 1 }
 0x564   :  { %3704 = vsyncpa [#allocation6], 1 }
 0x565   :  { %3706 = vsyncpa [#allocation6 + $0x1], 1 }
 0x566   :  { %3707 = vsyncpa [#allocation21], 1 }
 0x567   :  { %3709 = vsyncpa [#allocation21 + $0x1], 1 }

</bundles_post_ra>
